<compile_context>
chip_gen: v7x
topology: tpu7x:2x2x1
jax: 0.10.0
libtpu: 0.0.40
codegen_flags: <defaults>
</compile_context>

<pallas_src>
import functools

import jax
import jax.numpy as jnp
import numpy as np
from jax.experimental import pallas as pl
from jax.experimental.pallas import tpu as pltpu

_K = 8          # coordinate columns padded to 8 so the MXU contraction is aligned
_BIG = 1e30     # additive penalty excluding non-members / padding from the min


def _round_up(x: int, m: int) -> int:
    return ((x + m - 1) // m) * m


def _chunk_width(tj: int) -> int:
    # Largest lane-chunk <= 512 that divides the j tile (tj is a multiple of 128).
    for w in (512, 384, 256, 128):
        if tj % w == 0:
            return w
    return tj


def _hd_kernel(pts_i_ref, aux_i_ref, tab_j_ref, res_ref, min_b_ref, min_a_ref,
               *, n_chunks, tjc):
    j = pl.program_id(1)
    nj = pl.num_programs(1)

    @pl.when(j == 0)
    def _():
        min_b_ref[...] = jnp.full(min_b_ref.shape, jnp.inf, min_b_ref.dtype)
        min_a_ref[...] = jnp.full(min_a_ref.shape, jnp.inf, min_a_ref.dtype)

    ci = pts_i_ref[...]             # (TI, 8)  [coords..., 0-pad]  -- MXU lhs
    norm_i = aux_i_ref[:, 0:1]      # (TI, 1)  |c_i|^2

    # Fully-unrolled static chunk loop: temporaries stay (TI, TJC) and die at the
    # accumulator writes, keeping the vld/vst slots off the critical path.
    for c in range(n_chunks):
        lo, hi = c * tjc, (c + 1) * tjc
        cj = tab_j_ref[0:8, lo:hi]                       # (8, TJC) [-2*coords..., 0]
        # MXU: cross = -2 <c_i, c_j>   (f32, exact for integer grid coords)
        cross = jnp.dot(ci, cj, preferred_element_type=jnp.float32,
                        precision=jax.lax.Precision.HIGHEST)   # (TI, TJC)
        base = cross + norm_i                                  # + |c_i|^2
        # Bias rows carry |c_j|^2 plus the not-in-{B,A} / padding penalty, so the
        # set masking rides the add (no compares / selects in the inner loop).
        min_b_ref[...] = jnp.minimum(min_b_ref[...], base + tab_j_ref[8:9, lo:hi])
        min_a_ref[...] = jnp.minimum(min_a_ref[...], base + tab_j_ref[9:10, lo:hi])

    # After the last j tile: reduce this i tile to one partial max (both directions).
    @pl.when(j == nj - 1)
    def _():
        in_a_i = aux_i_ref[:, 1:2]                           # (TI, 1)
        in_b_i = aux_i_ref[:, 2:3]
        row_min_b = jnp.min(min_b_ref[...], axis=1, keepdims=True)   # (TI, 1)
        row_min_a = jnp.min(min_a_ref[...], axis=1, keepdims=True)
        cand_ab = jnp.max(jnp.where(in_a_i > 0.0, row_min_b, 0.0))   # h(A->B)^2
        cand_ba = jnp.max(jnp.where(in_b_i > 0.0, row_min_a, 0.0))   # h(B->A)^2
        res_ref[...] = jnp.full(res_ref.shape, jnp.maximum(cand_ab, cand_ba),
                                res_ref.dtype)


def hausdorff_distance(output: jax.Array, target: jax.Array) -> jax.Array:
    """Symmetric Hausdorff distance between thresholded `output` and `target`.

    Not wrapped in jax.jit end-to-end: the foreground point count is synced to
    host so the O(P^2) pass runs only over the compacted point set (Pallas grids
    need static shapes; the torch reference is a host-side metric anyway).
    """
    out = jnp.squeeze(jnp.asarray(output))
    tgt = jnp.squeeze(jnp.asarray(target))
    assert out.shape == tgt.shape, (out.shape, tgt.shape)
    shape = out.shape
    ndim = out.ndim
    assert 1 <= ndim <= _K - 1, f"unsupported rank {ndim}"

    in_a = (out > 0.5).reshape(-1)
    in_b = (tgt != 0).reshape(-1)
    in_u = jnp.logical_or(in_a, in_b)

    na = int(jnp.sum(in_a))
    nb = int(jnp.sum(in_b))
    nu = int(jnp.sum(in_u))
    if na == 0 and nb == 0:
        return jnp.asarray(0.0, dtype=jnp.float32)
    if na == 0 or nb == 0:
        return jnp.asarray(jnp.inf, dtype=jnp.float32)

    # ---- tile sizing -------------------------------------------------------
    ti = 512 if nu >= 512 else _round_up(nu, 8)        # i points per grid step
    tj = 2048 if nu >= 2048 else _round_up(nu, 128)    # j points per grid step
    tjc = _chunk_width(tj)                             # in-kernel chunk width
    n_chunks = tj // tjc
    ni_pad = _round_up(nu, ti)
    nj_pad = _round_up(nu, tj)
    m = max(ni_pad, nj_pad)

    # ---- compact the union of foreground points ----------------------------
    # Fill slots reuse point 0: duplicate points never change a min/max distance
    # and non-members are excluded by the flags / penalty rows.
    (idx,) = jnp.nonzero(in_u, size=m, fill_value=0)
    coords = jnp.stack(jnp.unravel_index(idx, shape), axis=-1).astype(jnp.float32)  # (m, nd)
    norm = jnp.sum(coords * coords, axis=-1)                                         # (m,)
    a_sel = in_a[idx].astype(jnp.float32)
    b_sel = in_b[idx].astype(jnp.float32)

    # i-side MXU operand (m, 8): [coords, 0-pad];  aux (m, 3): [|c|^2, inA, inB].
    pts_i = jnp.zeros((m, _K), jnp.float32).at[:, :ndim].set(coords)
    aux_i = jnp.stack([norm, a_sel, b_sel], axis=-1)

    # j-side table (10, m): rows 0..7 = [-2*coords, 0-pad] (MXU rhs);
    # rows 8/9 = |c_j|^2 + penalty-if-not-in-{B,A}.
    tab_j = jnp.zeros((_K + 2, m), jnp.float32)
    tab_j = tab_j.at[:ndim, :].set(-2.0 * coords.T)
    tab_j = tab_j.at[_K, :].set(norm + _BIG * (1.0 - b_sel))
    tab_j = tab_j.at[_K + 1, :].set(norm + _BIG * (1.0 - a_sel))

    n_i_tiles = ni_pad // ti
    kernel = functools.partial(_hd_kernel, n_chunks=n_chunks, tjc=tjc)
    # TODO(synk): scalar-prefetch per-tile point counts to pl.when-skip all-padding
    #             j chunks when nu sits just above a tile boundary.
    partial_max = pl.pallas_call(
        kernel,
        out_shape=jax.ShapeDtypeStruct((n_i_tiles, 8, 128), jnp.float32),
        grid_spec=pltpu.PrefetchScalarGridSpec(
            num_scalar_prefetch=0,
            grid=(n_i_tiles, nj_pad // tj),
            in_specs=[
                pl.BlockSpec((ti, _K), lambda i, j: (i, 0)),       # i coords
                pl.BlockSpec((ti, 3), lambda i, j: (i, 0)),        # i norm + flags
                pl.BlockSpec((_K + 2, tj), lambda i, j: (0, j)),   # j table
            ],
            out_specs=pl.BlockSpec((1, 8, 128), lambda i, j: (i, 0, 0)),
            scratch_shapes=[
                pltpu.VMEM((ti, tjc), jnp.float32),   # running min_{j in B} d^2
                pltpu.VMEM((ti, tjc), jnp.float32),   # running min_{j in A} d^2
            ],
        ),
        compiler_params=pltpu.CompilerParams(
            # i carries no cross-tile state -> parallel (megacore on v7x);
            # j carries the running minima -> arbitrary (reduction axis last).
            dimension_semantics=("parallel", "arbitrary"),
            vmem_limit_bytes=32 * 1024 * 1024,
        ),
    )(pts_i[:ni_pad], aux_i[:ni_pad], tab_j[:, :nj_pad])

    # Clamp guards f32 rounding of d^2 for very large volumes (coords >~ 2^11).
    # TODO(synk): center coordinates in the wrapper to extend exact f32 range.
    return jnp.sqrt(jnp.maximum(jnp.max(partial_max), 0.0))


def _reference_hausdorff(output, target) -> float:
    """Pure numpy reference matching scipy.spatial.distance.directed_hausdorff."""
    out = np.squeeze(np.asarray(output))
    tgt = np.squeeze(np.asarray(target))
    set_a = np.argwhere(np.where(out > 0.5, 1, 0)).astype(np.float64)
    set_b = np.argwhere(tgt).astype(np.float64)
    if set_a.size == 0 and set_b.size == 0:
        return 0.0
    if set_a.size == 0 or set_b.size == 0:
        return float("inf")
    d = np.sqrt(((set_a[:, None, :] - set_b[None, :, :]) ** 2).sum(-1))
    h_ab = d.min(axis=1).max()
    h_ba = d.min(axis=0).max()
    return float(max(h_ab, h_ba))


if __name__ == "__main__":
    key = jax.random.PRNGKey(0)
    k1, k2 = jax.random.split(key)
    # UNet-style output/target pair (NCHW with C=1); squeeze -> (2, 16, 16).
    output = jax.random.uniform(k1, (2, 1, 16, 16), dtype=jnp.float32)
    target = (
        jax.random.uniform(k2, (2, 1, 16, 16), dtype=jnp.float32) > 0.5
    ).astype(jnp.float32)

    result = hausdorff_distance(output, target)
    jax.block_until_ready(result)
    ref = _reference_hausdorff(output, target)
    assert np.allclose(np.asarray(result), ref, rtol=1e-5, atol=1e-5), (result, ref)

    # Sparse masks: exercises the foreground-compaction path (2-D, ragged tiles).
    out2 = jnp.zeros((1, 1, 24, 24), jnp.float32).at[0, 0, 3:6, 4:7].set(1.0)
    tgt2 = jnp.zeros((1, 1, 24, 24), jnp.float32).at[0, 0, 15:20, 10:12].set(1.0)
    result2 = hausdorff_distance(out2, tgt2)
    jax.block_until_ready(result2)
    ref2 = _reference_hausdorff(out2, tgt2)
    assert np.allclose(np.asarray(result2), ref2, rtol=1e-5, atol=1e-5), (result2, ref2)

    print("KERNEL_OK")
</pallas_src>

<mosaic_0001>
module attributes {stable_mosaic.version = 11 : i64} {
  func.func @_hd_kernel(%arg0: i32, %arg1: i32, %arg2: memref<368x8xf32, #tpu.memory_space<vmem>>, %arg3: memref<368x3xf32, #tpu.memory_space<vmem>>, %arg4: memref<10x384xf32, #tpu.memory_space<vmem>>, %arg5: memref<1x8x128xf32, #tpu.memory_space<vmem>>, %arg6: memref<368x384xf32, #tpu.memory_space<vmem>>, %arg7: memref<368x384xf32, #tpu.memory_space<vmem>>) attributes {dimension_semantics = [#tpu.dimension_semantics<parallel>, #tpu.dimension_semantics<arbitrary>], iteration_bounds = array<i64: 1, 1>, scalar_prefetch = 0 : i64, scratch_operands = 2 : i64, tpu.core_type = #tpu.core_type<tc>, window_params = [{transform_indices = @transform_0, window_bounds = array<i64: 368, 8>}, {transform_indices = @transform_1, window_bounds = array<i64: 368, 3>}, {transform_indices = @transform_2, window_bounds = array<i64: 10, 384>}, {transform_indices = @transform_3, window_bounds = array<i64: 1, 8, 128>}]} {
    %c0_i32 = arith.constant 0 : i32
    %0 = arith.cmpi eq, %arg1, %c0_i32 : i32
    %1 = arith.extui %0 : i1 to i32
    %c0_i32_0 = arith.constant 0 : i32
    %2 = arith.cmpi ne, %1, %c0_i32_0 : i32
    scf.if %2 {
      %cst_18 = arith.constant 0x7F800000 : f32
      %24 = vector.broadcast %cst_18 : f32 to vector<368x384xf32>
      %c0_19 = arith.constant 0 : index
      %c0_20 = arith.constant 0 : index
      %25 = vector.load %arg6[%c0_19, %c0_20] : memref<368x384xf32, #tpu.memory_space<vmem>>, vector<368x384xf32>
      tpu.vector_store %arg6[%c0_19, %c0_20], %24 {strides = array<i32>} : memref<368x384xf32, #tpu.memory_space<vmem>>, vector<368x384xf32>,
      %cst_21 = arith.constant 0x7F800000 : f32
      %26 = vector.broadcast %cst_21 : f32 to vector<368x384xf32>
      %c0_22 = arith.constant 0 : index
      %c0_23 = arith.constant 0 : index
      %27 = vector.load %arg7[%c0_22, %c0_23] : memref<368x384xf32, #tpu.memory_space<vmem>>, vector<368x384xf32>
      tpu.vector_store %arg7[%c0_22, %c0_23], %26 {strides = array<i32>} : memref<368x384xf32, #tpu.memory_space<vmem>>, vector<368x384xf32>,
    } else {
    }
    %c0 = arith.constant 0 : index
    %c0_1 = arith.constant 0 : index
    %3 = vector.load %arg2[%c0, %c0_1] : memref<368x8xf32, #tpu.memory_space<vmem>>, vector<368x8xf32>
    %c0_2 = arith.constant 0 : index
    %c0_3 = arith.constant 0 : index
    %4 = vector.load %arg3[%c0_2, %c0_3] : memref<368x3xf32, #tpu.memory_space<vmem>>, vector<368x1xf32>
    %c0_4 = arith.constant 0 : index
    %c0_5 = arith.constant 0 : index
    %5 = vector.load %arg4[%c0_4, %c0_5] : memref<10x384xf32, #tpu.memory_space<vmem>>, vector<8x384xf32>
    %cst = arith.constant dense<0.000000e+00> : vector<368x384xf32>
    %6 = tpu.matmul %3, %5, %cst {dimension_numbers = #tpu.dot_dimension_numbers<[1], [0], [0], [1], [0, 0, 1, 1], [], []>, precision = #tpu.contract_precision<fp32>} : vector<368x8xf32>, vector<8x384xf32>, vector<368x384xf32> -> vector<368x384xf32>
    %7 = vector.broadcast %4 : vector<368x1xf32> to vector<368x384xf32>
    %8 = arith.addf %6, %7 : vector<368x384xf32>
    %c0_6 = arith.constant 0 : index
    %c0_7 = arith.constant 0 : index
    %9 = vector.load %arg6[%c0_6, %c0_7] : memref<368x384xf32, #tpu.memory_space<vmem>>, vector<368x384xf32>
    %c8 = arith.constant 8 : index
    %c0_8 = arith.constant 0 : index
    %10 = vector.load %arg4[%c8, %c0_8] : memref<10x384xf32, #tpu.memory_space<vmem>>, vector<1x384xf32>
    %11 = vector.broadcast %10 : vector<1x384xf32> to vector<368x384xf32>
    %12 = arith.addf %8, %11 : vector<368x384xf32>
    %13 = arith.minimumf %9, %12 : vector<368x384xf32>
    %c0_9 = arith.constant 0 : index
    %c0_10 = arith.constant 0 : index
    %14 = vector.load %arg6[%c0_9, %c0_10] : memref<368x384xf32, #tpu.memory_space<vmem>>, vector<368x384xf32>
    tpu.vector_store %arg6[%c0_9, %c0_10], %13 {strides = array<i32>} : memref<368x384xf32, #tpu.memory_space<vmem>>, vector<368x384xf32>,
    %c0_11 = arith.constant 0 : index
    %c0_12 = arith.constant 0 : index
    %15 = vector.load %arg7[%c0_11, %c0_12] : memref<368x384xf32, #tpu.memory_space<vmem>>, vector<368x384xf32>
    %c9 = arith.constant 9 : index
    %c0_13 = arith.constant 0 : index
    %16 = vector.load %arg4[%c9, %c0_13] : memref<10x384xf32, #tpu.memory_space<vmem>>, vector<1x384xf32>
    %17 = vector.broadcast %16 : vector<1x384xf32> to vector<368x384xf32>
    %18 = arith.addf %8, %17 : vector<368x384xf32>
    %19 = arith.minimumf %15, %18 : vector<368x384xf32>
    %c0_14 = arith.constant 0 : index
    %c0_15 = arith.constant 0 : index
    %20 = vector.load %arg7[%c0_14, %c0_15] : memref<368x384xf32, #tpu.memory_space<vmem>>, vector<368x384xf32>
    tpu.vector_store %arg7[%c0_14, %c0_15], %19 {strides = array<i32>} : memref<368x384xf32, #tpu.memory_space<vmem>>, vector<368x384xf32>,
    %c0_i32_16 = arith.constant 0 : i32
    %21 = arith.cmpi eq, %arg1, %c0_i32_16 : i32
    %22 = arith.extui %21 : i1 to i32
    %c0_i32_17 = arith.constant 0 : i32
    %23 = arith.cmpi ne, %22, %c0_i32_17 : i32
    scf.if %23 {
      %c0_18 = arith.constant 0 : index
      %c1 = arith.constant 1 : index
      %24 = vector.load %arg3[%c0_18, %c1] : memref<368x3xf32, #tpu.memory_space<vmem>>, vector<368x1xf32>
      %c0_19 = arith.constant 0 : index
      %c2 = arith.constant 2 : index
      %25 = vector.load %arg3[%c0_19, %c2] : memref<368x3xf32, #tpu.memory_space<vmem>>, vector<368x1xf32>
      %c0_20 = arith.constant 0 : index
      %c0_21 = arith.constant 0 : index
      %26 = vector.load %arg6[%c0_20, %c0_21] : memref<368x384xf32, #tpu.memory_space<vmem>>, vector<368x384xf32>
      %cst_22 = arith.constant dense<0x7F800000> : vector<368xf32>
      %27 = vector.multi_reduction <minimumf>, %26, %cst_22 [1] : vector<368x384xf32> to vector<368xf32>
      %28 = vector.shape_cast %27 : vector<368xf32> to vector<368x1xf32>
      %c0_23 = arith.constant 0 : index
      %c0_24 = arith.constant 0 : index
      %29 = vector.load %arg7[%c0_23, %c0_24] : memref<368x384xf32, #tpu.memory_space<vmem>>, vector<368x384xf32>
      %cst_25 = arith.constant dense<0x7F800000> : vector<368xf32>
      %30 = vector.multi_reduction <minimumf>, %29, %cst_25 [1] : vector<368x384xf32> to vector<368xf32>
      %31 = vector.shape_cast %30 : vector<368xf32> to vector<368x1xf32>
      %cst_26 = arith.constant 0.000000e+00 : f32
      %32 = vector.broadcast %cst_26 : f32 to vector<368x1xf32>
      %33 = arith.cmpf ogt, %24, %32 : vector<368x1xf32>
      %cst_27 = arith.constant 0.000000e+00 : f32
      %34 = vector.broadcast %cst_27 : f32 to vector<368x1xf32>
      %35 = arith.select %33, %28, %34 : vector<368x1xi1>, vector<368x1xf32>
      %36 = vector.shape_cast %35 : vector<368x1xf32> to vector<1x368x1xf32>
      %cst_28 = arith.constant dense<0xFF800000> : vector<1xf32>
      %37 = vector.multi_reduction <maximumf>, %36, %cst_28 [1, 2] : vector<1x368x1xf32> to vector<1xf32>
      %38 = vector.shape_cast %37 : vector<1xf32> to vector<1x1x1xf32>
      %39 = vector.extract %38[0, 0, 0] : f32 from vector<1x1x1xf32>
      %cst_29 = arith.constant 0.000000e+00 : f32
      %40 = vector.broadcast %cst_29 : f32 to vector<368x1xf32>
      %41 = arith.cmpf ogt, %25, %40 : vector<368x1xf32>
      %cst_30 = arith.constant 0.000000e+00 : f32
      %42 = vector.broadcast %cst_30 : f32 to vector<368x1xf32>
      %43 = arith.select %41, %31, %42 : vector<368x1xi1>, vector<368x1xf32>
      %44 = vector.shape_cast %43 : vector<368x1xf32> to vector<1x368x1xf32>
      %cst_31 = arith.constant dense<0xFF800000> : vector<1xf32>
      %45 = vector.multi_reduction <maximumf>, %44, %cst_31 [1, 2] : vector<1x368x1xf32> to vector<1xf32>
      %46 = vector.shape_cast %45 : vector<1xf32> to vector<1x1x1xf32>
      %47 = vector.extract %46[0, 0, 0] : f32 from vector<1x1x1xf32>
      %48 = arith.maximumf %39, %47 : f32
      %49 = vector.broadcast %48 : f32 to vector<1x8x128xf32>
      %c0_32 = arith.constant 0 : index
      %c0_33 = arith.constant 0 : index
      %c0_34 = arith.constant 0 : index
      %50 = vector.load %arg5[%c0_32, %c0_33, %c0_34] : memref<1x8x128xf32, #tpu.memory_space<vmem>>, vector<1x8x128xf32>
      tpu.vector_store %arg5[%c0_32, %c0_33, %c0_34], %49 {strides = array<i32>} : memref<1x8x128xf32, #tpu.memory_space<vmem>>, vector<1x8x128xf32>,
    } else {
    }
    return
  }
  func.func @transform_0(%arg0: i32, %arg1: i32) -> (i32, i32) {
    %c0_i32 = arith.constant 0 : i32
    %c0_i32_0 = arith.constant 0 : i32
    return %arg0, %c0_i32 : i32, i32
  }
  func.func @transform_1(%arg0: i32, %arg1: i32) -> (i32, i32) {
    %c0_i32 = arith.constant 0 : i32
    %c0_i32_0 = arith.constant 0 : i32
    return %arg0, %c0_i32 : i32, i32
  }
  func.func @transform_2(%arg0: i32, %arg1: i32) -> (i32, i32) {
    %c0_i32 = arith.constant 0 : i32
    %c0_i32_0 = arith.constant 0 : i32
    return %c0_i32, %arg1 : i32, i32
  }
  func.func @transform_3(%arg0: i32, %arg1: i32) -> (i32, i32, i32) {
    %c0_i32 = arith.constant 0 : i32
    %c0_i32_0 = arith.constant 0 : i32
    %c0_i32_1 = arith.constant 0 : i32
    return %arg0, %c0_i32, %c0_i32_0 : i32, i32, i32
  }
}

</mosaic_0001>

<bundles_post_ra>
// kernel: tpu_custom_call.1
= control target key start
LH: loop header
LB: loop body
LE: loop exit
PB: predicated region body
PF: predicated region fallthrough
CT: control target
= control target key end

     0   :  { %vm620_vm0 = vcmask 64512   ;;  %v13995_v5 = vmov 0.0   ;;  %v9574_v15 = vmov 0   ;;  %s13989_s0 = inlined_call_operand.vmem [shape: f32[368,8], index: 0, kind: input, shape index: {}]   ;;  %s13990_s1 = inlined_call_operand.vmem [shape: f32[368,3], index: 1, kind: input, shape index: {}]   ;;  %s13991_s2 = inlined_call_operand.vmem [shape: f32[10,384], index: 2, kind: input, shape index: {}]   ;;  %s13992_s3 = inlined_call_operand.hbm [shape: f32[1,8,128], index: 3, kind: output, shape index: {}]  }
   0x1   :  { %v388_v0 = vld [vmem:[%s13991_s2 + $0x8] sm:$0xff]  ;;  %v387_v1 = vld [vmem:[%s13991_s2] sm:$0xff]  ;;  %825 = vmatprep.mubr.f32.mxu1 %v13995_v5  ;;  %1406 = vmatprep.mubr.f32.mxu0 %v13995_v5  ;;  %v297_v8 = vld [vmem:[%s13989_s0 + $0x10] sm:$0xff] }
   0x2   :  { %v295_v2 = vld [vmem:[%s13989_s0] sm:$0xff]  ;;  %v9605_v3 = vand.u32 4294901760, %v388_v0  ;;  %v9607_v4 = vand.u32 4294901760, %v387_v1  ;;  %v296_v7 = vld [vmem:[%s13989_s0 + $0x8] sm:$0xff]  ;;  %v298_v9 = vld [vmem:[%s13989_s0 + $0x18] sm:$0xff]  ;;  %v628_v12 = vsel %vm620_vm0, %v297_v8, 0  ;;  %9547 = vset.pattern.permute.xlu0 %v9574_v15  ;;  %9548 = vset.pattern.permute.xlu1 %v9574_v15 }
   0x3   :  { %v622_v6 = vsel %vm620_vm0, %v295_v2, 0  ;;  %v625_v11 = vsel %vm620_vm0, %v296_v7, 0  ;;  %v631_v13 = vsel %vm620_vm0, %v298_v9, 0  ;;  %v299_v14 = vld [vmem:[%s13989_s0 + $0x20] sm:$0xff]  ;;  %v9638_v19 = vand.u32 4294901760, %v628_v12  ;;  %v300_v23 = vld [vmem:[%s13989_s0 + $0x28] sm:$0xff] }
   0x4   :  { %14405 = vst [vmem:[#allocation7_spill] sm:$0xff] %v9605_v3  ;;  %14406 = vst [vmem:[#allocation8_spill] sm:$0xff] %v9607_v4  ;;  %v9621_v10 = vand.u32 4294901760, %v622_v6  ;;  %760 = vmatprep.subr.mxu1 %v9605_v3  ;;  %v9631_v16 = vsub.f32 %v388_v0, %v9605_v3  ;;  %v9634_v17 = vsub.f32 %v387_v1, %v9607_v4  ;;  %v9636_v18 = vand.u32 4294901760, %v625_v11  ;;  %v341_v37 = vld [vmem:[%s13990_s1] sm:$0xff]  ;;  %v343_v41 = vld [vmem:[%s13990_s1 + $0x10] sm:$0xff] }
   0x5   :  { %14410 = vst [vmem:[#allocation12_spill] sm:$0xff] %v9638_v19  ;;  %762 = vmatpush1.msra.mxu1 %v9607_v4  ;;  %v9644_v21 = vand.u32 4294901760, %v631_v13  ;;  %v634_v22 = vsel %vm620_vm0, %v299_v14, 0  ;;  %v9656_v27 = vsub.f32 %v628_v12, %v9638_v19  ;;  %v637_v32 = vsel %vm620_vm0, %v300_v23, 0  ;;  %392 = vperm.xlu0 %9547, %v341_v37   ;;  %v301_v43 = vld [vmem:[%s13989_s0 + $0x30] sm:$0xff]  ;;  %v342_v49 = vld [vmem:[%s13990_s1 + $0x8] sm:$0xff] }
   0x6   :  { %14407 = vst [vmem:[#allocation9_spill] sm:$0xff] %v9621_v10  ;;  %14408 = vst [vmem:[#allocation10_spill] sm:$0xff] %v9634_v17  ;;  %v9642_v20 = vsub.f32 %v622_v6, %v9621_v10  ;;  %v13994_v24 = vand.u32 4294901760, %v9631_v16  ;;  %v13993_v25 = vand.u32 4294901760, %v9634_v17  ;;  %v9653_v26 = vsub.f32 %v625_v11, %v9636_v18  ;;  %402 = vperm.xlu1 %9548, %v343_v41   ;;  %v302_v51 = vld [vmem:[%s13989_s0 + $0x38] sm:$0xff]  ;;  %v345_v58 = vld [vmem:[%s13990_s1 + $0x20] sm:$0xff] }
   0x7   :  { %14409 = vst [vmem:[#allocation11_spill] sm:$0xff] %v9636_v18  ;;  %14412 = vst [vmem:[#allocation14_spill] sm:$0xff] %v9644_v21  ;;  %v9674_v34 = vand.u32 4294901760, %v9656_v27  ;;  %v9677_v35 = vsub.f32 %v631_v13, %v9644_v21  ;;  %v9679_v36 = vand.u32 4294901760, %v634_v22  ;;  %v9694_v44 = vand.u32 4294901760, %v637_v32  ;;  %v344_v53 = vld [vmem:[%s13990_s1 + $0x18] sm:$0xff] }
   0x8   :  { %14411 = vst [vmem:[#allocation13_spill] sm:$0xff] %v9642_v20  ;;  %14413 = vst [vmem:[#allocation15_spill] sm:$0xff] %v9653_v26  ;;  %v9659_v28 = vand.u32 4294901760, %v9642_v20  ;;  %v1335_v29 = vsub.f32 %v9631_v16, %v13994_v24  ;;  %v1341_v30 = vsub.f32 %v9634_v17, %v13993_v25  ;;  %v9668_v31 = vand.u32 4294901760, %v9653_v26  ;;  %v303_v60 = vld [vmem:[%s13989_s0 + $0x40] sm:$0xff] }
   0x9   :  { %14414 = vst [vmem:[#allocation16_spill] sm:$0xff] %v9656_v27  ;;  %14417 = vst [vmem:[#allocation19_spill] sm:$0xff] %v9674_v34  ;;  %v851_v46 = vsub.f32 %v9656_v27, %v9674_v34  ;;  %v9702_v47 = vand.u32 4294901760, %v9677_v35  ;;  %v9705_v48 = vsub.f32 %v634_v22, %v9679_v36  ;;  %v640_v50 = vsel %vm620_vm0, %v301_v43, 0  ;;  %397 = vperm.xlu0 %9547, %v342_v49  }
   0xa   :  { %14415 = vst [vmem:[#allocation17_spill] sm:$0xff] %v9659_v28  ;;  %14416 = vst [vmem:[#allocation18_spill] sm:$0xff] %v9668_v31  ;;  %v829_v33 = vsub.f32 %v9642_v20, %v9659_v28  ;;  %v1336_v38 = vand.u32 4294901760, %v1335_v29  ;;  %v1342_v39 = vand.u32 4294901760, %v1341_v30  ;;  %v840_v40 = vsub.f32 %v9653_v26, %v9668_v31  ;;  %407 = vperm.xlu1 %9548, %v344_v53  }
   0xb   :  { %14418 = vst [vmem:[#allocation20_spill] sm:$0xff] %v9677_v35  ;;  %14419 = vst [vmem:[#allocation21_spill] sm:$0xff] %v9679_v36  ;;  %v9718_v52 = vsub.f32 %v637_v32, %v9694_v44  ;;  %v9725_v54 = vand.u32 4294901760, %v851_v46  ;;  %v862_v55 = vsub.f32 %v9677_v35, %v9702_v47  ;;  %v9730_v56 = vand.u32 4294901760, %v9705_v48 }
   0xc   :  { %v9689_v42 = vand.u32 4294901760, %v829_v33  ;;  %1337 = vmatprep.subr.mxu0 %v1336_v38  ;;  %8710 = vmatprep.subr.mxu1 %v1336_v38  ;;  %14421 = vst [vmem:[#allocation23_spill] sm:$0xff] %v9694_v44  ;;  %v9697_v45 = vand.u32 4294901760, %v840_v40  ;;  %14423 = vst [vmem:[#allocation25_spill] sm:$0xff] %v9702_v47  ;;  %v9732_v57 = vand.u32 4294901760, %v640_v50  ;;  %v643_v59 = vsel %vm620_vm0, %v302_v51, 0 }
   0xd   :  { %1343 = vmatpush1.msra.mxu0 %v1342_v39  ;;  %14424 = vst [vmem:[#allocation26_spill] sm:$0xff] %v9705_v48  ;;  %14425 = vst [vmem:[#allocation27_spill] sm:$0xff] %v9718_v52 }
   0xe   :  { %14420 = vst [vmem:[#allocation22_spill] sm:$0xff] %v9689_v42  ;;  %831 = vmatmul.mubr.f32.vlgmr.msra.gmra.mrb[0].mxu1 %v9689_v42  ;;  %14422 = vst [vmem:[#allocation24_spill] sm:$0xff] %v9697_v45  ;;  %1408 = vmatmul.mubr.f32.vlgmr.msra.gmra.mrb[0].mxu0 %v9621_v10 }
   0xf   :  { %8711 = vmatpush1.msra.mxu1 %v1342_v39  ;;  %836 = vmatprep.mubr.f32.mxu1 %v13995_v5  ;;  %14426 = vst [vmem:[#allocation28_spill] sm:$0xff] %v9725_v54  ;;  %14427 = vst [vmem:[#allocation29_spill] sm:$0xff] %v9730_v56 }
  0x10   :  { %1413 = vmatprep.mubr.f32.mxu0 %v13995_v5  ;;  %1731 = vmatprep.subr.mxu0 %v9631_v16  ;;  %14428 = vst [vmem:[#allocation30_spill] sm:$0xff] %v9732_v57 }
  0x11   :  { %1734 = vmatpush1.msra.mxu0 %v9634_v17 }
  0x12   :  { %842 = vmatmul.mubr.f32.gmra.mrb[2].mxu1 %v9697_v45  ;;  %1415 = vmatmul.mubr.f32.gmra.mrb[2].mxu0 %v9636_v18 }
  0x13   :  { %847 = vmatprep.mubr.f32.mxu1 %v13995_v5  ;;  %1420 = vmatprep.mubr.f32.mxu0 %v13995_v5 }
  0x14   :  { %8 = vsyncpa [#allocation5], 0  ;;  %v9746_v61 = vand.u32 4294901760, %v9718_v52  ;;  %412 = vperm.xlu0 %9547, %v345_v58   ;;  %v346_v62 = vld [vmem:[%s13990_s1 + $0x28] sm:$0xff]  ;;  %2167 = vmatprep.subr.mxu0 %v9605_v3  ;;  %v9753_v63 = vand.u32 4294901760, %v862_v55  ;;  %v873_v0 = vsub.f32 %v9705_v48, %v9730_v56  ;;  %v9758_v1 = vsub.f32 %v640_v50, %v9732_v57  ;;  %v347_v6 = vld [vmem:[%s13990_s1 + $0x30] sm:$0xff] }
  0x15   :  { %v9760_v2 = vand.u32 4294901760, %v643_v59  ;;  %v646_v7 = vsel %vm620_vm0, %v303_v60, 0  ;;  %v304_v8 = vld [vmem:[%s13989_s0 + $0x48] sm:$0xff]  ;;  %417 = vperm.xlu1 %9548, %v346_v62   ;;  %v348_v11 = vld [vmem:[%s13990_s1 + $0x38] sm:$0xff]  ;;  %v305_v22 = vld [vmem:[%s13989_s0 + $0x50] sm:$0xff]  ;;  %vm7735_vm4 = vcmask 15368  }
  0x16   :  { %14429 = vst [vmem:[#allocation31_spill] sm:$0xff] %v9746_v61  ;;  %853 = vmatmul.mubr.f32.gmra.mrb[4].mxu1 %v9725_v54  ;;  %14430 = vst [vmem:[#allocation32_spill] sm:$0xff] %v9753_v63  ;;  %1422 = vmatmul.mubr.f32.gmra.mrb[4].mxu0 %v9638_v19  ;;  %v884_v9 = vsub.f32 %v9718_v52, %v9746_v61  ;;  %v9778_v12 = vand.u32 4294901760, %v873_v0  ;;  %v9781_v13 = vand.u32 4294901760, %v9758_v1  ;;  %v9786_v15 = vand.u32 4294901760, %v646_v7  ;;  %v349_v23 = vld [vmem:[%s13990_s1 + $0x40] sm:$0xff] }
  0x17   :  { %14431 = vst [vmem:[#allocation33_spill] sm:$0xff] %v9758_v1  ;;  %14432 = vst [vmem:[#allocation34_spill] sm:$0xff] %v9760_v2  ;;  %858 = vmatprep.mubr.f32.mxu1 %v13995_v5  ;;  %1427 = vmatprep.mubr.f32.mxu0 %v13995_v5  ;;  %v9784_v14 = vsub.f32 %v643_v59, %v9760_v2  ;;  %v649_v29 = vsel %vm620_vm0, %v304_v8, 0  ;;  %v652_v32 = vsel %vm620_vm0, %v305_v22, 0  ;;  %v350_v33 = vld [vmem:[%s13990_s1 + $0x48] sm:$0xff]  ;;  %v306_v41 = vld [vmem:[%s13989_s0 + $0x58] sm:$0xff] }
  0x18   :  { %422 = vperm.xlu0 %9547, %v347_v6   ;;  %14433 = vst [vmem:[#allocation35_spill] sm:$0xff] %v9778_v12  ;;  %14434 = vst [vmem:[#allocation36_spill] sm:$0xff] %v9781_v13  ;;  %v9798_v30 = vand.u32 4294901760, %v884_v9  ;;  %v895_v37 = vsub.f32 %v9758_v1, %v9781_v13  ;;  %v9811_v39 = vsub.f32 %v646_v7, %v9786_v15  ;;  %v9813_v40 = vand.u32 4294901760, %v649_v29  ;;  %v351_v43 = vld [vmem:[%s13990_s1 + $0x50] sm:$0xff]  ;;  %v352_v50 = vld [vmem:[%s13990_s1 + $0x58] sm:$0xff] }
  0x19   :  { %14435 = vst [vmem:[#allocation37_spill] sm:$0xff] %v9784_v14  ;;  %14436 = vst [vmem:[#allocation38_spill] sm:$0xff] %v9786_v15  ;;  %427 = vperm.xlu1 %9548, %v348_v11   ;;  %v9808_v38 = vand.u32 4294901760, %v9784_v14  ;;  %v9824_v46 = vand.u32 4294901760, %v652_v32  ;;  %v655_v49 = vsel %vm620_vm0, %v306_v41, 0  ;;  %v307_v59 = vld [vmem:[%s13989_s0 + $0x60] sm:$0xff] }
  0x1a   :  { %864 = vmatmul.mubr.f32.gmra.mrb[6].mxu1 %v9753_v63  ;;  %1429 = vmatmul.mubr.f32.gmra.mrb[6].mxu0 %v9644_v21  ;;  %14437 = vst [vmem:[#allocation39_spill] sm:$0xff] %v9798_v30  ;;  %14439 = vst [vmem:[#allocation41_spill] sm:$0xff] %v9811_v39  ;;  %v9831_v51 = vand.u32 4294901760, %v895_v37  ;;  %v9836_v55 = vand.u32 4294901760, %v9811_v39  ;;  %v9839_v58 = vsub.f32 %v649_v29, %v9813_v40  ;;  %v353_v60 = vld [vmem:[%s13990_s1 + $0x60] sm:$0xff]  ;;  %v9850_v62 = vand.u32 4294901760, %v655_v49 }
  0x1b   :  { %869 = vmatprep.mubr.f32.mxu1 %v13995_v5  ;;  %1434 = vmatprep.mubr.f32.mxu0 %v13995_v5  ;;  %14438 = vst [vmem:[#allocation40_spill] sm:$0xff] %v9808_v38  ;;  %14440 = vst [vmem:[#allocation42_spill] sm:$0xff] %v9813_v40  ;;  %v906_v53 = vsub.f32 %v9784_v14, %v9808_v38  ;;  %v658_v0 = vsel %vm620_vm0, %v307_v59, 0  ;;  %v354_v6 = vld [vmem:[%s13990_s1 + $0x68] sm:$0xff]  ;;  %v9865_v11 = vsub.f32 %v652_v32, %v9824_v46  ;;  %v355_v22 = vld [vmem:[%s13990_s1 + $0x70] sm:$0xff]  ;;  %vm7882_vm6 = vcmask 23568  }
  0x1c   :  { %432 = vperm.xlu0 %9547, %v349_v23   ;;  %14441 = vst [vmem:[#allocation43_spill] sm:$0xff] %v9824_v46  ;;  %14442 = vst [vmem:[#allocation44_spill] sm:$0xff] %v9831_v51  ;;  %v917_v8 = vsub.f32 %v9811_v39, %v9836_v55  ;;  %v9862_v9 = vand.u32 4294901760, %v9839_v58  ;;  %v308_v23 = vld [vmem:[%s13989_s0 + $0x68] sm:$0xff]  ;;  %v9877_v29 = vsub.f32 %v655_v49, %v9850_v62  ;;  %v9879_v32 = vand.u32 4294901760, %v658_v0  ;;  %v357_v49 = vld [vmem:[%s13990_s1 + $0x80] sm:$0xff] }
  0x1d   :  { %437 = vperm.xlu1 %9548, %v350_v33   ;;  %14443 = vst [vmem:[#allocation45_spill] sm:$0xff] %v9836_v55  ;;  %14444 = vst [vmem:[#allocation46_spill] sm:$0xff] %v9839_v58  ;;  %v9857_v7 = vand.u32 4294901760, %v906_v53  ;;  %v356_v33 = vld [vmem:[%s13990_s1 + $0x78] sm:$0xff]  ;;  %v309_v53 = vld [vmem:[%s13989_s0 + $0x70] sm:$0xff] }
  0x1e   :  { %875 = vmatmul.mubr.f32.gmra.mrb[8].mxu1 %v9778_v12  ;;  %1436 = vmatmul.mubr.f32.gmra.mrb[8].mxu0 %v9679_v36  ;;  %14445 = vst [vmem:[#allocation47_spill] sm:$0xff] %v9850_v62  ;;  %14447 = vst [vmem:[#allocation49_spill] sm:$0xff] %v9862_v9  ;;  %v9885_v37 = vand.u32 4294901760, %v917_v8  ;;  %v928_v41 = vsub.f32 %v9839_v58, %v9862_v9  ;;  %v9903_v59 = vand.u32 4294901760, %v9877_v29  ;;  %v360_v24 = vld [vmem:[%s13990_s1 + $0x98] sm:$0xff]  ;;  %v335_v31 = vld [vmem:[%s13989_s0 + $0x140] sm:$0xff] }
  0x1f   :  { %880 = vmatprep.mubr.f32.mxu1 %v13995_v5  ;;  %1441 = vmatprep.mubr.f32.mxu0 %v13995_v5  ;;  %14446 = vst [vmem:[#allocation48_spill] sm:$0xff] %v9857_v7  ;;  %14448 = vst [vmem:[#allocation50_spill] sm:$0xff] %v9865_v11  ;;  %v337_v17 = vld [vmem:[%s13989_s0 + $0x150] sm:$0xff]  ;;  %v339_v28 = vld [vmem:[%s13989_s0 + $0x160] sm:$0xff] }
  0x20   :  { %442 = vperm.xlu0 %9547, %v351_v43   ;;  %14449 = vst [vmem:[#allocation51_spill] sm:$0xff] %v9877_v29  ;;  %14450 = vst [vmem:[#allocation52_spill] sm:$0xff] %v9879_v32  ;;  %v9890_v43 = vand.u32 4294901760, %v9865_v11  ;;  %v9912_v8 = vand.u32 4294901760, %v928_v41  ;;  %v310_v41 = vld [vmem:[%s13989_s0 + $0x78] sm:$0xff] }
  0x21   :  { %447 = vperm.xlu1 %9548, %v352_v50   ;;  %14451 = vst [vmem:[#allocation53_spill] sm:$0xff] %v9885_v37  ;;  %v661_v50 = vsel %vm620_vm0, %v308_v23, 0  ;;  %14453 = vst [vmem:[#allocation55_spill] sm:$0xff] %v9903_v59 }
  0x22   :  { %886 = vmatmul.mubr.f32.gmra.mrb[10].mxu1 %v9798_v30  ;;  %1443 = vmatmul.mubr.f32.gmra.mrb[10].mxu0 %v9694_v44  ;;  %14452 = vst [vmem:[#allocation54_spill] sm:$0xff] %v9890_v43  ;;  %14455 = vst [vmem:[#allocation57_spill] sm:$0xff] %v9912_v8  ;;  %v9916_v23 = vand.u32 4294901760, %v661_v50 }
  0x23   :  { %891 = vmatprep.mubr.f32.mxu1 %v13995_v5  ;;  %1448 = vmatprep.mubr.f32.mxu0 %v13995_v5 }
  0x24   :  { %452 = vperm.xlu0 %9547, %v353_v60   ;;  %v9906_v60 = vsub.f32 %v658_v0, %v9879_v32  ;;  %14456 = vst [vmem:[#allocation58_spill] sm:$0xff] %v9916_v23  ;;  %v664_v0 = vsel %vm620_vm0, %v309_v53, 0 }
  0x25   :  { %457 = vperm.xlu1 %9548, %v354_v6   ;;  %v358_v6 = vld [vmem:[%s13990_s1 + $0x88] sm:$0xff] }
  0x26   :  { %897 = vmatmul.mubr.f32.gmra.mrb[12].mxu1 %v9831_v51  ;;  %1450 = vmatmul.mubr.f32.gmra.mrb[12].mxu0 %v9732_v57  ;;  %14454 = vst [vmem:[#allocation56_spill] sm:$0xff] %v9906_v60  ;;  %v9931_v25 = vand.u32 4294901760, %v9906_v60 }
  0x27   :  { %902 = vmatprep.mubr.f32.mxu1 %v13995_v5  ;;  %1455 = vmatprep.mubr.f32.mxu0 %v13995_v5 }
  0x28   :  { %462 = vperm.xlu0 %9547, %v355_v22   ;;  %v939_v22 = vsub.f32 %v9865_v11, %v9890_v43  ;;  %14457 = vst [vmem:[#allocation59_spill] sm:$0xff] %v9931_v25  ;;  %v961_v57 = vsub.f32 %v9906_v60, %v9931_v25 }
  0x29   :  { %467 = vperm.xlu1 %9548, %v356_v33   ;;  %v359_v33 = vld [vmem:[%s13990_s1 + $0x90] sm:$0xff] }
  0x2a   :  { %908 = vmatmul.mubr.f32.gmra.mrb[14].mxu1 %v9857_v7  ;;  %1457 = vmatmul.mubr.f32.gmra.mrb[14].mxu0 %v9760_v2  ;;  %v9937_v53 = vand.u32 4294901760, %v939_v22  ;;  %v667_v2 = vsel %vm620_vm0, %v310_v41, 0  ;;  %v311_v22 = vld [vmem:[%s13989_s0 + $0x80] sm:$0xff] }
  0x2b   :  { %913 = vmatprep.mubr.f32.mxu1 %v13995_v5  ;;  %1462 = vmatprep.mubr.f32.mxu0 %v13995_v5  ;;  %v9968_v36 = vand.u32 4294901760, %v667_v2 }
  0x2c   :  { %472 = vperm.xlu0 %9547, %v357_v49   ;;  %v950_v49 = vsub.f32 %v9877_v29, %v9903_v59  ;;  %14458 = vst [vmem:[#allocation60_spill] sm:$0xff] %v9937_v53 }
  0x2d   :  { %477 = vperm.xlu1 %9548, %v358_v6   ;;  %v361_v6 = vld [vmem:[%s13990_s1 + $0xa0] sm:$0xff]  ;;  %14465 = vst [vmem:[#allocation66_spill] sm:$0xff] %v9968_v36  ;;  %v9991_v19 = vsub.f32 %v667_v2, %v9968_v36 }
  0x2e   :  { %919 = vmatmul.mubr.f32.gmra.mrb[16].mxu1 %v9885_v37  ;;  %1464 = vmatmul.mubr.f32.gmra.mrb[16].mxu0 %v9786_v15  ;;  %v9942_v15 = vand.u32 4294901760, %v664_v0 }
  0x2f   :  { %924 = vmatprep.mubr.f32.mxu1 %v13995_v5  ;;  %1469 = vmatprep.mubr.f32.mxu0 %v13995_v5  ;;  %v9940_v5 = vsub.f32 %v661_v50, %v9916_v23  ;;  %v9954_v50 = vand.u32 4294901760, %v950_v49  ;;  %v363_v49 = vld [vmem:[%s13990_s1 + $0xb0] sm:$0xff]  ;;  %14469 = vst [vmem:[#allocation70_spill] sm:$0xff] %v9991_v19 }
  0x30   :  { %482 = vperm.xlu0 %9547, %v359_v33   ;;  %14460 = vst [vmem:[#allocation62_spill] sm:$0xff] %v9942_v15  ;;  %v14461_v33 = vmov 0.0   ;;  %v9966_v44 = vsub.f32 %v664_v0, %v9942_v15 }
  0x31   :  { %14459 = vst [vmem:[#allocation61_spill] sm:$0xff] %v9940_v5  ;;  %487 = vperm.xlu1 %9548, %v360_v24   ;;  %14462 = vst [vmem:[#allocation63_spill] sm:$0xff] %v9954_v50  ;;  %v9963_v41 = vand.u32 4294901760, %v9940_v5  ;;  %v670_v24 = vsel %vm620_vm0, %v311_v22, 0  ;;  %v9983_v22 = vand.u32 4294901760, %v961_v57 }
  0x32   :  { %930 = vmatmul.mubr.f32.gmra.mrb[18].mxu1 %v9912_v8  ;;  %1471 = vmatmul.mubr.f32.gmra.mrb[18].mxu0 %v9813_v40  ;;  %v362_v40 = vld [vmem:[%s13990_s1 + $0xa8] sm:$0xff]  ;;  %14464 = vst [vmem:[#allocation65_spill] sm:$0xff] %v9966_v44  ;;  %v9980_v0 = vand.u32 4294901760, %v670_v24  ;;  %v9988_v21 = vand.u32 4294901760, %v9966_v44 }
  0x33   :  { %935 = vmatprep.mubr.f32.mxu1 %v14461_v33  ;;  %1476 = vmatprep.mubr.f32.mxu0 %v14461_v33  ;;  %14463 = vst [vmem:[#allocation64_spill] sm:$0xff] %v9963_v41  ;;  %14467 = vst [vmem:[#allocation68_spill] sm:$0xff] %v9983_v22 }
  0x34   :  { %492 = vperm.xlu0 %9547, %v361_v6   ;;  %v312_v6 = vld [vmem:[%s13989_s0 + $0x88] sm:$0xff]  ;;  %14466 = vst [vmem:[#allocation67_spill] sm:$0xff] %v9980_v0  ;;  %14468 = vst [vmem:[#allocation69_spill] sm:$0xff] %v9988_v21  ;;  %v983_v10 = vsub.f32 %v9966_v44, %v9988_v21 }
  0x35   :  { %497 = vperm.xlu1 %9548, %v362_v40   ;;  %v313_v40 = vld [vmem:[%s13989_s0 + $0x90] sm:$0xff]  ;;  %v673_v57 = vsel %vm620_vm0, %v312_v6, 0  ;;  %v314_v6 = vld [vmem:[%s13989_s0 + $0x98] sm:$0xff] }
  0x36   :  { %941 = vmatmul.mubr.f32.gmra.mrb[20].mxu1 %v9937_v53  ;;  %1478 = vmatmul.mubr.f32.gmra.mrb[20].mxu0 %v9824_v46  ;;  %v972_v46 = vsub.f32 %v9940_v5, %v9963_v41  ;;  %v676_v18 = vsel %vm620_vm0, %v313_v40, 0  ;;  %v10012_v41 = vand.u32 4294901760, %v673_v57  ;;  %v10024_v40 = vand.u32 4294901760, %v983_v10  ;;  %v315_v10 = vld [vmem:[%s13989_s0 + $0xa0] sm:$0xff] }
  0x37   :  { %946 = vmatprep.mubr.f32.mxu1 %v14461_v33  ;;  %1483 = vmatprep.mubr.f32.mxu0 %v14461_v33  ;;  %v323_v53 = vld [vmem:[%s13989_s0 + $0xe0] sm:$0xff] }
  0x38   :  { %502 = vperm.xlu0 %9547, %v363_v49   ;;  %v10001_v49 = vsub.f32 %v670_v24, %v9980_v0  ;;  %v10005_v2 = vand.u32 4294901760, %v972_v46  ;;  %14473 = vst [vmem:[#allocation74_spill] sm:$0xff] %v10012_v41  ;;  %v10020_v46 = vand.u32 4294901760, %v676_v18  ;;  %v679_v24 = vsel %vm620_vm0, %v314_v6, 0  ;;  %14475 = vst [vmem:[#allocation76_spill] sm:$0xff] %v10024_v40  ;;  %v10039_v6 = vld [vmem:[%s13991_s2 + $0x10] sm:$0xff] }
  0x39   :  { %v10059_v9 = vand.u32 4294901760, %v10039_v6 }
  0x3a   :  { %952 = vmatmul.mubr.f32.gmra.mrb[22].mxu1 %v9954_v50  ;;  %1485 = vmatmul.mubr.f32.gmra.mrb[22].mxu0 %v9850_v62  ;;  %14470 = vst [vmem:[#allocation71_spill] sm:$0xff] %v10001_v49  ;;  %14471 = vst [vmem:[#allocation72_spill] sm:$0xff] %v10005_v2  ;;  %v10010_v62 = vand.u32 4294901760, %v9991_v19  ;;  %v10029_v25 = vand.u32 4294901760, %v10001_v49  ;;  %v321_v50 = vld [vmem:[%s13989_s0 + $0xd0] sm:$0xff] }
  0x3b   :  { %957 = vmatprep.mubr.f32.mxu1 %v14461_v33  ;;  %1490 = vmatprep.mubr.f32.mxu0 %v14461_v33  ;;  %14474 = vst [vmem:[#allocation75_spill] sm:$0xff] %v10020_v46 }
  0x3c   :  { %14472 = vst [vmem:[#allocation73_spill] sm:$0xff] %v10010_v62  ;;  %v994_v21 = vsub.f32 %v9991_v19, %v10010_v62  ;;  %14476 = vst [vmem:[#allocation77_spill] sm:$0xff] %v10029_v25  ;;  %v10046_v62 = vsub.f32 %v676_v18, %v10020_v46  ;;  %v1005_v59 = vsub.f32 %v10001_v49, %v10029_v25  ;;  %v682_v18 = vsel %vm620_vm0, %v315_v10, 0 }
  0x3d   :  { %8284 = vmatprep.subr.mxu1 %v10059_v9  ;;  %v10080_v38 = vand.u32 4294901760, %v682_v18 }
  0x3e   :  { %963 = vmatmul.mubr.f32.gmra.mrb[24].mxu1 %v9983_v22  ;;  %1492 = vmatmul.mubr.f32.gmra.mrb[24].mxu0 %v9879_v32  ;;  %v10032_v32 = vsub.f32 %v673_v57, %v10012_v41  ;;  %14478 = vst [vmem:[#allocation79_spill] sm:$0xff] %v10046_v62  ;;  %v10048_v57 = vand.u32 4294901760, %v679_v24  ;;  %v10073_v55 = vand.u32 4294901760, %v1005_v59  ;;  %v10078_v10 = vand.u32 4294901760, %v10046_v62  ;;  %v317_v59 = vld [vmem:[%s13989_s0 + $0xb0] sm:$0xff] }
  0x3f   :  { %968 = vmatprep.mubr.f32.mxu1 %v14461_v33  ;;  %1497 = vmatprep.mubr.f32.mxu0 %v14461_v33  ;;  %14485 = vst [vmem:[#allocation86_spill] sm:$0xff] %v10080_v38  ;;  %v688_v13 = vsel %vm620_vm0, %v317_v59, 0 }
  0x40   :  { %14477 = vst [vmem:[#allocation78_spill] sm:$0xff] %v10032_v32  ;;  %14479 = vst [vmem:[#allocation80_spill] sm:$0xff] %v10048_v57  ;;  %v10056_v43 = vand.u32 4294901760, %v10032_v32  ;;  %v10070_v25 = vsub.f32 %v679_v24, %v10048_v57  ;;  %v10120_v59 = vand.u32 4294901760, %v688_v13 }
  0x41   :  { %14483 = vst [vmem:[#allocation84_spill] sm:$0xff] %v10073_v55  ;;  %14484 = vst [vmem:[#allocation85_spill] sm:$0xff] %v10078_v10 }
  0x42   :  { %974 = vmatmul.mubr.f32.gmra.mrb[26].mxu1 %v10005_v2  ;;  %1499 = vmatmul.mubr.f32.gmra.mrb[26].mxu0 %v9916_v23  ;;  %v10051_v23 = vand.u32 4294901760, %v994_v21  ;;  %14481 = vst [vmem:[#allocation82_spill] sm:$0xff] %v10056_v43  ;;  %v316_v21 = vld [vmem:[%s13989_s0 + $0xa8] sm:$0xff]  ;;  %14482 = vst [vmem:[#allocation83_spill] sm:$0xff] %v10070_v25  ;;  %v10090_v24 = vand.u32 4294901760, %v10070_v25  ;;  %v319_v2 = vld [vmem:[%s13989_s0 + $0xc0] sm:$0xff] }
  0x43   :  { %979 = vmatprep.mubr.f32.mxu1 %v14461_v33  ;;  %1504 = vmatprep.mubr.f32.mxu0 %v14461_v33  ;;  %14492 = vst [vmem:[#allocation93_spill] sm:$0xff] %v10120_v59 }
  0x44   :  { %14480 = vst [vmem:[#allocation81_spill] sm:$0xff] %v10051_v23  ;;  %14486 = vst [vmem:[#allocation87_spill] sm:$0xff] %v10090_v24 }
  0x46   :  { %985 = vmatmul.mubr.f32.gmra.mrb[28].mxu1 %v10024_v40  ;;  %1506 = vmatmul.mubr.f32.gmra.mrb[28].mxu0 %v9942_v15  ;;  %v1016_v15 = vsub.f32 %v10032_v32, %v10056_v43  ;;  %v685_v40 = vsel %vm620_vm0, %v316_v21, 0 }
  0x47   :  { %990 = vmatprep.mubr.f32.mxu1 %v14461_v33  ;;  %1511 = vmatprep.mubr.f32.mxu0 %v14461_v33  ;;  %v10100_v21 = vand.u32 4294901760, %v685_v40 }
  0x48   :  { %v10093_v43 = vand.u32 4294901760, %v1016_v15  ;;  %v318_v15 = vld [vmem:[%s13989_s0 + $0xb8] sm:$0xff] }
  0x49   :  { %14488 = vst [vmem:[#allocation89_spill] sm:$0xff] %v10100_v21 }
  0x4a   :  { %996 = vmatmul.mubr.f32.gmra.mrb[30].mxu1 %v10051_v23  ;;  %1513 = vmatmul.mubr.f32.gmra.mrb[30].mxu0 %v9968_v36  ;;  %14487 = vst [vmem:[#allocation88_spill] sm:$0xff] %v10093_v43  ;;  %v1027_v36 = vsub.f32 %v10046_v62, %v10078_v10  ;;  %v10098_v23 = vsub.f32 %v682_v18, %v10080_v38 }
  0x4b   :  { %1001 = vmatprep.mubr.f32.mxu1 %v14461_v33  ;;  %1518 = vmatprep.mubr.f32.mxu0 %v14461_v33  ;;  %v1038_v10 = vsub.f32 %v10070_v25, %v10090_v24  ;;  %v691_v24 = vsel %vm620_vm0, %v318_v15, 0 }
  0x4c   :  { %v10112_v18 = vand.u32 4294901760, %v1027_v36  ;;  %v10141_v61 = vand.u32 4294901760, %v691_v24 }
  0x4d   :  { %v10129_v36 = vand.u32 4294901760, %v1038_v10  ;;  %v320_v10 = vld [vmem:[%s13989_s0 + $0xc8] sm:$0xff] }
  0x4e   :  { %1007 = vmatmul.mubr.f32.gmra.mrb[32].mxu1 %v10073_v55  ;;  %1520 = vmatmul.mubr.f32.gmra.mrb[32].mxu0 %v9980_v0  ;;  %14489 = vst [vmem:[#allocation90_spill] sm:$0xff] %v10112_v18  ;;  %v10115_v55 = vand.u32 4294901760, %v10098_v23  ;;  %v10118_v0 = vsub.f32 %v685_v40, %v10100_v21  ;;  %v697_v15 = vsel %vm620_vm0, %v320_v10, 0  ;;  %v700_v10 = vsel %vm620_vm0, %v321_v50, 0 }
  0x4f   :  { %1012 = vmatprep.mubr.f32.mxu1 %v14461_v33  ;;  %1525 = vmatprep.mubr.f32.mxu0 %v14461_v33  ;;  %14493 = vst [vmem:[#allocation94_spill] sm:$0xff] %v10129_v36  ;;  %v10189_v50 = vand.u32 4294901760, %v700_v10 }
  0x50   :  { %14490 = vst [vmem:[#allocation91_spill] sm:$0xff] %v10115_v55  ;;  %14491 = vst [vmem:[#allocation92_spill] sm:$0xff] %v10118_v0  ;;  %v1049_v40 = vsub.f32 %v10098_v23, %v10115_v55  ;;  %v10136_v22 = vand.u32 4294901760, %v10118_v0 }
  0x52   :  { %1018 = vmatmul.mubr.f32.gmra.mrb[34].mxu1 %v10093_v43  ;;  %1527 = vmatmul.mubr.f32.gmra.mrb[34].mxu0 %v10012_v41  ;;  %v694_v43 = vsel %vm620_vm0, %v319_v2, 0  ;;  %14494 = vst [vmem:[#allocation95_spill] sm:$0xff] %v10136_v22  ;;  %v10139_v41 = vsub.f32 %v688_v13, %v10120_v59  ;;  %v10153_v13 = vand.u32 4294901760, %v1049_v40  ;;  %v1060_v55 = vsub.f32 %v10118_v0, %v10136_v22 }
  0x53   :  { %1023 = vmatprep.mubr.f32.mxu1 %v14461_v33  ;;  %1532 = vmatprep.mubr.f32.mxu0 %v14461_v33  ;;  %v10149_v2 = vand.u32 4294901760, %v694_v43  ;;  %v10169_v40 = vand.u32 4294901760, %v697_v15 }
  0x54   :  { %14495 = vst [vmem:[#allocation96_spill] sm:$0xff] %v10153_v13  ;;  %v10173_v22 = vand.u32 4294901760, %v1060_v55  ;;  %v322_v55 = vld [vmem:[%s13989_s0 + $0xd8] sm:$0xff] }
  0x56   :  { %1029 = vmatmul.mubr.f32.gmra.mrb[36].mxu1 %v10112_v18  ;;  %1534 = vmatmul.mubr.f32.gmra.mrb[36].mxu0 %v10020_v46  ;;  %v10158_v18 = vand.u32 4294901760, %v10139_v41  ;;  %v10161_v46 = vsub.f32 %v691_v24, %v10141_v61  ;;  %14497 = vst [vmem:[#allocation98_spill] sm:$0xff] %v10173_v22 }
  0x57   :  { %1034 = vmatprep.mubr.f32.mxu1 %v14461_v33  ;;  %1539 = vmatprep.mubr.f32.mxu0 %v14461_v33 }
  0x58   :  { %14496 = vst [vmem:[#allocation97_spill] sm:$0xff] %v10158_v18  ;;  %v1071_v24 = vsub.f32 %v10139_v41, %v10158_v18 }
  0x5a   :  { %1040 = vmatmul.mubr.f32.gmra.mrb[38].mxu1 %v10129_v36  ;;  %1541 = vmatmul.mubr.f32.gmra.mrb[38].mxu0 %v10048_v57  ;;  %v10178_v36 = vand.u32 4294901760, %v10161_v46  ;;  %v10181_v57 = vsub.f32 %v694_v43, %v10149_v2  ;;  %v10192_v18 = vand.u32 4294901760, %v1071_v24  ;;  %v703_v24 = vsel %vm620_vm0, %v322_v55, 0 }
  0x5b   :  { %1045 = vmatprep.mubr.f32.mxu1 %v14461_v33  ;;  %1546 = vmatprep.mubr.f32.mxu0 %v14461_v33  ;;  %v10221_v8 = vand.u32 4294901760, %v703_v24 }
  0x5c   :  { %14498 = vst [vmem:[#allocation99_spill] sm:$0xff] %v10178_v36  ;;  %14499 = vst [vmem:[#allocation100_spill] sm:$0xff] %v10192_v18  ;;  %v1082_v43 = vsub.f32 %v10161_v46, %v10178_v36  ;;  %v10210_v36 = vsub.f32 %v700_v10, %v10189_v50 }
  0x5e   :  { %1051 = vmatmul.mubr.f32.gmra.mrb[40].mxu1 %v10153_v13  ;;  %1548 = vmatmul.mubr.f32.gmra.mrb[40].mxu0 %v10080_v38  ;;  %v10197_v13 = vand.u32 4294901760, %v10181_v57  ;;  %v10200_v38 = vsub.f32 %v697_v15, %v10169_v40  ;;  %v10214_v15 = vand.u32 4294901760, %v1082_v43 }
  0x5f   :  { %1056 = vmatprep.mubr.f32.mxu1 %v14461_v33  ;;  %1553 = vmatprep.mubr.f32.mxu0 %v14461_v33 }
  0x60   :  { %14500 = vst [vmem:[#allocation101_spill] sm:$0xff] %v10197_v13  ;;  %14501 = vst [vmem:[#allocation102_spill] sm:$0xff] %v10214_v15  ;;  %v1093_v56 = vsub.f32 %v10181_v57, %v10197_v13  ;;  %v10237_v13 = vand.u32 4294901760, %v10210_v36 }
  0x62   :  { %1062 = vmatmul.mubr.f32.gmra.mrb[42].mxu1 %v10173_v22  ;;  %1555 = vmatmul.mubr.f32.gmra.mrb[42].mxu0 %v10100_v21  ;;  %v706_v22 = vsel %vm620_vm0, %v323_v53, 0  ;;  %v10219_v21 = vand.u32 4294901760, %v10200_v38  ;;  %v324_v53 = vld [vmem:[%s13989_s0 + $0xe8] sm:$0xff]  ;;  %v10232_v55 = vand.u32 4294901760, %v1093_v56  ;;  %14504 = vst [vmem:[#allocation105_spill] sm:$0xff] %v10237_v13  ;;  %v325_v56 = vld [vmem:[%s13989_s0 + $0xf0] sm:$0xff] }
  0x63   :  { %1067 = vmatprep.mubr.f32.mxu1 %v14461_v33  ;;  %1560 = vmatprep.mubr.f32.mxu0 %v14461_v33  ;;  %v10229_v10 = vand.u32 4294901760, %v706_v22 }
  0x64   :  { %14502 = vst [vmem:[#allocation103_spill] sm:$0xff] %v10219_v21  ;;  %14503 = vst [vmem:[#allocation104_spill] sm:$0xff] %v10232_v55  ;;  %v1104_v43 = vsub.f32 %v10200_v38, %v10219_v21 }
  0x65   :  { %v10251_v21 = vsub.f32 %v706_v22, %v10229_v10  ;;  %v712_v22 = vsel %vm620_vm0, %v325_v56, 0 }
  0x66   :  { %1073 = vmatmul.mubr.f32.gmra.mrb[44].mxu1 %v10192_v18  ;;  %1562 = vmatmul.mubr.f32.gmra.mrb[44].mxu0 %v10120_v59  ;;  %v10240_v59 = vsub.f32 %v703_v24, %v10221_v8  ;;  %v709_v18 = vsel %vm620_vm0, %v324_v53, 0  ;;  %v14506_v24 = vand.u32 4294901760, %v9631_v16  ;;  %v1115_v53 = vsub.f32 %v10210_v36, %v10237_v13  ;;  %v326_v16 = vld [vmem:[%s13989_s0 + $0xf8] sm:$0xff]  ;;  %v327_v13 = vld [vmem:[%s13989_s0 + $0x100] sm:$0xff] }
  0x67   :  { %1078 = vmatprep.mubr.f32.mxu1 %v14461_v33  ;;  %1797 = vmatprep.mubr.f32.mxu0 %v14461_v33  ;;  %14505 = vst [vmem:[#allocation106_spill] sm:$0xff] %v10251_v21  ;;  %v10263_v37 = vand.u32 4294901760, %v709_v18  ;;  %v10283_v56 = vand.u32 4294901760, %v712_v22 }
  0x6a   :  { %1084 = vmatmul.mubr.f32.gmra.mrb[46].mxu1 %v10214_v15  ;;  %1800 = vmatmul.mubr.f32.vlgmr.msra.gmra.mrb[0].mxu0 %v9642_v20  ;;  %v10256_v20 = vand.u32 4294901760, %v1104_v43  ;;  %v10261_v15 = vand.u32 4294901760, %v10240_v59  ;;  %v10273_v43 = vand.u32 4294901760, %v10251_v21 }
  0x6b   :  { %1089 = vmatprep.mubr.f32.mxu1 %v14461_v33  ;;  %1805 = vmatprep.mubr.f32.mxu0 %v14461_v33 }
  0x6c   :  { %2169 = vmatpush1.msra.mxu0 %v9607_v4  ;;  %14507 = vst [vmem:[#allocation107_spill] sm:$0xff] %v10256_v20  ;;  %14508 = vst [vmem:[#allocation108_spill] sm:$0xff] %v10261_v15  ;;  %v1126_v4 = vsub.f32 %v10240_v59, %v10261_v15 }
  0x6d   :  { %2650 = vmatprep.subr.mxu0 %v14506_v24  ;;  %14509 = vst [vmem:[#allocation109_spill] sm:$0xff] %v10273_v43  ;;  %v10276_v24 = vand.u32 4294901760, %v1115_v53  ;;  %v1137_v53 = vsub.f32 %v10251_v21, %v10273_v43 }
  0x6e   :  { %1095 = vmatmul.mubr.f32.gmra.mrb[48].mxu1 %v10232_v55  ;;  %1808 = vmatmul.mubr.f32.gmra.mrb[2].mxu0 %v9653_v26  ;;  %v10281_v26 = vsub.f32 %v709_v18, %v10263_v37  ;;  %v718_v18 = vsel %vm620_vm0, %v327_v13, 0  ;;  %v10296_v15 = vand.u32 4294901760, %v1126_v4  ;;  %v328_v13 = vld [vmem:[%s13989_s0 + $0x108] sm:$0xff] }
  0x6f   :  { %1100 = vmatprep.mubr.f32.mxu1 %v14461_v33  ;;  %1813 = vmatprep.mubr.f32.mxu0 %v14461_v33  ;;  %14510 = vst [vmem:[#allocation110_spill] sm:$0xff] %v10276_v24  ;;  %v10312_v4 = vand.u32 4294901760, %v718_v18 }
  0x70   :  { %14511 = vst [vmem:[#allocation111_spill] sm:$0xff] %v10281_v26  ;;  %14512 = vst [vmem:[#allocation112_spill] sm:$0xff] %v10296_v15  ;;  %v10299_v55 = vand.u32 4294901760, %v10281_v26 }
  0x72   :  { %1106 = vmatmul.mubr.f32.gmra.mrb[50].mxu1 %v10256_v20  ;;  %1816 = vmatmul.mubr.f32.gmra.mrb[4].mxu0 %v9656_v27  ;;  %v715_v20 = vsel %vm620_vm0, %v326_v16, 0  ;;  %14513 = vst [vmem:[#allocation113_spill] sm:$0xff] %v10299_v55  ;;  %v10302_v27 = vsub.f32 %v712_v22, %v10283_v56  ;;  %v10315_v16 = vand.u32 4294901760, %v1137_v53  ;;  %v1148_v22 = vsub.f32 %v10281_v26, %v10299_v55 }
  0x73   :  { %1111 = vmatprep.mubr.f32.mxu1 %v14461_v33  ;;  %1821 = vmatprep.mubr.f32.mxu0 %v14461_v33  ;;  %v10304_v47 = vand.u32 4294901760, %v715_v20  ;;  %v721_v53 = vsel %vm620_vm0, %v328_v13, 0  ;;  %v10333_v55 = vsub.f32 %v718_v18, %v10312_v4 }
  0x74   :  { %14514 = vst [vmem:[#allocation114_spill] sm:$0xff] %v10315_v16  ;;  %v10320_v43 = vand.u32 4294901760, %v10302_v27  ;;  %v10344_v51 = vand.u32 4294901760, %v721_v53 }
  0x76   :  { %1117 = vmatmul.mubr.f32.gmra.mrb[52].mxu1 %v10276_v24  ;;  %1824 = vmatmul.mubr.f32.gmra.mrb[6].mxu0 %v9677_v35  ;;  %14515 = vst [vmem:[#allocation115_spill] sm:$0xff] %v10320_v43  ;;  %v10323_v35 = vsub.f32 %v715_v20, %v10304_v47  ;;  %v329_v24 = vld [vmem:[%s13989_s0 + $0x110] sm:$0xff]  ;;  %v10337_v20 = vand.u32 4294901760, %v1148_v22  ;;  %v1159_v7 = vsub.f32 %v10302_v27, %v10320_v43  ;;  %v10360_v43 = vand.u32 4294901760, %v10333_v55 }
  0x77   :  { %1122 = vmatprep.mubr.f32.mxu1 %v14461_v33  ;;  %1829 = vmatprep.mubr.f32.mxu0 %v14461_v33 }
  0x78   :  { %14516 = vst [vmem:[#allocation116_spill] sm:$0xff] %v10337_v20  ;;  %v10355_v13 = vand.u32 4294901760, %v1159_v7  ;;  %14519 = vst [vmem:[#allocation119_spill] sm:$0xff] %v10360_v43  ;;  %v1181_v34 = vsub.f32 %v10333_v55, %v10360_v43 }
  0x7a   :  { %1128 = vmatmul.mubr.f32.gmra.mrb[54].mxu1 %v10296_v15  ;;  %1832 = vmatmul.mubr.f32.gmra.mrb[8].mxu0 %v9705_v48  ;;  %v724_v15 = vsel %vm620_vm0, %v329_v24, 0  ;;  %v10342_v48 = vand.u32 4294901760, %v10323_v35  ;;  %v330_v24 = vld [vmem:[%s13989_s0 + $0x118] sm:$0xff]  ;;  %14518 = vst [vmem:[#allocation118_spill] sm:$0xff] %v10355_v13 }
  0x7b   :  { %1133 = vmatprep.mubr.f32.mxu1 %v14461_v33  ;;  %1837 = vmatprep.mubr.f32.mxu0 %v14461_v33  ;;  %v10352_v18 = vand.u32 4294901760, %v724_v15  ;;  %v727_v7 = vsel %vm620_vm0, %v330_v24, 0  ;;  %v10395_v24 = vand.u32 4294901760, %v1181_v34  ;;  %v333_v34 = vld [vmem:[%s13989_s0 + $0x130] sm:$0xff] }
  0x7c   :  { %14517 = vst [vmem:[#allocation117_spill] sm:$0xff] %v10342_v48  ;;  %v1170_v22 = vsub.f32 %v10323_v35, %v10342_v48  ;;  %v10384_v30 = vand.u32 4294901760, %v727_v7  ;;  %v736_v12 = vsel %vm620_vm0, %v333_v34, 0 }
  0x7d   :  { %v10373_v48 = vsub.f32 %v724_v15, %v10352_v18  ;;  %v332_v15 = vld [vmem:[%s13989_s0 + $0x128] sm:$0xff]  ;;  %14524 = vst [vmem:[#allocation124_spill] sm:$0xff] %v10395_v24  ;;  %v10443_v34 = vand.u32 4294901760, %v736_v12 }
  0x7e   :  { %1139 = vmatmul.mubr.f32.gmra.mrb[56].mxu1 %v10315_v16  ;;  %1840 = vmatmul.mubr.f32.gmra.mrb[10].mxu0 %v9718_v52  ;;  %v10363_v52 = vsub.f32 %v721_v53, %v10344_v51  ;;  %v331_v16 = vld [vmem:[%s13989_s0 + $0x120] sm:$0xff]  ;;  %v10377_v53 = vand.u32 4294901760, %v1170_v22 }
  0x7f   :  { %1144 = vmatprep.mubr.f32.mxu1 %v14461_v33  ;;  %1845 = vmatprep.mubr.f32.mxu0 %v14461_v33  ;;  %14521 = vst [vmem:[#allocation121_spill] sm:$0xff] %v10373_v48  ;;  %v10400_v43 = vand.u32 4294901760, %v10373_v48 }
  0x80   :  { %14520 = vst [vmem:[#allocation120_spill] sm:$0xff] %v10363_v52  ;;  %14522 = vst [vmem:[#allocation122_spill] sm:$0xff] %v10377_v53 }
  0x81   :  { %14525 = vst [vmem:[#allocation125_spill] sm:$0xff] %v10400_v43 }
  0x82   :  { %1150 = vmatmul.mubr.f32.gmra.mrb[58].mxu1 %v10337_v20  ;;  %1848 = vmatmul.mubr.f32.gmra.mrb[12].mxu0 %v9758_v1  ;;  %v730_v20 = vsel %vm620_vm0, %v331_v16, 0  ;;  %v10382_v1 = vand.u32 4294901760, %v10363_v52 }
  0x83   :  { %1155 = vmatprep.mubr.f32.mxu1 %v14461_v33  ;;  %1853 = vmatprep.mubr.f32.mxu0 %v14461_v33  ;;  %v10392_v16 = vand.u32 4294901760, %v730_v20 }
  0x84   :  { %14523 = vst [vmem:[#allocation123_spill] sm:$0xff] %v10382_v1  ;;  %v1192_v22 = vsub.f32 %v10363_v52, %v10382_v1 }
  0x85   :  { %v10413_v1 = vsub.f32 %v730_v20, %v10392_v16  ;;  %v334_v20 = vld [vmem:[%s13989_s0 + $0x138] sm:$0xff] }
  0x86   :  { %1161 = vmatmul.mubr.f32.gmra.mrb[60].mxu1 %v10355_v13  ;;  %1856 = vmatmul.mubr.f32.gmra.mrb[14].mxu0 %v9784_v14  ;;  %v10403_v14 = vsub.f32 %v727_v7, %v10384_v30  ;;  %v733_v13 = vsel %vm620_vm0, %v332_v15, 0  ;;  %v1203_v7 = vsub.f32 %v10373_v48, %v10400_v43 }
  0x87   :  { %1166 = vmatprep.mubr.f32.mxu1 %v14461_v33  ;;  %1861 = vmatprep.mubr.f32.mxu0 %v14461_v33  ;;  %14527 = vst [vmem:[#allocation127_spill] sm:$0xff] %v10413_v1  ;;  %v10423_v15 = vand.u32 4294901760, %v733_v13 }
  0x88   :  { %14526 = vst [vmem:[#allocation126_spill] sm:$0xff] %v10403_v14  ;;  %v10436_v43 = vand.u32 4294901760, %v1203_v7 }
  0x8a   :  { %1172 = vmatmul.mubr.f32.gmra.mrb[62].mxu1 %v10377_v53  ;;  %1864 = vmatmul.mubr.f32.gmra.mrb[16].mxu0 %v9811_v39  ;;  %v10416_v53 = vand.u32 4294901760, %v1192_v22  ;;  %v10421_v39 = vand.u32 4294901760, %v10403_v14  ;;  %v10433_v22 = vand.u32 4294901760, %v10413_v1  ;;  %14531 = vst [vmem:[#allocation131_spill] sm:$0xff] %v10436_v43 }
  0x8b   :  { %1177 = vmatprep.mubr.f32.mxu1 %v14461_v33  ;;  %1869 = vmatprep.mubr.f32.mxu0 %v14461_v33 }
  0x8c   :  { %14528 = vst [vmem:[#allocation128_spill] sm:$0xff] %v10416_v53  ;;  %14529 = vst [vmem:[#allocation129_spill] sm:$0xff] %v10421_v39  ;;  %v1225_v7 = vsub.f32 %v10413_v1, %v10433_v22 }
  0x8d   :  { %14530 = vst [vmem:[#allocation130_spill] sm:$0xff] %v10433_v22 }
  0x8e   :  { %1183 = vmatmul.mubr.f32.gmra.mrb[64].mxu1 %v10395_v24  ;;  %1872 = vmatmul.mubr.f32.gmra.mrb[18].mxu0 %v9839_v58  ;;  %v1214_v58 = vsub.f32 %v10403_v14, %v10421_v39  ;;  %v10441_v24 = vsub.f32 %v733_v13, %v10423_v15  ;;  %v742_v13 = vsel %vm620_vm0, %v335_v31, 0  ;;  %v336_v31 = vld [vmem:[%s13989_s0 + $0x148] sm:$0xff] }
  0x8f   :  { %1188 = vmatprep.mubr.f32.mxu1 %v14461_v33  ;;  %1877 = vmatprep.mubr.f32.mxu0 %v14461_v33 }
  0x90   :  { %14532 = vst [vmem:[#allocation132_spill] sm:$0xff] %v10441_v24  ;;  %v10456_v39 = vand.u32 4294901760, %v1214_v58  ;;  %v10459_v3 = vand.u32 4294901760, %v10441_v24  ;;  %v10472_v58 = vand.u32 4294901760, %v742_v13 }
  0x92   :  { %1194 = vmatmul.mubr.f32.gmra.mrb[66].mxu1 %v10416_v53  ;;  %1880 = vmatmul.mubr.f32.gmra.mrb[20].mxu0 %v9865_v11  ;;  %v739_v53 = vsel %vm620_vm0, %v334_v20, 0  ;;  %14533 = vst [vmem:[#allocation133_spill] sm:$0xff] %v10456_v39  ;;  %14534 = vst [vmem:[#allocation134_spill] sm:$0xff] %v10459_v3  ;;  %v10462_v11 = vsub.f32 %v736_v12, %v10443_v34  ;;  %v364_v20 = vld [vmem:[%s13990_s1 + $0xb8] sm:$0xff]  ;;  %v10478_v12 = vand.u32 4294901760, %v1225_v7  ;;  %v745_v7 = vsel %vm620_vm0, %v336_v31, 0 }
  0x93   :  { %1199 = vmatprep.mubr.f32.mxu1 %v14461_v33  ;;  %1885 = vmatprep.mubr.f32.mxu0 %v14461_v33  ;;  %v10464_v63 = vand.u32 4294901760, %v739_v53  ;;  %v10510_v54 = vand.u32 4294901760, %v745_v7 }
  0x94   :  { %14535 = vst [vmem:[#allocation135_spill] sm:$0xff] %v10462_v11  ;;  %14536 = vst [vmem:[#allocation136_spill] sm:$0xff] %v10478_v12  ;;  %v10483_v22 = vand.u32 4294901760, %v10462_v11  ;;  %507 = vperm.xlu1 %9548, %v364_v20  }
  0x96   :  { %1205 = vmatmul.mubr.f32.gmra.mrb[68].mxu1 %v10436_v43  ;;  %1888 = vmatmul.mubr.f32.gmra.mrb[22].mxu0 %v9877_v29  ;;  %v1236_v29 = vsub.f32 %v10441_v24, %v10459_v3  ;;  %14537 = vst [vmem:[#allocation137_spill] sm:$0xff] %v10483_v22  ;;  %v10486_v43 = vsub.f32 %v739_v53, %v10464_v63  ;;  %v365_v53 = vld [vmem:[%s13990_s1 + $0xc0] sm:$0xff] }
  0x97   :  { %1210 = vmatprep.mubr.f32.mxu1 %v14461_v33  ;;  %1893 = vmatprep.mubr.f32.mxu0 %v14461_v33  ;;  %v10496_v3 = vsub.f32 %v742_v13, %v10472_v58  ;;  %v366_v13 = vld [vmem:[%s13990_s1 + $0xc8] sm:$0xff] }
  0x98   :  { %14538 = vst [vmem:[#allocation138_spill] sm:$0xff] %v10486_v43  ;;  %v10503_v20 = vand.u32 4294901760, %v1236_v29  ;;  %v10508_v31 = vand.u32 4294901760, %v10486_v43  ;;  %512 = vperm.xlu0 %9547, %v365_v53   ;;  %517 = vperm.xlu1 %9548, %v366_v13  }
  0x99   :  { %14539 = vst [vmem:[#allocation139_spill] sm:$0xff] %v10496_v3 }
  0x9a   :  { %1216 = vmatmul.mubr.f32.gmra.mrb[70].mxu1 %v10456_v39  ;;  %1896 = vmatmul.mubr.f32.gmra.mrb[24].mxu0 %v9906_v60  ;;  %v748_v39 = vsel %vm620_vm0, %v337_v17, 0  ;;  %14540 = vst [vmem:[#allocation140_spill] sm:$0xff] %v10503_v20  ;;  %v1247_v60 = vsub.f32 %v10462_v11, %v10483_v22  ;;  %14541 = vst [vmem:[#allocation141_spill] sm:$0xff] %v10508_v31  ;;  %v338_v17 = vld [vmem:[%s13989_s0 + $0x158] sm:$0xff]  ;;  %v1258_v53 = vsub.f32 %v10486_v43, %v10508_v31 }
  0x9b   :  { %1221 = vmatprep.mubr.f32.mxu1 %v14461_v33  ;;  %1901 = vmatprep.mubr.f32.mxu0 %v14461_v33  ;;  %v10518_v29 = vand.u32 4294901760, %v748_v39 }
  0x9c   :  { %v10524_v22 = vand.u32 4294901760, %v1247_v60  ;;  %v751_v60 = vsel %vm620_vm0, %v338_v17, 0  ;;  %v10549_v13 = vand.u32 4294901760, %v1258_v53  ;;  %v368_v53 = vld [vmem:[%s13990_s1 + $0xd8] sm:$0xff] }
  0x9d   :  { %v10542_v31 = vsub.f32 %v748_v39, %v10518_v29  ;;  %v10556_v45 = vand.u32 4294901760, %v751_v60  ;;  %527 = vperm.xlu1 %9548, %v368_v53  }
  0x9e   :  { %1227 = vmatmul.mubr.f32.gmra.mrb[72].mxu1 %v10478_v12  ;;  %1904 = vmatmul.mubr.f32.gmra.mrb[26].mxu0 %v9940_v5  ;;  %14542 = vst [vmem:[#allocation142_spill] sm:$0xff] %v10524_v22  ;;  %v10529_v5 = vand.u32 4294901760, %v10496_v3  ;;  %v10532_v12 = vsub.f32 %v745_v7, %v10510_v54  ;;  %v367_v7 = vld [vmem:[%s13990_s1 + $0xd0] sm:$0xff] }
  0x9f   :  { %1232 = vmatprep.mubr.f32.mxu1 %v14461_v33  ;;  %1909 = vmatprep.mubr.f32.mxu0 %v14461_v33  ;;  %14545 = vst [vmem:[#allocation145_spill] sm:$0xff] %v10542_v31 }
  0xa0   :  { %14543 = vst [vmem:[#allocation143_spill] sm:$0xff] %v10529_v5  ;;  %14544 = vst [vmem:[#allocation144_spill] sm:$0xff] %v10532_v12  ;;  %v10554_v17 = vand.u32 4294901760, %v10532_v12  ;;  %522 = vperm.xlu0 %9547, %v367_v7  }
  0xa2   :  { %1238 = vmatmul.mubr.f32.gmra.mrb[74].mxu1 %v10503_v20  ;;  %1912 = vmatmul.mubr.f32.gmra.mrb[28].mxu0 %v9966_v44  ;;  %v754_v20 = vsel %vm620_vm0, %v339_v28, 0  ;;  %v1269_v44 = vsub.f32 %v10496_v3, %v10529_v5  ;;  %14546 = vst [vmem:[#allocation146_spill] sm:$0xff] %v10554_v17  ;;  %v340_v28 = vld [vmem:[%s13989_s0 + $0x168] sm:$0xff]  ;;  %v1280_v7 = vsub.f32 %v10532_v12, %v10554_v17  ;;  %v369_v17 = vld [vmem:[%s13990_s1 + $0xe0] sm:$0xff] }
  0xa3   :  { %1243 = vmatprep.mubr.f32.mxu1 %v14461_v33  ;;  %1917 = vmatprep.mubr.f32.mxu0 %v14461_v33  ;;  %v10564_v39 = vand.u32 4294901760, %v754_v20  ;;  %v757_v42 = vsel %vm620_vm0, %v340_v28, 0 }
  0xa4   :  { %v10570_v5 = vand.u32 4294901760, %v1269_v44  ;;  %v10598_v28 = vand.u32 4294901760, %v757_v42  ;;  %532 = vperm.xlu0 %9547, %v369_v17  }
  0xa5   :  { %v10585_v44 = vsub.f32 %v754_v20, %v10564_v39  ;;  %v370_v20 = vld [vmem:[%s13990_s1 + $0xe8] sm:$0xff] }
  0xa6   :  { %1249 = vmatmul.mubr.f32.gmra.mrb[76].mxu1 %v10524_v22  ;;  %1920 = vmatmul.mubr.f32.gmra.mrb[30].mxu0 %v9991_v19  ;;  %14547 = vst [vmem:[#allocation147_spill] sm:$0xff] %v10570_v5  ;;  %v10575_v19 = vand.u32 4294901760, %v10542_v31  ;;  %v10578_v22 = vsub.f32 %v751_v60, %v10556_v45  ;;  %v10591_v60 = vand.u32 4294901760, %v1280_v7  ;;  %14552 = vst [vmem:[#allocation152_spill] sm:$0xff] %v10598_v28 }
  0xa7   :  { %1254 = vmatprep.mubr.f32.mxu1 %v14461_v33  ;;  %1925 = vmatprep.mubr.f32.mxu0 %v14461_v33  ;;  %14550 = vst [vmem:[#allocation150_spill] sm:$0xff] %v10585_v44  ;;  %v10615_v17 = vsub.f32 %v757_v42, %v10598_v28 }
  0xa8   :  { %14548 = vst [vmem:[#allocation148_spill] sm:$0xff] %v10575_v19  ;;  %14549 = vst [vmem:[#allocation149_spill] sm:$0xff] %v10578_v22  ;;  %v1291_v53 = vsub.f32 %v10542_v31, %v10575_v19  ;;  %537 = vperm.xlu1 %9548, %v370_v20   ;;  %v10636_v20 = vsub.f32 %v10039_v6, %v10059_v9  ;;  %v373_v6 = vld [vmem:[%s13990_s1 + $0x100] sm:$0xff] }
  0xa9   :  { %14554 = vst [vmem:[#allocation154_spill] sm:$0xff] %v10615_v17  ;;  %v10629_v42 = vand.u32 4294901760, %v10615_v17 }
  0xaa   :  { %1260 = vmatmul.mubr.f32.gmra.mrb[78].mxu1 %v10549_v13  ;;  %1928 = vmatmul.mubr.f32.gmra.mrb[32].mxu0 %v10001_v49  ;;  %v10596_v49 = vand.u32 4294901760, %v10578_v22  ;;  %v10607_v7 = vand.u32 4294901760, %v1291_v53  ;;  %v371_v53 = vld [vmem:[%s13990_s1 + $0xf0] sm:$0xff] }
  0xab   :  { %1265 = vmatprep.mubr.f32.mxu1 %v14461_v33  ;;  %1933 = vmatprep.mubr.f32.mxu0 %v14461_v33 }
  0xac   :  { %14551 = vst [vmem:[#allocation151_spill] sm:$0xff] %v10596_v49  ;;  %v1302_v19 = vsub.f32 %v10578_v22, %v10596_v49  ;;  %542 = vperm.xlu0 %9547, %v371_v53   ;;  %v1324_v53 = vsub.f32 %v10615_v17, %v10629_v42 }
  0xae   :  { %1271 = vmatmul.mubr.f32.gmra.mrb[80].mxu1 %v10570_v5  ;;  %1936 = vmatmul.mubr.f32.gmra.mrb[34].mxu0 %v10032_v32  ;;  %v10612_v5 = vand.u32 4294901760, %v10585_v44  ;;  %v10624_v32 = vand.u32 4294901760, %v1302_v19  ;;  %v372_v19 = vld [vmem:[%s13990_s1 + $0xf8] sm:$0xff] }
  0xaf   :  { %1276 = vmatprep.mubr.f32.mxu1 %v14461_v33  ;;  %1941 = vmatprep.mubr.f32.mxu0 %v14461_v33 }
  0xb0   :  { %14553 = vst [vmem:[#allocation153_spill] sm:$0xff] %v10612_v5  ;;  %v1313_v49 = vsub.f32 %v10585_v44, %v10612_v5  ;;  %547 = vperm.xlu1 %9548, %v372_v19   ;;  %552 = vperm.xlu0 %9547, %v373_v6   ;;  %v374_v19 = vld [vmem:[%s13990_s1 + $0x108] sm:$0xff] }
  0xb2   :  { %1282 = vmatmul.mubr.f32.gmra.mrb[82].mxu1 %v10591_v60  ;;  %1944 = vmatmul.mubr.f32.gmra.mrb[36].mxu0 %v10046_v62  ;;  %v10642_v62 = vand.u32 4294901760, %v1313_v49  ;;  %v10656_v49 = vand.u32 4294901760, %v1324_v53  ;;  %v375_v53 = vld [vmem:[%s13990_s1 + $0x110] sm:$0xff] }
  0xb3   :  { %1287 = vmatprep.mubr.f32.mxu1 %v14461_v33  ;;  %1949 = vmatprep.mubr.f32.mxu0 %v14461_v33 }
  0xb4   :  { %557 = vperm.xlu1 %9548, %v374_v19   ;;  %562 = vperm.xlu0 %9547, %v375_v53   ;;  %v376_v19 = vld [vmem:[%s13990_s1 + $0x118] sm:$0xff]  ;;  %v378_v53 = vld [vmem:[%s13990_s1 + $0x128] sm:$0xff] }
  0xb6   :  { %1293 = vmatmul.mubr.f32.gmra.mrb[84].mxu1 %v10607_v7  ;;  %1952 = vmatmul.mubr.f32.gmra.mrb[38].mxu0 %v10070_v25  ;;  %v10653_v25 = vand.u32 4294901760, %v10636_v20 }
  0xb7   :  { %1298 = vmatprep.mubr.f32.mxu1 %v14461_v33  ;;  %1957 = vmatprep.mubr.f32.mxu0 %v14461_v33 }
  0xb8   :  { %v3959_v6 = vsub.f32 %v10636_v20, %v10653_v25  ;;  %567 = vperm.xlu1 %9548, %v376_v19   ;;  %v379_v19 = vld [vmem:[%s13990_s1 + $0x130] sm:$0xff] }
  0xba   :  { %1304 = vmatmul.mubr.f32.gmra.mrb[86].mxu1 %v10624_v32  ;;  %1960 = vmatmul.mubr.f32.gmra.mrb[40].mxu0 %v10098_v23 }
  0xbb   :  { %1309 = vmatprep.mubr.f32.mxu1 %v14461_v33  ;;  %1965 = vmatprep.mubr.f32.mxu0 %v14461_v33 }
  0xbc   :  { %577 = vperm.xlu1 %9548, %v378_v53   ;;  %v381_v53 = vld [vmem:[%s13990_s1 + $0x140] sm:$0xff] }
  0xbe   :  { %1315 = vmatmul.mubr.f32.gmra.mrb[88].mxu1 %v10642_v62  ;;  %1968 = vmatmul.mubr.f32.gmra.mrb[42].mxu0 %v10118_v0  ;;  %v10673_v0 = vand.u32 4294901760, %v3959_v6  ;;  %v377_v6 = vld [vmem:[%s13990_s1 + $0x120] sm:$0xff] }
  0xbf   :  { %1320 = vmatprep.mubr.f32.mxu1 %v14461_v33  ;;  %1973 = vmatprep.mubr.f32.mxu0 %v14461_v33 }
  0xc0   :  { %572 = vperm.xlu0 %9547, %v377_v6   ;;  %v380_v6 = vld [vmem:[%s13990_s1 + $0x138] sm:$0xff] }
  0xc1   :  { %587 = vperm.xlu1 %9548, %v380_v6  }
  0xc2   :  { %1326 = vmatmul.mubr.f32.gmra.mrb[90].mxu1 %v10656_v49  ;;  %1976 = vmatmul.mubr.f32.gmra.mrb[44].mxu0 %v10139_v41 }
  0xc3   :  { %1567 = vmatprep.mubr.f32.mxu1 %v14461_v33  ;;  %1981 = vmatprep.mubr.f32.mxu0 %v14461_v33 }
  0xc4   :  { %582 = vperm.xlu0 %9547, %v379_v19   ;;  %v382_v19 = vld [vmem:[%s13990_s1 + $0x148] sm:$0xff] }
  0xc5   :  { %597 = vperm.xlu1 %9548, %v382_v19  }
  0xc6   :  { %1569 = vmatmul.mubr.f32.vlgmr.msra.gmra.mrb[46].mxu1 %v10141_v61  ;;  %1984 = vmatmul.mubr.f32.gmra.mrb[46].mxu0 %v10161_v46 }
  0xc7   :  { %8285 = vmatpush3.msra.mxu1 %v10059_v9  ;;  %1574 = vmatprep.mubr.f32.mxu1 %v14461_v33 }
  0xc8   :  { %1989 = vmatprep.mubr.f32.mxu0 %v14461_v33  ;;  %8355 = vmatprep.subr.mxu1 %v10673_v0 }
  0xc9   :  { %592 = vperm.xlu0 %9547, %v381_v53   ;;  %v383_v53 = vld [vmem:[%s13990_s1 + $0x150] sm:$0xff] }
  0xca   :  { %1576 = vmatmul.mubr.f32.gmra.mrb[48].mxu1 %v10149_v2  ;;  %1992 = vmatmul.mubr.f32.gmra.mrb[48].mxu0 %v10181_v57 }
  0xcb   :  { %1581 = vmatprep.mubr.f32.mxu1 %v14461_v33  ;;  %1997 = vmatprep.mubr.f32.mxu0 %v14461_v33 }
  0xcd   :  { %602 = vperm.xlu0 %9547, %v383_v53  }
  0xce   :  { %1583 = vmatmul.mubr.f32.gmra.mrb[50].mxu1 %v10169_v40  ;;  %2000 = vmatmul.mubr.f32.gmra.mrb[50].mxu0 %v10200_v38 }
  0xcf   :  { %1588 = vmatprep.mubr.f32.mxu1 %v14461_v33  ;;  %2005 = vmatprep.mubr.f32.mxu0 %v14461_v33 }
  0xd2   :  { %1590 = vmatmul.mubr.f32.gmra.mrb[52].mxu1 %v10189_v50  ;;  %2008 = vmatmul.mubr.f32.gmra.mrb[52].mxu0 %v10210_v36 }
  0xd3   :  { %1595 = vmatprep.mubr.f32.mxu1 %v14461_v33  ;;  %2013 = vmatprep.mubr.f32.mxu0 %v14461_v33 }
  0xd6   :  { %1597 = vmatmul.mubr.f32.gmra.mrb[54].mxu1 %v10221_v8  ;;  %2016 = vmatmul.mubr.f32.gmra.mrb[54].mxu0 %v10240_v59 }
  0xd7   :  { %1602 = vmatprep.mubr.f32.mxu1 %v14461_v33  ;;  %2021 = vmatprep.mubr.f32.mxu0 %v14461_v33 }
  0xda   :  { %1604 = vmatmul.mubr.f32.gmra.mrb[56].mxu1 %v10229_v10  ;;  %2024 = vmatmul.mubr.f32.gmra.mrb[56].mxu0 %v10251_v21 }
  0xdb   :  { %1609 = vmatprep.mubr.f32.mxu1 %v14461_v33  ;;  %2029 = vmatprep.mubr.f32.mxu0 %v14461_v33 }
  0xde   :  { %1611 = vmatmul.mubr.f32.gmra.mrb[58].mxu1 %v10263_v37  ;;  %2032 = vmatmul.mubr.f32.gmra.mrb[58].mxu0 %v10281_v26 }
  0xdf   :  { %1616 = vmatprep.mubr.f32.mxu1 %v14461_v33  ;;  %2037 = vmatprep.mubr.f32.mxu0 %v14461_v33 }
  0xe1   :  { %v10726_v6 = vpop.f32.mrb[0].mxu1 }
  0xe2   :  { %14555 = vst [vmem:[#allocation155_spill] sm:$0xff] %v10726_v6  ;;  %v10728_v21 = vpop.f32.mrb[1].mxu1  ;;  %1618 = vmatmul.mubr.f32.gmra.mrb[60].mxu1 %v10283_v56  ;;  %2040 = vmatmul.mubr.f32.gmra.mrb[60].mxu0 %v10302_v27 }
  0xe3   :  { %14556 = vst [vmem:[#allocation156_spill] sm:$0xff] %v10728_v21  ;;  %1623 = vmatprep.mubr.f32.mxu1 %v14461_v33  ;;  %2045 = vmatprep.mubr.f32.mxu0 %v14461_v33  ;;  %v384_v21 = vld [vmem:[%s13990_s1 + $0x158] sm:$0xff] }
  0xe4   :  { %607 = vperm.xlu1 %9548, %v384_v21  }
  0xe5   :  { %v10737_v26 = vpop.f32.mrb[2].mxu1 }
  0xe6   :  { %14557 = vst [vmem:[#allocation157_spill] sm:$0xff] %v10737_v26  ;;  %v10739_v19 = vpop.f32.mrb[3].mxu1  ;;  %1625 = vmatmul.mubr.f32.gmra.mrb[62].mxu1 %v10304_v47  ;;  %2048 = vmatmul.mubr.f32.gmra.mrb[62].mxu0 %v10323_v35 }
  0xe7   :  { %14558 = vst [vmem:[#allocation158_spill] sm:$0xff] %v10739_v19  ;;  %1630 = vmatprep.mubr.f32.mxu1 %v14461_v33  ;;  %2053 = vmatprep.mubr.f32.mxu0 %v14461_v33  ;;  %v385_v19 = vld [vmem:[%s13990_s1 + $0x160] sm:$0xff] }
  0xe8   :  { %612 = vperm.xlu0 %9547, %v385_v19  }
  0xe9   :  { %v10748_v6 = vpop.f32.mrb[4].mxu1 }
  0xea   :  { %14559 = vst [vmem:[#allocation159_spill] sm:$0xff] %v10748_v6  ;;  %v10750_v53 = vpop.f32.mrb[5].mxu1  ;;  %1632 = vmatmul.mubr.f32.gmra.mrb[64].mxu1 %v10312_v4  ;;  %2056 = vmatmul.mubr.f32.gmra.mrb[64].mxu0 %v10333_v55 }
  0xeb   :  { %14560 = vst [vmem:[#allocation160_spill] sm:$0xff] %v10750_v53  ;;  %1637 = vmatprep.mubr.f32.mxu1 %v14461_v33  ;;  %2061 = vmatprep.mubr.f32.mxu0 %v14461_v33  ;;  %v386_v53 = vld [vmem:[%s13990_s1 + $0x168] sm:$0xff] }
  0xec   :  { %617 = vperm.xlu1 %9548, %v386_v53  }
  0xed   :  { %v10759_v26 = vpop.f32.mrb[6].mxu1 }
  0xee   :  { %14561 = vst [vmem:[#allocation161_spill] sm:$0xff] %v10759_v26  ;;  %v10761_v21 = vpop.f32.mrb[7].mxu1  ;;  %1639 = vmatmul.mubr.f32.gmra.mrb[66].mxu1 %v10344_v51  ;;  %2064 = vmatmul.mubr.f32.gmra.mrb[66].mxu0 %v10363_v52  ;;  %v14703_v52 = vld [vmem:[#allocation86_spill] sm:$0xff] }
  0xef   :  { %14562 = vst [vmem:[#allocation162_spill] sm:$0xff] %v10761_v21  ;;  %1644 = vmatprep.mubr.f32.mxu1 %v14461_v33  ;;  %2069 = vmatprep.mubr.f32.mxu0 %v14461_v33 }
  0xf1   :  { %v10770_v6 = vpop.f32.mrb[8].mxu1 }
  0xf2   :  { %14563 = vst [vmem:[#allocation163_spill] sm:$0xff] %v10770_v6  ;;  %v10772_v19 = vpop.f32.mrb[9].mxu1  ;;  %1646 = vmatmul.mubr.f32.gmra.mrb[68].mxu1 %v10352_v18  ;;  %2072 = vmatmul.mubr.f32.gmra.mrb[68].mxu0 %v10373_v48  ;;  %v14587_v6 = vld [vmem:[#allocation22_spill] sm:$0xff]  ;;  %v14698_v48 = vld [vmem:[#allocation75_spill] sm:$0xff] }
  0xf3   :  { %14564 = vst [vmem:[#allocation164_spill] sm:$0xff] %v10772_v19  ;;  %1651 = vmatprep.mubr.f32.mxu1 %v14461_v33  ;;  %2077 = vmatprep.mubr.f32.mxu0 %v14461_v33 }
  0xf5   :  { %v10778_v21 = vpop.f32.mrb[10].mxu1 }
  0xf6   :  { %14565 = vst [vmem:[#allocation165_spill] sm:$0xff] %v10778_v21  ;;  %v10780_v26 = vpop.f32.mrb[11].mxu1  ;;  %1653 = vmatmul.mubr.f32.gmra.mrb[70].mxu1 %v10384_v30  ;;  %2080 = vmatmul.mubr.f32.gmra.mrb[70].mxu0 %v10403_v14  ;;  %v14697_v14 = vld [vmem:[#allocation117_spill] sm:$0xff] }
  0xf7   :  { %14566 = vst [vmem:[#allocation166_spill] sm:$0xff] %v10780_v26  ;;  %1658 = vmatprep.mubr.f32.mxu1 %v14461_v33  ;;  %2085 = vmatprep.mubr.f32.mxu0 %v14461_v33 }
  0xf9   :  { %v10786_v53 = vpop.f32.mrb[12].mxu1 }
  0xfa   :  { %14567 = vst [vmem:[#allocation167_spill] sm:$0xff] %v10786_v53  ;;  %v10788_v19 = vpop.f32.mrb[13].mxu1  ;;  %1660 = vmatmul.mubr.f32.gmra.mrb[72].mxu1 %v10392_v16  ;;  %2088 = vmatmul.mubr.f32.gmra.mrb[72].mxu0 %v10413_v1 }
  0xfb   :  { %14568 = vst [vmem:[#allocation168_spill] sm:$0xff] %v10788_v19  ;;  %1665 = vmatprep.mubr.f32.mxu1 %v14461_v33  ;;  %2093 = vmatprep.mubr.f32.mxu0 %v14461_v33 }
  0xfd   :  { %v10794_v26 = vpop.f32.mrb[14].mxu1 }
  0xfe   :  { %14569 = vst [vmem:[#allocation169_spill] sm:$0xff] %v10794_v26  ;;  %v10796_v21 = vpop.f32.mrb[15].mxu1  ;;  %1667 = vmatmul.mubr.f32.gmra.mrb[74].mxu1 %v10423_v15  ;;  %2096 = vmatmul.mubr.f32.gmra.mrb[74].mxu0 %v10441_v24 }
  0xff   :  { %14570 = vst [vmem:[#allocation170_spill] sm:$0xff] %v10796_v21  ;;  %1672 = vmatprep.mubr.f32.mxu1 %v14461_v33  ;;  %2101 = vmatprep.mubr.f32.mxu0 %v14461_v33 }
 0x101   :  { %v10802_v19 = vpop.f32.mrb[16].mxu1 }
 0x102   :  { %14571 = vst [vmem:[#allocation171_spill] sm:$0xff] %v10802_v19  ;;  %v10804_v53 = vpop.f32.mrb[17].mxu1  ;;  %1674 = vmatmul.mubr.f32.gmra.mrb[76].mxu1 %v10443_v34  ;;  %2104 = vmatmul.mubr.f32.gmra.mrb[76].mxu0 %v10462_v11  ;;  %v14692_v11 = vld [vmem:[#allocation115_spill] sm:$0xff] }
 0x103   :  { %14572 = vst [vmem:[#allocation172_spill] sm:$0xff] %v10804_v53  ;;  %1679 = vmatprep.mubr.f32.mxu1 %v14461_v33  ;;  %2109 = vmatprep.mubr.f32.mxu0 %v14461_v33 }
 0x105   :  { %v10810_v21 = vpop.f32.mrb[18].mxu1 }
 0x106   :  { %14573 = vst [vmem:[#allocation173_spill] sm:$0xff] %v10810_v21  ;;  %v10812_v26 = vpop.f32.mrb[19].mxu1  ;;  %1681 = vmatmul.mubr.f32.gmra.mrb[78].mxu1 %v10464_v63  ;;  %2112 = vmatmul.mubr.f32.gmra.mrb[78].mxu0 %v10486_v43  ;;  %v14691_v43 = vld [vmem:[#allocation66_spill] sm:$0xff] }
 0x107   :  { %14574 = vst [vmem:[#allocation174_spill] sm:$0xff] %v10812_v26  ;;  %1686 = vmatprep.mubr.f32.mxu1 %v14461_v33  ;;  %2117 = vmatprep.mubr.f32.mxu0 %v14461_v33 }
 0x109   :  { %v10818_v53 = vpop.f32.mrb[20].mxu1 }
 0x10a   :  { %14575 = vst [vmem:[#allocation175_spill] sm:$0xff] %v10818_v53  ;;  %v10820_v19 = vpop.f32.mrb[21].mxu1  ;;  %1688 = vmatmul.mubr.f32.gmra.mrb[80].mxu1 %v10472_v58  ;;  %2120 = vmatmul.mubr.f32.gmra.mrb[80].mxu0 %v10496_v3 }
 0x10b   :  { %14576 = vst [vmem:[#allocation176_spill] sm:$0xff] %v10820_v19  ;;  %1693 = vmatprep.mubr.f32.mxu1 %v14461_v33  ;;  %2125 = vmatprep.mubr.f32.mxu0 %v14461_v33 }
 0x10d   :  { %v10826_v26 = vpop.f32.mrb[22].mxu1 }
 0x10e   :  { %14577 = vst [vmem:[#allocation177_spill] sm:$0xff] %v10826_v26  ;;  %v10828_v21 = vpop.f32.mrb[23].mxu1  ;;  %1695 = vmatmul.mubr.f32.gmra.mrb[82].mxu1 %v10510_v54  ;;  %2128 = vmatmul.mubr.f32.gmra.mrb[82].mxu0 %v10532_v12  ;;  %v14688_v12 = vld [vmem:[#allocation62_spill] sm:$0xff] }
 0x10f   :  { %14578 = vst [vmem:[#allocation178_spill] sm:$0xff] %v10828_v21  ;;  %1700 = vmatprep.mubr.f32.mxu1 %v14461_v33  ;;  %2133 = vmatprep.mubr.f32.mxu0 %v14461_v33 }
 0x111   :  { %v10834_v19 = vpop.f32.mrb[24].mxu1 }
 0x112   :  { %14579 = vst [vmem:[#allocation179_spill] sm:$0xff] %v10834_v19  ;;  %v10836_v53 = vpop.f32.mrb[25].mxu1  ;;  %1702 = vmatmul.mubr.f32.gmra.mrb[84].mxu1 %v10518_v29  ;;  %2136 = vmatmul.mubr.f32.gmra.mrb[84].mxu0 %v10542_v31  ;;  %v14605_v31 = vld [vmem:[#allocation44_spill] sm:$0xff] }
 0x113   :  { %14580 = vst [vmem:[#allocation180_spill] sm:$0xff] %v10836_v53  ;;  %1707 = vmatprep.mubr.f32.mxu1 %v14461_v33  ;;  %2141 = vmatprep.mubr.f32.mxu0 %v14461_v33 }
 0x115   :  { %v10842_v21 = vpop.f32.mrb[26].mxu1 }
 0x116   :  { %14581 = vst [vmem:[#allocation181_spill] sm:$0xff] %v10842_v21  ;;  %v10844_v26 = vpop.f32.mrb[27].mxu1  ;;  %1709 = vmatmul.mubr.f32.gmra.mrb[86].mxu1 %v10556_v45  ;;  %2144 = vmatmul.mubr.f32.gmra.mrb[86].mxu0 %v10578_v22  ;;  %v14591_v22 = vld [vmem:[#allocation17_spill] sm:$0xff] }
 0x117   :  { %14582 = vst [vmem:[#allocation182_spill] sm:$0xff] %v10844_v26  ;;  %1714 = vmatprep.mubr.f32.mxu1 %v14461_v33  ;;  %2149 = vmatprep.mubr.f32.mxu0 %v14461_v33 }
 0x119   :  { %v10850_v53 = vpop.f32.mrb[28].mxu1 }
 0x11a   :  { %14583 = vst [vmem:[#allocation183_spill] sm:$0xff] %v10850_v53  ;;  %v10852_v19 = vpop.f32.mrb[29].mxu1  ;;  %1716 = vmatmul.mubr.f32.gmra.mrb[88].mxu1 %v10564_v39  ;;  %2152 = vmatmul.mubr.f32.gmra.mrb[88].mxu0 %v10585_v44  ;;  %v14590_v44 = vld [vmem:[#allocation24_spill] sm:$0xff] }
 0x11b   :  { %14584 = vst [vmem:[#allocation184_spill] sm:$0xff] %v10852_v19  ;;  %1721 = vmatprep.mubr.f32.mxu1 %v14461_v33  ;;  %2157 = vmatprep.mubr.f32.mxu0 %v14461_v33 }
 0x11d   :  { %v10858_v26 = vpop.f32.mrb[30].mxu1 }
 0x11e   :  { %14585 = vst [vmem:[#allocation185_spill] sm:$0xff] %v10858_v26  ;;  %v10860_v21 = vpop.f32.mrb[31].mxu1  ;;  %1723 = vmatmul.mubr.f32.gmra.mrb[90].mxu1 %v10598_v28  ;;  %2160 = vmatmul.mubr.f32.gmra.mrb[90].mxu0 %v10615_v17  ;;  %v14592_v26 = vld [vmem:[#allocation28_spill] sm:$0xff]  ;;  %v14594_v17 = vld [vmem:[#allocation10_spill] sm:$0xff] }
 0x11f   :  { %14586 = vst [vmem:[#allocation186_spill] sm:$0xff] %v10860_v21  ;;  %8286 = vmatprep.mubr.f32.mxu1 %v14587_v6  ;;  %2232 = vmatprep.mubr.f32.mxu0 %v14461_v33  ;;  %v14595_v6 = vand.u32 4294901760, %v14594_v17  ;;  %v14603_v17 = vld [vmem:[#allocation39_spill] sm:$0xff] }
 0x121   :  { %v10866_v19 = vpop.f32.mrb[32].mxu1 }
 0x122   :  { %14588 = vst [vmem:[#allocation22_spill] sm:$0xff] %v10866_v19  ;;  %v10868_v53 = vpop.f32.mrb[33].mxu1  ;;  %8287 = vmatmul.mubr.f32.vlgmr.msra.gmra.mrb[92].mxu1 %v14590_v44  ;;  %2236 = vmatmul.mubr.f32.vlgmr.msra.gmra.mrb[0].mxu0 %v14591_v22  ;;  %v14598_v44 = vld [vmem:[#allocation7_spill] sm:$0xff] }
 0x123   :  { %14589 = vst [vmem:[#allocation187_spill] sm:$0xff] %v10868_v53  ;;  %8356 = vmatpush3.msra.mxu1 %v10673_v0  ;;  %8289 = vmatprep.mubr.f32.mxu1 %v14592_v26  ;;  %v14597_v53 = vld [vmem:[#allocation32_spill] sm:$0xff]  ;;  %v14599_v0 = vld [vmem:[#allocation18_spill] sm:$0xff]  ;;  %v14600_v22 = vld [vmem:[#allocation35_spill] sm:$0xff] }
 0x124   :  { %2241 = vmatprep.mubr.f32.mxu0 %v14461_v33  ;;  %2654 = vmatpush1.msra.mxu0 %v14595_v6  ;;  %v14604_v6 = vld [vmem:[#allocation19_spill] sm:$0xff] }
 0x125   :  { %v10875_v21 = vpop.f32.mrb[34].mxu1  ;;  %8426 = vmatprep.subr.mxu1 %v10636_v20  ;;  %3041 = vmatprep.subr.mxu0 %v14598_v44 }
 0x126   :  { %14593 = vst [vmem:[#allocation24_spill] sm:$0xff] %v10875_v21  ;;  %v10880_v19 = vpop.f32.mrb[35].mxu1  ;;  %8290 = vmatmul.mubr.f32.gmra.mrb[94].mxu1 %v14597_v53  ;;  %2245 = vmatmul.mubr.f32.gmra.mrb[2].mxu0 %v14599_v0  ;;  %v14610_v0 = vld [vmem:[#allocation53_spill] sm:$0xff] }
 0x127   :  { %14596 = vst [vmem:[#allocation28_spill] sm:$0xff] %v10880_v19  ;;  %8292 = vmatprep.mubr.f32.mxu1 %v14600_v22  ;;  %2250 = vmatprep.mubr.f32.mxu0 %v14461_v33  ;;  %v14608_v19 = vld [vmem:[#allocation48_spill] sm:$0xff]  ;;  %v14609_v22 = vld [vmem:[#allocation25_spill] sm:$0xff] }
 0x129   :  { %v10887_v26 = vpop.f32.mrb[36].mxu1 }
 0x12a   :  { %14601 = vst [vmem:[#allocation10_spill] sm:$0xff] %v10887_v26  ;;  %v10889_v21 = vpop.f32.mrb[37].mxu1  ;;  %8293 = vmatmul.mubr.f32.gmra.mrb[96].mxu1 %v14603_v17  ;;  %2254 = vmatmul.mubr.f32.gmra.mrb[4].mxu0 %v14604_v6  ;;  %v14613_v26 = vld [vmem:[#allocation57_spill] sm:$0xff]  ;;  %v14615_v6 = vld [vmem:[#allocation60_spill] sm:$0xff] }
 0x12b   :  { %14602 = vst [vmem:[#allocation32_spill] sm:$0xff] %v10889_v21  ;;  %8295 = vmatprep.mubr.f32.mxu1 %v14605_v31  ;;  %2259 = vmatprep.mubr.f32.mxu0 %v14461_v33  ;;  %v14614_v31 = vld [vmem:[#allocation29_spill] sm:$0xff] }
 0x12d   :  { %v10895_v53 = vpop.f32.mrb[38].mxu1 }
 0x12e   :  { %14606 = vst [vmem:[#allocation7_spill] sm:$0xff] %v10895_v53  ;;  %v10897_v44 = vpop.f32.mrb[39].mxu1  ;;  %8296 = vmatmul.mubr.f32.gmra.mrb[98].mxu1 %v14608_v19  ;;  %2263 = vmatmul.mubr.f32.gmra.mrb[6].mxu0 %v14609_v22  ;;  %v14618_v53 = vld [vmem:[#allocation63_spill] sm:$0xff]  ;;  %v14620_v22 = vld [vmem:[#allocation68_spill] sm:$0xff] }
 0x12f   :  { %14607 = vst [vmem:[#allocation35_spill] sm:$0xff] %v10897_v44  ;;  %8298 = vmatprep.mubr.f32.mxu1 %v14610_v0  ;;  %2268 = vmatprep.mubr.f32.mxu0 %v14461_v33  ;;  %v14619_v0 = vld [vmem:[#allocation31_spill] sm:$0xff] }
 0x131   :  { %v10903_v21 = vpop.f32.mrb[40].mxu1 }
 0x132   :  { %14611 = vst [vmem:[#allocation39_spill] sm:$0xff] %v10903_v21  ;;  %v10905_v17 = vpop.f32.mrb[41].mxu1  ;;  %8299 = vmatmul.mubr.f32.gmra.mrb[100].mxu1 %v14613_v26  ;;  %2272 = vmatmul.mubr.f32.gmra.mrb[8].mxu0 %v14614_v31  ;;  %v14623_v21 = vld [vmem:[#allocation72_spill] sm:$0xff] }
 0x133   :  { %14612 = vst [vmem:[#allocation44_spill] sm:$0xff] %v10905_v17  ;;  %8301 = vmatprep.mubr.f32.mxu1 %v14615_v6  ;;  %2277 = vmatprep.mubr.f32.mxu0 %v14461_v33  ;;  %v14624_v6 = vld [vmem:[#allocation36_spill] sm:$0xff] }
 0x134   :  { %v14625_v31 = vld [vmem:[#allocation76_spill] sm:$0xff] }
 0x135   :  { %v10911_v44 = vpop.f32.mrb[42].mxu1 }
 0x136   :  { %14616 = vst [vmem:[#allocation48_spill] sm:$0xff] %v10911_v44  ;;  %v10913_v19 = vpop.f32.mrb[43].mxu1  ;;  %8302 = vmatmul.mubr.f32.gmra.mrb[102].mxu1 %v14618_v53  ;;  %2281 = vmatmul.mubr.f32.gmra.mrb[10].mxu0 %v14619_v0  ;;  %v14627_v53 = vld [vmem:[#allocation40_spill] sm:$0xff]  ;;  %v14687_v0 = vld [vmem:[#allocation113_spill] sm:$0xff] }
 0x137   :  { %14617 = vst [vmem:[#allocation53_spill] sm:$0xff] %v10913_v19  ;;  %8304 = vmatprep.mubr.f32.mxu1 %v14620_v22  ;;  %2286 = vmatprep.mubr.f32.mxu0 %v14461_v33  ;;  %v14626_v19 = vld [vmem:[#allocation81_spill] sm:$0xff]  ;;  %v14628_v44 = vld [vmem:[#allocation84_spill] sm:$0xff] }
 0x138   :  { %v14629_v22 = vld [vmem:[#allocation88_spill] sm:$0xff] }
 0x139   :  { %v10919_v17 = vpop.f32.mrb[44].mxu1 }
 0x13a   :  { %14621 = vst [vmem:[#allocation57_spill] sm:$0xff] %v10919_v17  ;;  %v10921_v26 = vpop.f32.mrb[45].mxu1  ;;  %8305 = vmatmul.mubr.f32.gmra.mrb[104].mxu1 %v14623_v21  ;;  %2290 = vmatmul.mubr.f32.gmra.mrb[12].mxu0 %v14624_v6  ;;  %v14630_v17 = vld [vmem:[#allocation45_spill] sm:$0xff]  ;;  %v14632_v21 = vld [vmem:[#allocation94_spill] sm:$0xff]  ;;  %v14634_v6 = vld [vmem:[#allocation96_spill] sm:$0xff] }
 0x13b   :  { %14622 = vst [vmem:[#allocation60_spill] sm:$0xff] %v10921_v26  ;;  %8307 = vmatprep.mubr.f32.mxu1 %v14625_v31  ;;  %2295 = vmatprep.mubr.f32.mxu0 %v14461_v33  ;;  %v14631_v26 = vld [vmem:[#allocation90_spill] sm:$0xff]  ;;  %v14633_v31 = vld [vmem:[#allocation49_spill] sm:$0xff] }
 0x13e   :  { %8308 = vmatmul.mubr.f32.gmra.mrb[106].mxu1 %v14626_v19  ;;  %2299 = vmatmul.mubr.f32.gmra.mrb[14].mxu0 %v14627_v53  ;;  %v14635_v19 = vld [vmem:[#allocation98_spill] sm:$0xff]  ;;  %v14637_v53 = vld [vmem:[#allocation100_spill] sm:$0xff] }
 0x13f   :  { %8310 = vmatprep.mubr.f32.mxu1 %v14628_v44  ;;  %2304 = vmatprep.mubr.f32.mxu0 %v14461_v33  ;;  %v14636_v44 = vld [vmem:[#allocation54_spill] sm:$0xff] }
 0x142   :  { %8311 = vmatmul.mubr.f32.gmra.mrb[108].mxu1 %v14629_v22  ;;  %2308 = vmatmul.mubr.f32.gmra.mrb[16].mxu0 %v14630_v17  ;;  %v14638_v22 = vld [vmem:[#allocation102_spill] sm:$0xff]  ;;  %v14640_v17 = vld [vmem:[#allocation104_spill] sm:$0xff] }
 0x143   :  { %8313 = vmatprep.mubr.f32.mxu1 %v14631_v26  ;;  %2313 = vmatprep.mubr.f32.mxu0 %v14461_v33  ;;  %v14639_v26 = vld [vmem:[#allocation55_spill] sm:$0xff] }
 0x146   :  { %8314 = vmatmul.mubr.f32.gmra.mrb[110].mxu1 %v14632_v21  ;;  %2317 = vmatmul.mubr.f32.gmra.mrb[18].mxu0 %v14633_v31  ;;  %v14641_v21 = vld [vmem:[#allocation107_spill] sm:$0xff]  ;;  %v14643_v31 = vld [vmem:[#allocation110_spill] sm:$0xff] }
 0x147   :  { %8316 = vmatprep.mubr.f32.mxu1 %v14634_v6  ;;  %2322 = vmatprep.mubr.f32.mxu0 %v14461_v33  ;;  %v14642_v6 = vld [vmem:[#allocation59_spill] sm:$0xff] }
 0x14a   :  { %8317 = vmatmul.mubr.f32.gmra.mrb[112].mxu1 %v14635_v19  ;;  %2326 = vmatmul.mubr.f32.gmra.mrb[20].mxu0 %v14636_v44  ;;  %v14644_v19 = vld [vmem:[#allocation112_spill] sm:$0xff]  ;;  %v14646_v44 = vld [vmem:[#allocation114_spill] sm:$0xff] }
 0x14b   :  { %8319 = vmatprep.mubr.f32.mxu1 %v14637_v53  ;;  %2331 = vmatprep.mubr.f32.mxu0 %v14461_v33  ;;  %v14645_v53 = vld [vmem:[#allocation64_spill] sm:$0xff] }
 0x14e   :  { %8320 = vmatmul.mubr.f32.gmra.mrb[114].mxu1 %v14638_v22  ;;  %2335 = vmatmul.mubr.f32.gmra.mrb[22].mxu0 %v14639_v26  ;;  %v14647_v22 = vld [vmem:[#allocation116_spill] sm:$0xff]  ;;  %v14649_v26 = vld [vmem:[#allocation118_spill] sm:$0xff] }
 0x14f   :  { %8322 = vmatprep.mubr.f32.mxu1 %v14640_v17  ;;  %2340 = vmatprep.mubr.f32.mxu0 %v14461_v33  ;;  %v14648_v17 = vld [vmem:[#allocation69_spill] sm:$0xff] }
 0x152   :  { %8323 = vmatmul.mubr.f32.gmra.mrb[116].mxu1 %v14641_v21  ;;  %2344 = vmatmul.mubr.f32.gmra.mrb[24].mxu0 %v14642_v6  ;;  %v14650_v21 = vld [vmem:[#allocation122_spill] sm:$0xff]  ;;  %v14652_v6 = vld [vmem:[#allocation124_spill] sm:$0xff] }
 0x153   :  { %8325 = vmatprep.mubr.f32.mxu1 %v14643_v31  ;;  %2349 = vmatprep.mubr.f32.mxu0 %v14461_v33  ;;  %v14651_v31 = vld [vmem:[#allocation73_spill] sm:$0xff] }
 0x156   :  { %8326 = vmatmul.mubr.f32.gmra.mrb[118].mxu1 %v14644_v19  ;;  %2353 = vmatmul.mubr.f32.gmra.mrb[26].mxu0 %v14645_v53  ;;  %v14653_v19 = vld [vmem:[#allocation128_spill] sm:$0xff]  ;;  %v14655_v53 = vld [vmem:[#allocation131_spill] sm:$0xff] }
 0x157   :  { %8328 = vmatprep.mubr.f32.mxu1 %v14646_v44  ;;  %2358 = vmatprep.mubr.f32.mxu0 %v14461_v33  ;;  %v14654_v44 = vld [vmem:[#allocation77_spill] sm:$0xff] }
 0x15a   :  { %8329 = vmatmul.mubr.f32.gmra.mrb[120].mxu1 %v14647_v22  ;;  %2362 = vmatmul.mubr.f32.gmra.mrb[28].mxu0 %v14648_v17  ;;  %v14656_v22 = vld [vmem:[#allocation133_spill] sm:$0xff]  ;;  %v14658_v17 = vld [vmem:[#allocation136_spill] sm:$0xff] }
 0x15b   :  { %8331 = vmatprep.mubr.f32.mxu1 %v14649_v26  ;;  %2367 = vmatprep.mubr.f32.mxu0 %v14461_v33  ;;  %v14657_v26 = vld [vmem:[#allocation82_spill] sm:$0xff] }
 0x15e   :  { %8332 = vmatmul.mubr.f32.gmra.mrb[122].mxu1 %v14650_v21  ;;  %2371 = vmatmul.mubr.f32.gmra.mrb[30].mxu0 %v14651_v31  ;;  %v14659_v21 = vld [vmem:[#allocation140_spill] sm:$0xff]  ;;  %v14661_v31 = vld [vmem:[#allocation142_spill] sm:$0xff] }
 0x15f   :  { %8334 = vmatprep.mubr.f32.mxu1 %v14652_v6  ;;  %2376 = vmatprep.mubr.f32.mxu0 %v14461_v33  ;;  %v14660_v6 = vld [vmem:[#allocation85_spill] sm:$0xff] }
 0x162   :  { %8335 = vmatmul.mubr.f32.gmra.mrb[124].mxu1 %v14653_v19  ;;  %2380 = vmatmul.mubr.f32.gmra.mrb[32].mxu0 %v14654_v44  ;;  %v14663_v19 = vld [vmem:[#allocation147_spill] sm:$0xff]  ;;  %v14685_v44 = vld [vmem:[#allocation52_spill] sm:$0xff] }
 0x163   :  { %8337 = vmatprep.mubr.f32.mxu1 %v14655_v53  ;;  %2385 = vmatprep.mubr.f32.mxu0 %v14461_v33  ;;  %v14662_v53 = vld [vmem:[#allocation87_spill] sm:$0xff] }
 0x166   :  { %8338 = vmatmul.mubr.f32.gmra.mrb[126].mxu1 %v14656_v22  ;;  %2389 = vmatmul.mubr.f32.gmra.mrb[34].mxu0 %v14657_v26  ;;  %v14667_v22 = vld [vmem:[#allocation9_spill] sm:$0xff] }
 0x167   :  { %8340 = vmatprep.mubr.f32.mxu1 %v14658_v17  ;;  %2394 = vmatprep.mubr.f32.mxu0 %v14461_v33  ;;  %v14664_v17 = vld [vmem:[#allocation91_spill] sm:$0xff]  ;;  %v14684_v26 = vld [vmem:[#allocation109_spill] sm:$0xff] }
 0x16a   :  { %8341 = vmatmul.mubr.f32.gmra.mrb[128].mxu1 %v14659_v21  ;;  %2398 = vmatmul.mubr.f32.gmra.mrb[36].mxu0 %v14660_v6  ;;  %v14673_v21 = vld [vmem:[#allocation21_spill] sm:$0xff]  ;;  %v14682_v6 = vld [vmem:[#allocation43_spill] sm:$0xff] }
 0x16b   :  { %8343 = vmatprep.mubr.f32.mxu1 %v14661_v31  ;;  %2403 = vmatprep.mubr.f32.mxu0 %v14461_v33  ;;  %v14665_v31 = vld [vmem:[#allocation95_spill] sm:$0xff] }
 0x16e   :  { %8344 = vmatmul.mubr.f32.gmra.mrb[130].mxu1 %v10549_v13  ;;  %2407 = vmatmul.mubr.f32.gmra.mrb[38].mxu0 %v14662_v53  ;;  %v14666_v13 = vld [vmem:[#allocation97_spill] sm:$0xff]  ;;  %v14681_v53 = vld [vmem:[#allocation108_spill] sm:$0xff] }
 0x16f   :  { %8346 = vmatprep.mubr.f32.mxu1 %v14663_v19  ;;  %2412 = vmatprep.mubr.f32.mxu0 %v14461_v33  ;;  %v14674_v19 = vld [vmem:[#allocation23_spill] sm:$0xff] }
 0x172   :  { %8347 = vmatmul.mubr.f32.gmra.mrb[132].mxu1 %v10591_v60  ;;  %2416 = vmatmul.mubr.f32.gmra.mrb[40].mxu0 %v14664_v17  ;;  %v14668_v60 = vld [vmem:[#allocation11_spill] sm:$0xff]  ;;  %v14679_v17 = vld [vmem:[#allocation38_spill] sm:$0xff] }
 0x173   :  { %8349 = vmatprep.mubr.f32.mxu1 %v10607_v7  ;;  %2421 = vmatprep.mubr.f32.mxu0 %v14461_v33  ;;  %v14669_v7 = vld [vmem:[#allocation99_spill] sm:$0xff] }
 0x176   :  { %8350 = vmatmul.mubr.f32.gmra.mrb[134].mxu1 %v10624_v32  ;;  %2425 = vmatmul.mubr.f32.gmra.mrb[42].mxu0 %v14665_v31  ;;  %v14670_v32 = vld [vmem:[#allocation12_spill] sm:$0xff]  ;;  %v14678_v31 = vld [vmem:[#allocation105_spill] sm:$0xff] }
 0x177   :  { %8352 = vmatprep.mubr.f32.mxu1 %v10642_v62  ;;  %2430 = vmatprep.mubr.f32.mxu0 %v14461_v33  ;;  %v14671_v62 = vld [vmem:[#allocation14_spill] sm:$0xff] }
 0x17a   :  { %8353 = vmatmul.mubr.f32.gmra.mrb[136].mxu1 %v10656_v49  ;;  %2434 = vmatmul.mubr.f32.gmra.mrb[44].mxu0 %v14666_v13  ;;  %v14672_v49 = vld [vmem:[#allocation101_spill] sm:$0xff]  ;;  %v14675_v13 = vld [vmem:[#allocation103_spill] sm:$0xff] }
 0x17b   :  { %8357 = vmatprep.mubr.f32.mxu1 %v14667_v22  ;;  %2439 = vmatprep.mubr.f32.mxu0 %v14461_v33 }
 0x17e   :  { %8358 = vmatmul.mubr.f32.vlgmr.msra.gmra.mrb[92].mxu1 %v14668_v60  ;;  %2443 = vmatmul.mubr.f32.gmra.mrb[46].mxu0 %v14669_v7  ;;  %v14677_v7 = vld [vmem:[#allocation34_spill] sm:$0xff] }
 0x17f   :  { %8427 = vmatpush3.msra.mxu1 %v10636_v20  ;;  %8360 = vmatprep.mubr.f32.mxu1 %v14670_v32  ;;  %v14676_v20 = vld [vmem:[#allocation30_spill] sm:$0xff] }
 0x180   :  { %2448 = vmatprep.mubr.f32.mxu0 %v14461_v33  ;;  %8497 = vmatprep.subr.mxu1 %v10059_v9 }
 0x182   :  { %8361 = vmatmul.mubr.f32.gmra.mrb[94].mxu1 %v14671_v62  ;;  %2452 = vmatmul.mubr.f32.gmra.mrb[48].mxu0 %v14672_v49  ;;  %v14680_v49 = vld [vmem:[#allocation42_spill] sm:$0xff] }
 0x183   :  { %8363 = vmatprep.mubr.f32.mxu1 %v14673_v21  ;;  %2457 = vmatprep.mubr.f32.mxu0 %v14461_v33 }
 0x186   :  { %8364 = vmatmul.mubr.f32.gmra.mrb[96].mxu1 %v14674_v19  ;;  %2461 = vmatmul.mubr.f32.gmra.mrb[50].mxu0 %v14675_v13  ;;  %v14683_v13 = vld [vmem:[#allocation47_spill] sm:$0xff] }
 0x187   :  { %8366 = vmatprep.mubr.f32.mxu1 %v14676_v20  ;;  %2466 = vmatprep.mubr.f32.mxu0 %v14461_v33 }
 0x18a   :  { %8367 = vmatmul.mubr.f32.gmra.mrb[98].mxu1 %v14677_v7  ;;  %2470 = vmatmul.mubr.f32.gmra.mrb[52].mxu0 %v14678_v31  ;;  %v14686_v31 = vld [vmem:[#allocation58_spill] sm:$0xff] }
 0x18b   :  { %8369 = vmatprep.mubr.f32.mxu1 %v14679_v17  ;;  %2475 = vmatprep.mubr.f32.mxu0 %v14461_v33 }
 0x18e   :  { %8370 = vmatmul.mubr.f32.gmra.mrb[100].mxu1 %v14680_v49  ;;  %2479 = vmatmul.mubr.f32.gmra.mrb[54].mxu0 %v14681_v53 }
 0x18f   :  { %8372 = vmatprep.mubr.f32.mxu1 %v14682_v6  ;;  %2484 = vmatprep.mubr.f32.mxu0 %v14461_v33 }
 0x192   :  { %8373 = vmatmul.mubr.f32.gmra.mrb[102].mxu1 %v14683_v13  ;;  %2488 = vmatmul.mubr.f32.gmra.mrb[56].mxu0 %v14684_v26  ;;  %v14693_v26 = vld [vmem:[#allocation67_spill] sm:$0xff] }
 0x193   :  { %8375 = vmatprep.mubr.f32.mxu1 %v14685_v44  ;;  %2493 = vmatprep.mubr.f32.mxu0 %v14461_v33 }
 0x196   :  { %8376 = vmatmul.mubr.f32.gmra.mrb[104].mxu1 %v14686_v31  ;;  %2497 = vmatmul.mubr.f32.gmra.mrb[58].mxu0 %v14687_v0  ;;  %v14696_v0 = vld [vmem:[#allocation74_spill] sm:$0xff] }
 0x197   :  { %8378 = vmatprep.mubr.f32.mxu1 %v14688_v12  ;;  %2502 = vmatprep.mubr.f32.mxu0 %v14461_v33 }
 0x199   :  { %v11021_v53 = vpop.f32.mrb[46].mxu1 }
 0x19a   :  { %14689 = vst [vmem:[#allocation63_spill] sm:$0xff] %v11021_v53  ;;  %v11023_v3 = vpop.f32.mrb[47].mxu1  ;;  %8379 = vmatmul.mubr.f32.gmra.mrb[106].mxu1 %v14691_v43  ;;  %2506 = vmatmul.mubr.f32.gmra.mrb[60].mxu0 %v14692_v11  ;;  %v14701_v11 = vld [vmem:[#allocation80_spill] sm:$0xff] }
 0x19b   :  { %14690 = vst [vmem:[#allocation68_spill] sm:$0xff] %v11023_v3  ;;  %8381 = vmatprep.mubr.f32.mxu1 %v14693_v26  ;;  %2511 = vmatprep.mubr.f32.mxu0 %v14461_v33  ;;  %v14702_v26 = vld [vmem:[#allocation119_spill] sm:$0xff] }
 0x19d   :  { %v11029_v24 = vpop.f32.mrb[48].mxu1 }
 0x19e   :  { %14694 = vst [vmem:[#allocation72_spill] sm:$0xff] %v11029_v24  ;;  %v11031_v1 = vpop.f32.mrb[49].mxu1  ;;  %8382 = vmatmul.mubr.f32.gmra.mrb[108].mxu1 %v14696_v0  ;;  %2515 = vmatmul.mubr.f32.gmra.mrb[62].mxu0 %v14697_v14  ;;  %v14706_v14 = vld [vmem:[#allocation89_spill] sm:$0xff] }
 0x19f   :  { %14695 = vst [vmem:[#allocation76_spill] sm:$0xff] %v11031_v1  ;;  %8384 = vmatprep.mubr.f32.mxu1 %v14698_v48  ;;  %2520 = vmatprep.mubr.f32.mxu0 %v14461_v33  ;;  %v14707_v48 = vld [vmem:[#allocation123_spill] sm:$0xff]  ;;  %v14708_v0 = vld [vmem:[#allocation93_spill] sm:$0xff] }
 0x1a1   :  { %v11037_v3 = vpop.f32.mrb[50].mxu1 }
 0x1a2   :  { %14699 = vst [vmem:[#allocation81_spill] sm:$0xff] %v11037_v3  ;;  %v11039_v53 = vpop.f32.mrb[51].mxu1  ;;  %8385 = vmatmul.mubr.f32.gmra.mrb[110].mxu1 %v14701_v11  ;;  %2524 = vmatmul.mubr.f32.gmra.mrb[64].mxu0 %v14702_v26  ;;  %v14711_v26 = vld [vmem:[#allocation125_spill] sm:$0xff] }
 0x1a3   :  { %14700 = vst [vmem:[#allocation84_spill] sm:$0xff] %v11039_v53  ;;  %8387 = vmatprep.mubr.f32.mxu1 %v14703_v52  ;;  %2529 = vmatprep.mubr.f32.mxu0 %v14461_v33 }
 0x1a5   :  { %v11045_v1 = vpop.f32.mrb[52].mxu1 }
 0x1a6   :  { %14704 = vst [vmem:[#allocation88_spill] sm:$0xff] %v11045_v1  ;;  %v11047_v24 = vpop.f32.mrb[53].mxu1  ;;  %8388 = vmatmul.mubr.f32.gmra.mrb[112].mxu1 %v14706_v14  ;;  %2533 = vmatmul.mubr.f32.gmra.mrb[66].mxu0 %v14707_v48  ;;  %v14714_v48 = vld [vmem:[#allocation129_spill] sm:$0xff] }
 0x1a7   :  { %14705 = vst [vmem:[#allocation90_spill] sm:$0xff] %v11047_v24  ;;  %8390 = vmatprep.mubr.f32.mxu1 %v14708_v0  ;;  %2538 = vmatprep.mubr.f32.mxu0 %v14461_v33 }
 0x1a9   :  { %v11053_v53 = vpop.f32.mrb[54].mxu1 }
 0x1aa   :  { %14709 = vst [vmem:[#allocation94_spill] sm:$0xff] %v11053_v53  ;;  %v11055_v3 = vpop.f32.mrb[55].mxu1  ;;  %8391 = vmatmul.mubr.f32.gmra.mrb[114].mxu1 %v10141_v61  ;;  %2542 = vmatmul.mubr.f32.gmra.mrb[68].mxu0 %v14711_v26  ;;  %v14717_v26 = vld [vmem:[#allocation130_spill] sm:$0xff] }
 0x1ab   :  { %14710 = vst [vmem:[#allocation96_spill] sm:$0xff] %v11055_v3  ;;  %8393 = vmatprep.mubr.f32.mxu1 %v10149_v2  ;;  %2547 = vmatprep.mubr.f32.mxu0 %v14461_v33 }
 0x1ad   :  { %v11061_v24 = vpop.f32.mrb[56].mxu1 }
 0x1ae   :  { %14712 = vst [vmem:[#allocation98_spill] sm:$0xff] %v11061_v24  ;;  %v11063_v1 = vpop.f32.mrb[57].mxu1  ;;  %8394 = vmatmul.mubr.f32.gmra.mrb[116].mxu1 %v10169_v40  ;;  %2551 = vmatmul.mubr.f32.gmra.mrb[70].mxu0 %v14714_v48  ;;  %v14720_v48 = vld [vmem:[#allocation134_spill] sm:$0xff] }
 0x1af   :  { %14713 = vst [vmem:[#allocation100_spill] sm:$0xff] %v11063_v1  ;;  %8396 = vmatprep.mubr.f32.mxu1 %v10189_v50  ;;  %2556 = vmatprep.mubr.f32.mxu0 %v14461_v33 }
 0x1b1   :  { %v11069_v3 = vpop.f32.mrb[58].mxu1 }
 0x1b2   :  { %14715 = vst [vmem:[#allocation102_spill] sm:$0xff] %v11069_v3  ;;  %v11071_v53 = vpop.f32.mrb[59].mxu1  ;;  %8397 = vmatmul.mubr.f32.gmra.mrb[118].mxu1 %v10221_v8  ;;  %2560 = vmatmul.mubr.f32.gmra.mrb[72].mxu0 %v14717_v26  ;;  %v14723_v26 = vld [vmem:[#allocation137_spill] sm:$0xff] }
 0x1b3   :  { %14716 = vst [vmem:[#allocation104_spill] sm:$0xff] %v11071_v53  ;;  %8399 = vmatprep.mubr.f32.mxu1 %v10229_v10  ;;  %2565 = vmatprep.mubr.f32.mxu0 %v14461_v33 }
 0x1b5   :  { %v11077_v1 = vpop.f32.mrb[60].mxu1 }
 0x1b6   :  { %14718 = vst [vmem:[#allocation107_spill] sm:$0xff] %v11077_v1  ;;  %v11079_v24 = vpop.f32.mrb[61].mxu1  ;;  %8400 = vmatmul.mubr.f32.gmra.mrb[120].mxu1 %v10263_v37  ;;  %2569 = vmatmul.mubr.f32.gmra.mrb[74].mxu0 %v14720_v48  ;;  %v14726_v48 = vld [vmem:[#allocation141_spill] sm:$0xff] }
 0x1b7   :  { %14719 = vst [vmem:[#allocation110_spill] sm:$0xff] %v11079_v24  ;;  %8402 = vmatprep.mubr.f32.mxu1 %v10283_v56  ;;  %2574 = vmatprep.mubr.f32.mxu0 %v14461_v33 }
 0x1b9   :  { %v11085_v53 = vpop.f32.mrb[62].mxu1 }
 0x1ba   :  { %14721 = vst [vmem:[#allocation112_spill] sm:$0xff] %v11085_v53  ;;  %v11087_v3 = vpop.f32.mrb[63].mxu1  ;;  %8403 = vmatmul.mubr.f32.gmra.mrb[122].mxu1 %v10304_v47  ;;  %2578 = vmatmul.mubr.f32.gmra.mrb[76].mxu0 %v14723_v26  ;;  %v14729_v26 = vld [vmem:[#allocation143_spill] sm:$0xff] }
 0x1bb   :  { %14722 = vst [vmem:[#allocation114_spill] sm:$0xff] %v11087_v3  ;;  %8405 = vmatprep.mubr.f32.mxu1 %v10312_v4  ;;  %2583 = vmatprep.mubr.f32.mxu0 %v14461_v33 }
 0x1bd   :  { %v11093_v24 = vpop.f32.mrb[64].mxu1 }
 0x1be   :  { %14724 = vst [vmem:[#allocation116_spill] sm:$0xff] %v11093_v24  ;;  %v11095_v1 = vpop.f32.mrb[65].mxu1  ;;  %8406 = vmatmul.mubr.f32.gmra.mrb[124].mxu1 %v10344_v51  ;;  %2587 = vmatmul.mubr.f32.gmra.mrb[78].mxu0 %v14726_v48  ;;  %v14732_v48 = vld [vmem:[#allocation146_spill] sm:$0xff] }
 0x1bf   :  { %14725 = vst [vmem:[#allocation118_spill] sm:$0xff] %v11095_v1  ;;  %8408 = vmatprep.mubr.f32.mxu1 %v10352_v18  ;;  %2592 = vmatprep.mubr.f32.mxu0 %v14461_v33 }
 0x1c1   :  { %v11101_v3 = vpop.f32.mrb[66].mxu1 }
 0x1c2   :  { %14727 = vst [vmem:[#allocation122_spill] sm:$0xff] %v11101_v3  ;;  %v11103_v53 = vpop.f32.mrb[67].mxu1  ;;  %8409 = vmatmul.mubr.f32.gmra.mrb[126].mxu1 %v10384_v30  ;;  %2596 = vmatmul.mubr.f32.gmra.mrb[80].mxu0 %v14729_v26  ;;  %v14735_v26 = vld [vmem:[#allocation148_spill] sm:$0xff] }
 0x1c3   :  { %14728 = vst [vmem:[#allocation124_spill] sm:$0xff] %v11103_v53  ;;  %8411 = vmatprep.mubr.f32.mxu1 %v10392_v16  ;;  %2601 = vmatprep.mubr.f32.mxu0 %v14461_v33 }
 0x1c5   :  { %v11109_v1 = vpop.f32.mrb[68].mxu1 }
 0x1c6   :  { %14730 = vst [vmem:[#allocation128_spill] sm:$0xff] %v11109_v1  ;;  %v11111_v24 = vpop.f32.mrb[69].mxu1  ;;  %8412 = vmatmul.mubr.f32.gmra.mrb[128].mxu1 %v10423_v15  ;;  %2605 = vmatmul.mubr.f32.gmra.mrb[82].mxu0 %v14732_v48  ;;  %v14738_v48 = vld [vmem:[#allocation151_spill] sm:$0xff] }
 0x1c7   :  { %14731 = vst [vmem:[#allocation131_spill] sm:$0xff] %v11111_v24  ;;  %8414 = vmatprep.mubr.f32.mxu1 %v10443_v34  ;;  %2610 = vmatprep.mubr.f32.mxu0 %v14461_v33 }
 0x1c9   :  { %v11117_v53 = vpop.f32.mrb[70].mxu1 }
 0x1ca   :  { %14733 = vst [vmem:[#allocation133_spill] sm:$0xff] %v11117_v53  ;;  %v11119_v3 = vpop.f32.mrb[71].mxu1  ;;  %8415 = vmatmul.mubr.f32.gmra.mrb[130].mxu1 %v10464_v63  ;;  %2614 = vmatmul.mubr.f32.gmra.mrb[84].mxu0 %v14735_v26 }
 0x1cb   :  { %14734 = vst [vmem:[#allocation136_spill] sm:$0xff] %v11119_v3  ;;  %8417 = vmatprep.mubr.f32.mxu1 %v10472_v58  ;;  %2619 = vmatprep.mubr.f32.mxu0 %v14461_v33 }
 0x1cd   :  { %v11125_v24 = vpop.f32.mrb[72].mxu1 }
 0x1ce   :  { %14736 = vst [vmem:[#allocation140_spill] sm:$0xff] %v11125_v24  ;;  %v11127_v1 = vpop.f32.mrb[73].mxu1  ;;  %8418 = vmatmul.mubr.f32.gmra.mrb[132].mxu1 %v10510_v54  ;;  %2623 = vmatmul.mubr.f32.gmra.mrb[86].mxu0 %v14738_v48  ;;  %v14743_v48 = vld [vmem:[#allocation13_spill] sm:$0xff] }
 0x1cf   :  { %14737 = vst [vmem:[#allocation142_spill] sm:$0xff] %v11127_v1  ;;  %8420 = vmatprep.mubr.f32.mxu1 %v10518_v29  ;;  %2628 = vmatprep.mubr.f32.mxu0 %v14461_v33 }
 0x1d1   :  { %v11133_v3 = vpop.f32.mrb[74].mxu1 }
 0x1d2   :  { %14739 = vst [vmem:[#allocation147_spill] sm:$0xff] %v11133_v3  ;;  %v11135_v53 = vpop.f32.mrb[75].mxu1  ;;  %8421 = vmatmul.mubr.f32.gmra.mrb[134].mxu1 %v10556_v45  ;;  %2632 = vmatmul.mubr.f32.gmra.mrb[88].mxu0 %v10612_v5  ;;  %v14746_v5 = vld [vmem:[#allocation15_spill] sm:$0xff] }
 0x1d3   :  { %14740 = vst [vmem:[#allocation11_spill] sm:$0xff] %v11135_v53  ;;  %8423 = vmatprep.mubr.f32.mxu1 %v10564_v39  ;;  %2637 = vmatprep.mubr.f32.mxu0 %v14461_v33 }
 0x1d5   :  { %v11141_v1 = vpop.f32.mrb[76].mxu1 }
 0x1d6   :  { %14741 = vst [vmem:[#allocation12_spill] sm:$0xff] %v11141_v1  ;;  %v11143_v24 = vpop.f32.mrb[77].mxu1  ;;  %8424 = vmatmul.mubr.f32.gmra.mrb[136].mxu1 %v10598_v28  ;;  %2641 = vmatmul.mubr.f32.gmra.mrb[90].mxu0 %v10629_v42  ;;  %v14747_v1 = vld [vmem:[#allocation16_spill] sm:$0xff] }
 0x1d7   :  { %14742 = vst [vmem:[#allocation14_spill] sm:$0xff] %v11143_v24  ;;  %8428 = vmatprep.mubr.f32.mxu1 %v14743_v48  ;;  %2717 = vmatprep.mubr.f32.mxu0 %v14461_v33  ;;  %v14749_v28 = vld [vmem:[#allocation8_spill] sm:$0xff] }
 0x1d9   :  { %v11149_v53 = vpop.f32.mrb[78].mxu1 }
 0x1da   :  { %14744 = vst [vmem:[#allocation21_spill] sm:$0xff] %v11149_v53  ;;  %v11151_v3 = vpop.f32.mrb[79].mxu1  ;;  %8429 = vmatmul.mubr.f32.vlgmr.msra.gmra.mrb[92].mxu1 %v14746_v5  ;;  %2719 = vmatmul.mubr.f32.vlgmr.msra.gmra.mrb[0].mxu0 %v14667_v22  ;;  %v14751_v53 = vld [vmem:[#allocation20_spill] sm:$0xff]  ;;  %v14752_v5 = vld [vmem:[#allocation26_spill] sm:$0xff]  ;;  %v14755_v22 = vld [vmem:[#allocation27_spill] sm:$0xff] }
 0x1db   :  { %14745 = vst [vmem:[#allocation23_spill] sm:$0xff] %v11151_v3  ;;  %8498 = vmatpush3.msra.mxu1 %v10059_v9  ;;  %8431 = vmatprep.mubr.f32.mxu1 %v14747_v1 }
 0x1dc   :  { %2724 = vmatprep.mubr.f32.mxu0 %v14461_v33  ;;  %3043 = vmatpush1.msra.mxu0 %v14749_v28  ;;  %v14756_v28 = vld [vmem:[#allocation33_spill] sm:$0xff] }
 0x1dd   :  { %v11158_v24 = vpop.f32.mrb[80].mxu1  ;;  %8568 = vmatprep.subr.mxu1 %v10653_v25 }
 0x1de   :  { %14748 = vst [vmem:[#allocation30_spill] sm:$0xff] %v11158_v24  ;;  %v11162_v48 = vpop.f32.mrb[81].mxu1  ;;  %8432 = vmatmul.mubr.f32.gmra.mrb[94].mxu1 %v14751_v53  ;;  %2726 = vmatmul.mubr.f32.gmra.mrb[2].mxu0 %v14668_v60  ;;  %v14759_v24 = vld [vmem:[#allocation37_spill] sm:$0xff] }
 0x1df   :  { %14750 = vst [vmem:[#allocation34_spill] sm:$0xff] %v11162_v48  ;;  %8434 = vmatprep.mubr.f32.mxu1 %v14752_v5  ;;  %2731 = vmatprep.mubr.f32.mxu0 %v14461_v33  ;;  %v14760_v5 = vld [vmem:[#allocation41_spill] sm:$0xff] }
 0x1e1   :  { %v11168_v3 = vpop.f32.mrb[82].mxu1 }
 0x1e2   :  { %14753 = vst [vmem:[#allocation38_spill] sm:$0xff] %v11168_v3  ;;  %v11170_v1 = vpop.f32.mrb[83].mxu1  ;;  %8435 = vmatmul.mubr.f32.gmra.mrb[96].mxu1 %v14755_v22  ;;  %2733 = vmatmul.mubr.f32.gmra.mrb[4].mxu0 %v14670_v32  ;;  %v14763_v3 = vld [vmem:[#allocation46_spill] sm:$0xff] }
 0x1e3   :  { %14754 = vst [vmem:[#allocation42_spill] sm:$0xff] %v11170_v1  ;;  %8437 = vmatprep.mubr.f32.mxu1 %v14756_v28  ;;  %2738 = vmatprep.mubr.f32.mxu0 %v14461_v33  ;;  %v14764_v28 = vld [vmem:[#allocation50_spill] sm:$0xff] }
 0x1e5   :  { %v11176_v48 = vpop.f32.mrb[84].mxu1 }
 0x1e6   :  { %14757 = vst [vmem:[#allocation43_spill] sm:$0xff] %v11176_v48  ;;  %v11178_v53 = vpop.f32.mrb[85].mxu1  ;;  %8438 = vmatmul.mubr.f32.gmra.mrb[98].mxu1 %v14759_v24  ;;  %2740 = vmatmul.mubr.f32.gmra.mrb[6].mxu0 %v14671_v62  ;;  %v14766_v48 = vld [vmem:[#allocation51_spill] sm:$0xff] }
 0x1e7   :  { %14758 = vst [vmem:[#allocation47_spill] sm:$0xff] %v11178_v53  ;;  %8440 = vmatprep.mubr.f32.mxu1 %v14760_v5  ;;  %2745 = vmatprep.mubr.f32.mxu0 %v14461_v33  ;;  %v14767_v5 = vld [vmem:[#allocation56_spill] sm:$0xff] }
 0x1e9   :  { %v11184_v1 = vpop.f32.mrb[86].mxu1 }
 0x1ea   :  { %14761 = vst [vmem:[#allocation52_spill] sm:$0xff] %v11184_v1  ;;  %v11186_v22 = vpop.f32.mrb[87].mxu1  ;;  %8441 = vmatmul.mubr.f32.gmra.mrb[100].mxu1 %v14763_v3  ;;  %2747 = vmatmul.mubr.f32.gmra.mrb[8].mxu0 %v14673_v21  ;;  %v14769_v1 = vld [vmem:[#allocation61_spill] sm:$0xff] }
 0x1eb   :  { %14762 = vst [vmem:[#allocation58_spill] sm:$0xff] %v11186_v22  ;;  %8443 = vmatprep.mubr.f32.mxu1 %v14764_v28  ;;  %2752 = vmatprep.mubr.f32.mxu0 %v14461_v33  ;;  %v14770_v28 = vld [vmem:[#allocation65_spill] sm:$0xff] }
 0x1ed   :  { %v11192_v53 = vpop.f32.mrb[88].mxu1 }
 0x1ee   :  { %v11194_v24 = vpop.f32.mrb[89].mxu1  ;;  %8444 = vmatmul.mubr.f32.gmra.mrb[102].mxu1 %v14766_v48  ;;  %2754 = vmatmul.mubr.f32.gmra.mrb[10].mxu0 %v14674_v19  ;;  %v14772_v48 = vld [vmem:[#allocation71_spill] sm:$0xff] }
 0x1ef   :  { %14765 = vst [vmem:[#allocation62_spill] sm:$0xff] %v11194_v24  ;;  %8446 = vmatprep.mubr.f32.mxu1 %v14767_v5  ;;  %2759 = vmatprep.mubr.f32.mxu0 %v14461_v33  ;;  %v14771_v24 = vld [vmem:[#allocation70_spill] sm:$0xff] }
 0x1f0   :  { %v14773_v5 = vld [vmem:[#allocation78_spill] sm:$0xff] }
 0x1f1   :  { %v11200_v22 = vpop.f32.mrb[90].mxu1 }
 0x1f2   :  { %v11202_v3 = vpop.f32.mrb[91].mxu1  ;;  %8447 = vmatmul.mubr.f32.gmra.mrb[104].mxu1 %v14769_v1  ;;  %2761 = vmatmul.mubr.f32.gmra.mrb[12].mxu0 %v14676_v20  ;;  %v14775_v1 = vld [vmem:[#allocation83_spill] sm:$0xff] }
 0x1f3   :  { %14768 = vst [vmem:[#allocation66_spill] sm:$0xff] %v11202_v3  ;;  %8449 = vmatprep.mubr.f32.mxu1 %v14770_v28  ;;  %2766 = vmatprep.mubr.f32.mxu0 %v14461_v33  ;;  %v14774_v3 = vld [vmem:[#allocation79_spill] sm:$0xff]  ;;  %v14788_v28 = vld [vmem:[#allocation138_spill] sm:$0xff] }
 0x1f6   :  { %8450 = vmatmul.mubr.f32.gmra.mrb[106].mxu1 %v14771_v24  ;;  %2768 = vmatmul.mubr.f32.gmra.mrb[14].mxu0 %v14677_v7  ;;  %v14776_v24 = vld [vmem:[#allocation92_spill] sm:$0xff] }
 0x1f7   :  { %8452 = vmatprep.mubr.f32.mxu1 %v14772_v48  ;;  %2773 = vmatprep.mubr.f32.mxu0 %v14461_v33  ;;  %v14789_v48 = vld [vmem:[#allocation139_spill] sm:$0xff] }
 0x1fa   :  { %8453 = vmatmul.mubr.f32.gmra.mrb[108].mxu1 %v14773_v5  ;;  %2775 = vmatmul.mubr.f32.gmra.mrb[16].mxu0 %v14679_v17  ;;  %v14790_v5 = vld [vmem:[#allocation144_spill] sm:$0xff] }
 0x1fb   :  { %8455 = vmatprep.mubr.f32.mxu1 %v14774_v3  ;;  %2780 = vmatprep.mubr.f32.mxu0 %v14461_v33  ;;  %v14787_v3 = vld [vmem:[#allocation135_spill] sm:$0xff] }
 0x1fe   :  { %8456 = vmatmul.mubr.f32.gmra.mrb[110].mxu1 %v14775_v1  ;;  %2782 = vmatmul.mubr.f32.gmra.mrb[18].mxu0 %v14680_v49  ;;  %v14791_v1 = vld [vmem:[#allocation145_spill] sm:$0xff] }
 0x1ff   :  { %8458 = vmatprep.mubr.f32.mxu1 %v10098_v23  ;;  %2787 = vmatprep.mubr.f32.mxu0 %v14461_v33  ;;  %v14777_v23 = vld [vmem:[#allocation106_spill] sm:$0xff] }
 0x202   :  { %8459 = vmatmul.mubr.f32.gmra.mrb[112].mxu1 %v14776_v24  ;;  %2789 = vmatmul.mubr.f32.gmra.mrb[20].mxu0 %v14682_v6  ;;  %v14792_v24 = vld [vmem:[#allocation149_spill] sm:$0xff] }
 0x203   :  { %8461 = vmatprep.mubr.f32.mxu1 %v10139_v41  ;;  %2794 = vmatprep.mubr.f32.mxu0 %v14461_v33  ;;  %v14778_v41 = vld [vmem:[#allocation111_spill] sm:$0xff] }
 0x206   :  { %8462 = vmatmul.mubr.f32.gmra.mrb[114].mxu1 %v10161_v46  ;;  %2796 = vmatmul.mubr.f32.gmra.mrb[22].mxu0 %v14683_v13  ;;  %v14780_v46 = vld [vmem:[#allocation67_spill] sm:$0xff] }
 0x207   :  { %8464 = vmatprep.mubr.f32.mxu1 %v10181_v57  ;;  %2801 = vmatprep.mubr.f32.mxu0 %v14461_v33  ;;  %v14781_v57 = vld [vmem:[#allocation121_spill] sm:$0xff] }
 0x20a   :  { %8465 = vmatmul.mubr.f32.gmra.mrb[116].mxu1 %v10200_v38  ;;  %2803 = vmatmul.mubr.f32.gmra.mrb[24].mxu0 %v14685_v44  ;;  %v14779_v38 = vld [vmem:[#allocation120_spill] sm:$0xff] }
 0x20b   :  { %8467 = vmatprep.mubr.f32.mxu1 %v10210_v36  ;;  %2808 = vmatprep.mubr.f32.mxu0 %v14461_v33  ;;  %v14784_v36 = vld [vmem:[#allocation127_spill] sm:$0xff] }
 0x20e   :  { %8468 = vmatmul.mubr.f32.gmra.mrb[118].mxu1 %v10240_v59  ;;  %2810 = vmatmul.mubr.f32.gmra.mrb[26].mxu0 %v14686_v31  ;;  %v14782_v59 = vld [vmem:[#allocation126_spill] sm:$0xff] }
 0x20f   :  { %8470 = vmatprep.mubr.f32.mxu1 %v14777_v23  ;;  %2815 = vmatprep.mubr.f32.mxu0 %v14461_v33  ;;  %v14793_v23 = vld [vmem:[#allocation150_spill] sm:$0xff] }
 0x212   :  { %8471 = vmatmul.mubr.f32.gmra.mrb[120].mxu1 %v14778_v41  ;;  %2817 = vmatmul.mubr.f32.gmra.mrb[28].mxu0 %v14688_v12  ;;  %v14794_v41 = vld [vmem:[#allocation154_spill] sm:$0xff] }
 0x213   :  { %8473 = vmatprep.mubr.f32.mxu1 %v10302_v27  ;;  %2822 = vmatprep.mubr.f32.mxu0 %v14461_v33  ;;  %v14783_v27 = vld [vmem:[#allocation74_spill] sm:$0xff] }
 0x216   :  { %8474 = vmatmul.mubr.f32.gmra.mrb[122].mxu1 %v10323_v35  ;;  %2824 = vmatmul.mubr.f32.gmra.mrb[30].mxu0 %v14691_v43  ;;  %v14785_v35 = vld [vmem:[#allocation132_spill] sm:$0xff] }
 0x217   :  { %8476 = vmatprep.mubr.f32.mxu1 %v10333_v55  ;;  %2829 = vmatprep.mubr.f32.mxu0 %v14461_v33  ;;  %v14786_v55 = vld [vmem:[#allocation75_spill] sm:$0xff] }
 0x21a   :  { %8477 = vmatmul.mubr.f32.gmra.mrb[124].mxu1 %v14779_v38  ;;  %2831 = vmatmul.mubr.f32.gmra.mrb[32].mxu0 %v14780_v46  ;;  %v14795_v38 = vld [vmem:[#allocation17_spill] sm:$0xff] }
 0x21b   :  { %8479 = vmatprep.mubr.f32.mxu1 %v14781_v57  ;;  %2836 = vmatprep.mubr.f32.mxu0 %v14461_v33  ;;  %v14796_v57 = vld [vmem:[#allocation18_spill] sm:$0xff] }
 0x21e   :  { %8480 = vmatmul.mubr.f32.gmra.mrb[126].mxu1 %v14782_v59  ;;  %2838 = vmatmul.mubr.f32.gmra.mrb[34].mxu0 %v14783_v27  ;;  %v14797_v59 = vld [vmem:[#allocation19_spill] sm:$0xff] }
 0x21f   :  { %8482 = vmatprep.mubr.f32.mxu1 %v14784_v36  ;;  %2843 = vmatprep.mubr.f32.mxu0 %v14461_v33  ;;  %v14798_v36 = vld [vmem:[#allocation25_spill] sm:$0xff] }
 0x222   :  { %8483 = vmatmul.mubr.f32.gmra.mrb[128].mxu1 %v14785_v35  ;;  %2845 = vmatmul.mubr.f32.gmra.mrb[36].mxu0 %v14786_v55  ;;  %v14799_v35 = vld [vmem:[#allocation29_spill] sm:$0xff] }
 0x223   :  { %8485 = vmatprep.mubr.f32.mxu1 %v14787_v3  ;;  %2850 = vmatprep.mubr.f32.mxu0 %v14461_v33  ;;  %v14800_v3 = vld [vmem:[#allocation31_spill] sm:$0xff] }
 0x226   :  { %8486 = vmatmul.mubr.f32.gmra.mrb[130].mxu1 %v14788_v28  ;;  %2852 = vmatmul.mubr.f32.gmra.mrb[38].mxu0 %v14701_v11  ;;  %v14802_v28 = vld [vmem:[#allocation40_spill] sm:$0xff] }
 0x227   :  { %8488 = vmatprep.mubr.f32.mxu1 %v14789_v48  ;;  %2857 = vmatprep.mubr.f32.mxu0 %v14461_v33  ;;  %v14803_v48 = vld [vmem:[#allocation45_spill] sm:$0xff] }
 0x22a   :  { %8489 = vmatmul.mubr.f32.gmra.mrb[132].mxu1 %v14790_v5  ;;  %2859 = vmatmul.mubr.f32.gmra.mrb[40].mxu0 %v14703_v52  ;;  %v14804_v5 = vld [vmem:[#allocation49_spill] sm:$0xff] }
 0x22b   :  { %8491 = vmatprep.mubr.f32.mxu1 %v14791_v1  ;;  %2864 = vmatprep.mubr.f32.mxu0 %v14461_v33  ;;  %v14805_v1 = vld [vmem:[#allocation54_spill] sm:$0xff] }
 0x22e   :  { %8492 = vmatmul.mubr.f32.gmra.mrb[134].mxu1 %v14792_v24  ;;  %2866 = vmatmul.mubr.f32.gmra.mrb[42].mxu0 %v14706_v14  ;;  %v14806_v24 = vld [vmem:[#allocation55_spill] sm:$0xff] }
 0x22f   :  { %8494 = vmatprep.mubr.f32.mxu1 %v14793_v23  ;;  %2871 = vmatprep.mubr.f32.mxu0 %v14461_v33  ;;  %v14807_v23 = vld [vmem:[#allocation59_spill] sm:$0xff] }
 0x232   :  { %8495 = vmatmul.mubr.f32.gmra.mrb[136].mxu1 %v14794_v41  ;;  %2873 = vmatmul.mubr.f32.gmra.mrb[44].mxu0 %v14708_v0  ;;  %v14808_v41 = vld [vmem:[#allocation64_spill] sm:$0xff] }
 0x233   :  { %8499 = vmatprep.mubr.f32.mxu1 %v14795_v38  ;;  %2878 = vmatprep.mubr.f32.mxu0 %v14461_v33  ;;  %v14809_v38 = vld [vmem:[#allocation69_spill] sm:$0xff] }
 0x236   :  { %8500 = vmatmul.mubr.f32.vlgmr.msra.gmra.mrb[92].mxu1 %v14796_v57  ;;  %2880 = vmatmul.mubr.f32.gmra.mrb[46].mxu0 %v10141_v61  ;;  %v14810_v57 = vld [vmem:[#allocation73_spill] sm:$0xff] }
 0x237   :  { %8569 = vmatpush3.msra.mxu1 %v10653_v25  ;;  %8502 = vmatprep.mubr.f32.mxu1 %v14797_v59  ;;  %v14801_v25 = vld [vmem:[#allocation36_spill] sm:$0xff]  ;;  %v14811_v59 = vld [vmem:[#allocation77_spill] sm:$0xff] }
 0x238   :  { %2885 = vmatprep.mubr.f32.mxu0 %v14461_v33  ;;  %8639 = vmatprep.subr.mxu1 %v10059_v9 }
 0x23a   :  { %8503 = vmatmul.mubr.f32.gmra.mrb[94].mxu1 %v14798_v36  ;;  %2887 = vmatmul.mubr.f32.gmra.mrb[48].mxu0 %v10149_v2  ;;  %v14812_v36 = vld [vmem:[#allocation82_spill] sm:$0xff] }
 0x23b   :  { %8505 = vmatprep.mubr.f32.mxu1 %v14799_v35  ;;  %2892 = vmatprep.mubr.f32.mxu0 %v14461_v33  ;;  %v14813_v35 = vld [vmem:[#allocation85_spill] sm:$0xff] }
 0x23e   :  { %8506 = vmatmul.mubr.f32.gmra.mrb[96].mxu1 %v14800_v3  ;;  %2894 = vmatmul.mubr.f32.gmra.mrb[50].mxu0 %v10169_v40  ;;  %v14814_v3 = vld [vmem:[#allocation87_spill] sm:$0xff] }
 0x23f   :  { %8508 = vmatprep.mubr.f32.mxu1 %v14801_v25  ;;  %2899 = vmatprep.mubr.f32.mxu0 %v14461_v33  ;;  %v14815_v25 = vld [vmem:[#allocation91_spill] sm:$0xff] }
 0x242   :  { %8509 = vmatmul.mubr.f32.gmra.mrb[98].mxu1 %v14802_v28  ;;  %2901 = vmatmul.mubr.f32.gmra.mrb[52].mxu0 %v10189_v50  ;;  %v14816_v28 = vld [vmem:[#allocation95_spill] sm:$0xff] }
 0x243   :  { %8511 = vmatprep.mubr.f32.mxu1 %v14803_v48  ;;  %2906 = vmatprep.mubr.f32.mxu0 %v14461_v33  ;;  %v14817_v48 = vld [vmem:[#allocation97_spill] sm:$0xff] }
 0x246   :  { %8512 = vmatmul.mubr.f32.gmra.mrb[100].mxu1 %v14804_v5  ;;  %2908 = vmatmul.mubr.f32.gmra.mrb[54].mxu0 %v10221_v8  ;;  %v14818_v5 = vld [vmem:[#allocation99_spill] sm:$0xff] }
 0x247   :  { %8514 = vmatprep.mubr.f32.mxu1 %v14805_v1  ;;  %2913 = vmatprep.mubr.f32.mxu0 %v14461_v33  ;;  %v14819_v1 = vld [vmem:[#allocation101_spill] sm:$0xff] }
 0x24a   :  { %8515 = vmatmul.mubr.f32.gmra.mrb[102].mxu1 %v14806_v24  ;;  %2915 = vmatmul.mubr.f32.gmra.mrb[56].mxu0 %v10229_v10  ;;  %v14820_v24 = vld [vmem:[#allocation103_spill] sm:$0xff] }
 0x24b   :  { %8517 = vmatprep.mubr.f32.mxu1 %v14807_v23  ;;  %2920 = vmatprep.mubr.f32.mxu0 %v14461_v33  ;;  %v14821_v23 = vld [vmem:[#allocation105_spill] sm:$0xff] }
 0x24e   :  { %8518 = vmatmul.mubr.f32.gmra.mrb[104].mxu1 %v14808_v41  ;;  %2922 = vmatmul.mubr.f32.gmra.mrb[58].mxu0 %v10263_v37  ;;  %v14822_v41 = vld [vmem:[#allocation108_spill] sm:$0xff] }
 0x24f   :  { %8520 = vmatprep.mubr.f32.mxu1 %v14809_v38  ;;  %2927 = vmatprep.mubr.f32.mxu0 %v14461_v33  ;;  %v14823_v38 = vld [vmem:[#allocation109_spill] sm:$0xff] }
 0x252   :  { %8521 = vmatmul.mubr.f32.gmra.mrb[106].mxu1 %v14810_v57  ;;  %2929 = vmatmul.mubr.f32.gmra.mrb[60].mxu0 %v10283_v56  ;;  %v14824_v57 = vld [vmem:[#allocation113_spill] sm:$0xff] }
 0x253   :  { %8523 = vmatprep.mubr.f32.mxu1 %v14811_v59  ;;  %2934 = vmatprep.mubr.f32.mxu0 %v14461_v33  ;;  %v14825_v59 = vld [vmem:[#allocation115_spill] sm:$0xff] }
 0x256   :  { %8524 = vmatmul.mubr.f32.gmra.mrb[108].mxu1 %v14812_v36  ;;  %2936 = vmatmul.mubr.f32.gmra.mrb[62].mxu0 %v10304_v47  ;;  %v14826_v36 = vld [vmem:[#allocation117_spill] sm:$0xff] }
 0x257   :  { %8526 = vmatprep.mubr.f32.mxu1 %v14813_v35  ;;  %2941 = vmatprep.mubr.f32.mxu0 %v14461_v33  ;;  %v14827_v35 = vld [vmem:[#allocation119_spill] sm:$0xff] }
 0x25a   :  { %8527 = vmatmul.mubr.f32.gmra.mrb[110].mxu1 %v14814_v3  ;;  %2943 = vmatmul.mubr.f32.gmra.mrb[64].mxu0 %v10312_v4  ;;  %v14828_v3 = vld [vmem:[#allocation123_spill] sm:$0xff] }
 0x25b   :  { %8529 = vmatprep.mubr.f32.mxu1 %v14815_v25  ;;  %2948 = vmatprep.mubr.f32.mxu0 %v14461_v33  ;;  %v14829_v25 = vld [vmem:[#allocation125_spill] sm:$0xff] }
 0x25e   :  { %8530 = vmatmul.mubr.f32.gmra.mrb[112].mxu1 %v14816_v28  ;;  %2950 = vmatmul.mubr.f32.gmra.mrb[66].mxu0 %v10344_v51  ;;  %v14830_v28 = vld [vmem:[#allocation129_spill] sm:$0xff] }
 0x25f   :  { %8532 = vmatprep.mubr.f32.mxu1 %v14817_v48  ;;  %2955 = vmatprep.mubr.f32.mxu0 %v14461_v33  ;;  %v14831_v48 = vld [vmem:[#allocation130_spill] sm:$0xff] }
 0x262   :  { %8533 = vmatmul.mubr.f32.gmra.mrb[114].mxu1 %v14818_v5  ;;  %2957 = vmatmul.mubr.f32.gmra.mrb[68].mxu0 %v10352_v18  ;;  %v14832_v5 = vld [vmem:[#allocation134_spill] sm:$0xff] }
 0x263   :  { %8535 = vmatprep.mubr.f32.mxu1 %v14819_v1  ;;  %2962 = vmatprep.mubr.f32.mxu0 %v14461_v33  ;;  %v14833_v1 = vld [vmem:[#allocation137_spill] sm:$0xff] }
 0x266   :  { %8536 = vmatmul.mubr.f32.gmra.mrb[116].mxu1 %v14820_v24  ;;  %2964 = vmatmul.mubr.f32.gmra.mrb[70].mxu0 %v10384_v30  ;;  %v14834_v24 = vld [vmem:[#allocation141_spill] sm:$0xff] }
 0x267   :  { %8538 = vmatprep.mubr.f32.mxu1 %v14821_v23  ;;  %2969 = vmatprep.mubr.f32.mxu0 %v14461_v33  ;;  %v14835_v23 = vld [vmem:[#allocation143_spill] sm:$0xff] }
 0x26a   :  { %8539 = vmatmul.mubr.f32.gmra.mrb[118].mxu1 %v14822_v41  ;;  %2971 = vmatmul.mubr.f32.gmra.mrb[72].mxu0 %v10392_v16  ;;  %v14836_v41 = vld [vmem:[#allocation146_spill] sm:$0xff] }
 0x26b   :  { %8541 = vmatprep.mubr.f32.mxu1 %v14823_v38  ;;  %2976 = vmatprep.mubr.f32.mxu0 %v14461_v33  ;;  %v14837_v38 = vld [vmem:[#allocation151_spill] sm:$0xff] }
 0x26e   :  { %8542 = vmatmul.mubr.f32.gmra.mrb[120].mxu1 %v14824_v57  ;;  %2978 = vmatmul.mubr.f32.gmra.mrb[74].mxu0 %v10423_v15  ;;  %v14838_v57 = vld [vmem:[#allocation153_spill] sm:$0xff] }
 0x26f   :  { %8544 = vmatprep.mubr.f32.mxu1 %v14825_v59  ;;  %2983 = vmatprep.mubr.f32.mxu0 %v14461_v33  ;;  %v14839_v59 = vld [vmem:[#allocation152_spill] sm:$0xff] }
 0x272   :  { %8545 = vmatmul.mubr.f32.gmra.mrb[122].mxu1 %v14826_v36  ;;  %2985 = vmatmul.mubr.f32.gmra.mrb[76].mxu0 %v10443_v34  ;;  %v14840_v36 = vld [vmem:[#allocation9_spill] sm:$0xff] }
 0x273   :  { %8547 = vmatprep.mubr.f32.mxu1 %v14827_v35  ;;  %2990 = vmatprep.mubr.f32.mxu0 %v14461_v33 }
 0x276   :  { %8548 = vmatmul.mubr.f32.gmra.mrb[124].mxu1 %v14828_v3  ;;  %2992 = vmatmul.mubr.f32.gmra.mrb[78].mxu0 %v10464_v63 }
 0x277   :  { %8550 = vmatprep.mubr.f32.mxu1 %v14829_v25  ;;  %2997 = vmatprep.mubr.f32.mxu0 %v14461_v33  ;;  %v14847_v25 = vld [vmem:[#allocation161_spill] sm:$0xff] }
 0x27a   :  { %8551 = vmatmul.mubr.f32.gmra.mrb[126].mxu1 %v14830_v28  ;;  %2999 = vmatmul.mubr.f32.gmra.mrb[80].mxu0 %v10472_v58 }
 0x27b   :  { %8553 = vmatprep.mubr.f32.mxu1 %v14831_v48  ;;  %3004 = vmatprep.mubr.f32.mxu0 %v14461_v33 }
 0x27e   :  { %8554 = vmatmul.mubr.f32.gmra.mrb[128].mxu1 %v14832_v5  ;;  %3006 = vmatmul.mubr.f32.gmra.mrb[82].mxu0 %v10510_v54 }
 0x27f   :  { %8556 = vmatprep.mubr.f32.mxu1 %v14833_v1  ;;  %3011 = vmatprep.mubr.f32.mxu0 %v14461_v33  ;;  %v14850_v1 = vld [vmem:[#allocation162_spill] sm:$0xff] }
 0x282   :  { %8557 = vmatmul.mubr.f32.gmra.mrb[130].mxu1 %v14834_v24  ;;  %3013 = vmatmul.mubr.f32.gmra.mrb[84].mxu0 %v10518_v29 }
 0x283   :  { %8559 = vmatprep.mubr.f32.mxu1 %v14835_v23  ;;  %3018 = vmatprep.mubr.f32.mxu0 %v14461_v33 }
 0x286   :  { %8560 = vmatmul.mubr.f32.gmra.mrb[132].mxu1 %v14836_v41  ;;  %3020 = vmatmul.mubr.f32.gmra.mrb[86].mxu0 %v10556_v45 }
 0x287   :  { %8562 = vmatprep.mubr.f32.mxu1 %v14735_v26  ;;  %3025 = vmatprep.mubr.f32.mxu0 %v14461_v33 }
 0x28a   :  { %8563 = vmatmul.mubr.f32.gmra.mrb[134].mxu1 %v14837_v38  ;;  %3027 = vmatmul.mubr.f32.gmra.mrb[88].mxu0 %v10564_v39 }
 0x28b   :  { %8565 = vmatprep.mubr.f32.mxu1 %v14838_v57  ;;  %3032 = vmatprep.mubr.f32.mxu0 %v14461_v33 }
 0x28e   :  { %8566 = vmatmul.mubr.f32.gmra.mrb[136].mxu1 %v10629_v42  ;;  %3034 = vmatmul.mubr.f32.gmra.mrb[90].mxu0 %v14839_v59 }
 0x28f   :  { %8570 = vmatprep.mubr.f32.mxu1 %v14840_v36  ;;  %3106 = vmatprep.mubr.f32.mxu0 %v14461_v33 }
 0x292   :  { %8571 = vmatmul.mubr.f32.vlgmr.msra.gmra.mrb[92].mxu1 %v14668_v60  ;;  %3108 = vmatmul.mubr.f32.vlgmr.msra.gmra.mrb[0].mxu0 %v14840_v36 }
 0x293   :  { %8640 = vmatpush3.msra.mxu1 %v10059_v9  ;;  %8573 = vmatprep.mubr.f32.mxu1 %v14670_v32 }
 0x294   :  { %3113 = vmatprep.mubr.f32.mxu0 %v14461_v33 }
 0x296   :  { %8574 = vmatmul.mubr.f32.gmra.mrb[94].mxu1 %v14671_v62  ;;  %3115 = vmatmul.mubr.f32.gmra.mrb[2].mxu0 %v14668_v60 }
 0x297   :  { %8576 = vmatprep.mubr.f32.mxu1 %v14673_v21  ;;  %3120 = vmatprep.mubr.f32.mxu0 %v14461_v33 }
 0x29a   :  { %8577 = vmatmul.mubr.f32.gmra.mrb[96].mxu1 %v14674_v19  ;;  %3122 = vmatmul.mubr.f32.gmra.mrb[4].mxu0 %v14670_v32 }
 0x29b   :  { %8579 = vmatprep.mubr.f32.mxu1 %v14676_v20  ;;  %3127 = vmatprep.mubr.f32.mxu0 %v14461_v33 }
 0x29e   :  { %8580 = vmatmul.mubr.f32.gmra.mrb[98].mxu1 %v14677_v7  ;;  %3129 = vmatmul.mubr.f32.gmra.mrb[6].mxu0 %v14671_v62 }
 0x29f   :  { %8582 = vmatprep.mubr.f32.mxu1 %v14679_v17  ;;  %3134 = vmatprep.mubr.f32.mxu0 %v14461_v33 }
 0x2a2   :  { %8583 = vmatmul.mubr.f32.gmra.mrb[100].mxu1 %v14680_v49  ;;  %3136 = vmatmul.mubr.f32.gmra.mrb[8].mxu0 %v14673_v21 }
 0x2a3   :  { %8585 = vmatprep.mubr.f32.mxu1 %v14682_v6  ;;  %3141 = vmatprep.mubr.f32.mxu0 %v14461_v33 }
 0x2a6   :  { %8586 = vmatmul.mubr.f32.gmra.mrb[102].mxu1 %v14683_v13  ;;  %3143 = vmatmul.mubr.f32.gmra.mrb[10].mxu0 %v14674_v19 }
 0x2a7   :  { %8588 = vmatprep.mubr.f32.mxu1 %v14685_v44  ;;  %3148 = vmatprep.mubr.f32.mxu0 %v14461_v33 }
 0x2aa   :  { %8589 = vmatmul.mubr.f32.gmra.mrb[104].mxu1 %v14686_v31  ;;  %3150 = vmatmul.mubr.f32.gmra.mrb[12].mxu0 %v14676_v20 }
 0x2ab   :  { %8591 = vmatprep.mubr.f32.mxu1 %v14688_v12  ;;  %3155 = vmatprep.mubr.f32.mxu0 %v14461_v33 }
 0x2ae   :  { %8592 = vmatmul.mubr.f32.gmra.mrb[106].mxu1 %v14691_v43  ;;  %3157 = vmatmul.mubr.f32.gmra.mrb[14].mxu0 %v14677_v7 }
 0x2af   :  { %8594 = vmatprep.mubr.f32.mxu1 %v14780_v46  ;;  %3162 = vmatprep.mubr.f32.mxu0 %v14461_v33 }
 0x2b2   :  { %8595 = vmatmul.mubr.f32.gmra.mrb[108].mxu1 %v14783_v27  ;;  %3164 = vmatmul.mubr.f32.gmra.mrb[16].mxu0 %v14679_v17 }
 0x2b3   :  { %8597 = vmatprep.mubr.f32.mxu1 %v14786_v55  ;;  %3169 = vmatprep.mubr.f32.mxu0 %v14461_v33 }
 0x2b6   :  { %8598 = vmatmul.mubr.f32.gmra.mrb[110].mxu1 %v14701_v11  ;;  %3171 = vmatmul.mubr.f32.gmra.mrb[18].mxu0 %v14680_v49 }
 0x2b7   :  { %8600 = vmatprep.mubr.f32.mxu1 %v14703_v52  ;;  %3176 = vmatprep.mubr.f32.mxu0 %v14461_v33 }
 0x2ba   :  { %8601 = vmatmul.mubr.f32.gmra.mrb[112].mxu1 %v14706_v14  ;;  %3178 = vmatmul.mubr.f32.gmra.mrb[20].mxu0 %v14682_v6 }
 0x2bb   :  { %8603 = vmatprep.mubr.f32.mxu1 %v14708_v0  ;;  %3183 = vmatprep.mubr.f32.mxu0 %v14461_v33 }
 0x2be   :  { %8604 = vmatmul.mubr.f32.gmra.mrb[114].mxu1 %v10141_v61  ;;  %3185 = vmatmul.mubr.f32.gmra.mrb[22].mxu0 %v14683_v13 }
 0x2bf   :  { %8606 = vmatprep.mubr.f32.mxu1 %v10149_v2  ;;  %3190 = vmatprep.mubr.f32.mxu0 %v14461_v33 }
 0x2c2   :  { %8607 = vmatmul.mubr.f32.gmra.mrb[116].mxu1 %v10169_v40  ;;  %3192 = vmatmul.mubr.f32.gmra.mrb[24].mxu0 %v14685_v44 }
 0x2c3   :  { %8609 = vmatprep.mubr.f32.mxu1 %v10189_v50  ;;  %3197 = vmatprep.mubr.f32.mxu0 %v14461_v33 }
 0x2c6   :  { %8610 = vmatmul.mubr.f32.gmra.mrb[118].mxu1 %v10221_v8  ;;  %3199 = vmatmul.mubr.f32.gmra.mrb[26].mxu0 %v14686_v31 }
 0x2c7   :  { %8612 = vmatprep.mubr.f32.mxu1 %v10229_v10  ;;  %3204 = vmatprep.mubr.f32.mxu0 %v14461_v33 }
 0x2ca   :  { %8613 = vmatmul.mubr.f32.gmra.mrb[120].mxu1 %v10263_v37  ;;  %3206 = vmatmul.mubr.f32.gmra.mrb[28].mxu0 %v14688_v12 }
 0x2cb   :  { %8615 = vmatprep.mubr.f32.mxu1 %v10283_v56  ;;  %3211 = vmatprep.mubr.f32.mxu0 %v14461_v33 }
 0x2ce   :  { %8616 = vmatmul.mubr.f32.gmra.mrb[122].mxu1 %v10304_v47  ;;  %3213 = vmatmul.mubr.f32.gmra.mrb[30].mxu0 %v14691_v43 }
 0x2cf   :  { %8618 = vmatprep.mubr.f32.mxu1 %v10312_v4  ;;  %3218 = vmatprep.mubr.f32.mxu0 %v14461_v33 }
 0x2d2   :  { %8619 = vmatmul.mubr.f32.gmra.mrb[124].mxu1 %v10344_v51  ;;  %3220 = vmatmul.mubr.f32.gmra.mrb[32].mxu0 %v14780_v46 }
 0x2d3   :  { %8621 = vmatprep.mubr.f32.mxu1 %v10352_v18  ;;  %3225 = vmatprep.mubr.f32.mxu0 %v14461_v33 }
 0x2d6   :  { %8622 = vmatmul.mubr.f32.gmra.mrb[126].mxu1 %v10384_v30  ;;  %3227 = vmatmul.mubr.f32.gmra.mrb[34].mxu0 %v14783_v27 }
 0x2d7   :  { %8624 = vmatprep.mubr.f32.mxu1 %v10392_v16  ;;  %3232 = vmatprep.mubr.f32.mxu0 %v14461_v33 }
 0x2da   :  { %8625 = vmatmul.mubr.f32.gmra.mrb[128].mxu1 %v10423_v15  ;;  %3234 = vmatmul.mubr.f32.gmra.mrb[36].mxu0 %v14786_v55 }
 0x2db   :  { %8627 = vmatprep.mubr.f32.mxu1 %v10443_v34  ;;  %3239 = vmatprep.mubr.f32.mxu0 %v14461_v33 }
 0x2de   :  { %8628 = vmatmul.mubr.f32.gmra.mrb[130].mxu1 %v10464_v63  ;;  %3241 = vmatmul.mubr.f32.gmra.mrb[38].mxu0 %v14701_v11 }
 0x2df   :  { %8630 = vmatprep.mubr.f32.mxu1 %v10472_v58  ;;  %3246 = vmatprep.mubr.f32.mxu0 %v14461_v33 }
 0x2e2   :  { %8631 = vmatmul.mubr.f32.gmra.mrb[132].mxu1 %v10510_v54  ;;  %3248 = vmatmul.mubr.f32.gmra.mrb[40].mxu0 %v14703_v52 }
 0x2e3   :  { %8633 = vmatprep.mubr.f32.mxu1 %v10518_v29  ;;  %3253 = vmatprep.mubr.f32.mxu0 %v14461_v33 }
 0x2e6   :  { %8634 = vmatmul.mubr.f32.gmra.mrb[134].mxu1 %v10556_v45  ;;  %3255 = vmatmul.mubr.f32.gmra.mrb[42].mxu0 %v14706_v14 }
 0x2e7   :  { %8636 = vmatprep.mubr.f32.mxu1 %v10564_v39  ;;  %3260 = vmatprep.mubr.f32.mxu0 %v14461_v33 }
 0x2ea   :  { %8637 = vmatmul.mubr.f32.gmra.mrb[136].mxu1 %v14839_v59  ;;  %3262 = vmatmul.mubr.f32.gmra.mrb[44].mxu0 %v14708_v0 }
 0x2eb   :  { %8641 = vmatprep.mubr.f32.mxu1 %v14840_v36  ;;  %3267 = vmatprep.mubr.f32.mxu0 %v14461_v33 }
 0x2ee   :  { %8642 = vmatmul.mubr.f32.vlgmr.msra.gmra.mrb[92].mxu1 %v14668_v60  ;;  %3269 = vmatmul.mubr.f32.gmra.mrb[46].mxu0 %v10141_v61 }
 0x2ef   :  { %8644 = vmatprep.mubr.f32.mxu1 %v14670_v32  ;;  %3274 = vmatprep.mubr.f32.mxu0 %v14461_v33  ;;  %v14846_v32 = vld [vmem:[#allocation160_spill] sm:$0xff] }
 0x2f2   :  { %8645 = vmatmul.mubr.f32.gmra.mrb[94].mxu1 %v14671_v62  ;;  %3276 = vmatmul.mubr.f32.gmra.mrb[48].mxu0 %v10149_v2 }
 0x2f3   :  { %8647 = vmatprep.mubr.f32.mxu1 %v14673_v21  ;;  %3281 = vmatprep.mubr.f32.mxu0 %v14461_v33 }
 0x2f6   :  { %8648 = vmatmul.mubr.f32.gmra.mrb[96].mxu1 %v14674_v19  ;;  %3283 = vmatmul.mubr.f32.gmra.mrb[50].mxu0 %v10169_v40 }
 0x2f7   :  { %8650 = vmatprep.mubr.f32.mxu1 %v14676_v20  ;;  %3288 = vmatprep.mubr.f32.mxu0 %v14461_v33 }
 0x2fa   :  { %8651 = vmatmul.mubr.f32.gmra.mrb[98].mxu1 %v14677_v7  ;;  %3290 = vmatmul.mubr.f32.gmra.mrb[52].mxu0 %v10189_v50 }
 0x2fb   :  { %8653 = vmatprep.mubr.f32.mxu1 %v14679_v17  ;;  %3295 = vmatprep.mubr.f32.mxu0 %v14461_v33 }
 0x2fe   :  { %8654 = vmatmul.mubr.f32.gmra.mrb[100].mxu1 %v14680_v49  ;;  %3297 = vmatmul.mubr.f32.gmra.mrb[54].mxu0 %v10221_v8 }
 0x2ff   :  { %8656 = vmatprep.mubr.f32.mxu1 %v14682_v6  ;;  %3302 = vmatprep.mubr.f32.mxu0 %v14461_v33 }
 0x302   :  { %8657 = vmatmul.mubr.f32.gmra.mrb[102].mxu1 %v14683_v13  ;;  %3304 = vmatmul.mubr.f32.gmra.mrb[56].mxu0 %v10229_v10 }
 0x303   :  { %8659 = vmatprep.mubr.f32.mxu1 %v14685_v44  ;;  %3309 = vmatprep.mubr.f32.mxu0 %v14461_v33 }
 0x306   :  { %8660 = vmatmul.mubr.f32.gmra.mrb[104].mxu1 %v14686_v31  ;;  %3311 = vmatmul.mubr.f32.gmra.mrb[58].mxu0 %v10263_v37  ;;  %v14845_v31 = vld [vmem:[#allocation159_spill] sm:$0xff] }
 0x307   :  { %8662 = vmatprep.mubr.f32.mxu1 %v14688_v12  ;;  %3316 = vmatprep.mubr.f32.mxu0 %v14461_v33 }
 0x30a   :  { %8663 = vmatmul.mubr.f32.gmra.mrb[106].mxu1 %v14691_v43  ;;  %3318 = vmatmul.mubr.f32.gmra.mrb[60].mxu0 %v10283_v56 }
 0x30b   :  { %8665 = vmatprep.mubr.f32.mxu1 %v14780_v46  ;;  %3323 = vmatprep.mubr.f32.mxu0 %v14461_v33 }
 0x30e   :  { %8666 = vmatmul.mubr.f32.gmra.mrb[108].mxu1 %v14783_v27  ;;  %3325 = vmatmul.mubr.f32.gmra.mrb[62].mxu0 %v10304_v47 }
 0x30f   :  { %8668 = vmatprep.mubr.f32.mxu1 %v14786_v55  ;;  %3330 = vmatprep.mubr.f32.mxu0 %v14461_v33 }
 0x312   :  { %8669 = vmatmul.mubr.f32.gmra.mrb[110].mxu1 %v14701_v11  ;;  %3332 = vmatmul.mubr.f32.gmra.mrb[64].mxu0 %v10312_v4 }
 0x313   :  { %8671 = vmatprep.mubr.f32.mxu1 %v14703_v52  ;;  %3337 = vmatprep.mubr.f32.mxu0 %v14461_v33 }
 0x316   :  { %8672 = vmatmul.mubr.f32.gmra.mrb[112].mxu1 %v14706_v14  ;;  %3339 = vmatmul.mubr.f32.gmra.mrb[66].mxu0 %v10344_v51 }
 0x317   :  { %8674 = vmatprep.mubr.f32.mxu1 %v14708_v0  ;;  %3344 = vmatprep.mubr.f32.mxu0 %v14461_v33 }
 0x31a   :  { %8675 = vmatmul.mubr.f32.gmra.mrb[114].mxu1 %v10141_v61  ;;  %3346 = vmatmul.mubr.f32.gmra.mrb[68].mxu0 %v10352_v18  ;;  %v11556_v61 = vld [vmem:[%s13991_s2 + $0x18] ss:$8 sm:$0x7] }
 0x31b   :  { %8677 = vmatprep.mubr.f32.mxu1 %v10149_v2  ;;  %3351 = vmatprep.mubr.f32.mxu0 %v14461_v33 }
 0x31e   :  { %8678 = vmatmul.mubr.f32.gmra.mrb[116].mxu1 %v10169_v40  ;;  %3353 = vmatmul.mubr.f32.gmra.mrb[70].mxu0 %v10384_v30 }
 0x31f   :  { %8680 = vmatprep.mubr.f32.mxu1 %v10189_v50  ;;  %3358 = vmatprep.mubr.f32.mxu0 %v14461_v33 }
 0x322   :  { %8681 = vmatmul.mubr.f32.gmra.mrb[118].mxu1 %v10221_v8  ;;  %3360 = vmatmul.mubr.f32.gmra.mrb[72].mxu0 %v10392_v16 }
 0x323   :  { %8683 = vmatprep.mubr.f32.mxu1 %v10229_v10  ;;  %3365 = vmatprep.mubr.f32.mxu0 %v14461_v33 }
 0x326   :  { %8684 = vmatmul.mubr.f32.gmra.mrb[120].mxu1 %v10263_v37  ;;  %3367 = vmatmul.mubr.f32.gmra.mrb[74].mxu0 %v10423_v15  ;;  %v14842_v37 = vld [vmem:[#allocation156_spill] sm:$0xff] }
 0x327   :  { %8686 = vmatprep.mubr.f32.mxu1 %v10283_v56  ;;  %3372 = vmatprep.mubr.f32.mxu0 %v14461_v33  ;;  %v11583_v56 = vpop.permute.xlu1 %402 }
 0x328   :  { %v855_v13 = vadd.f32 %v14845_v31, %v11583_v56  ;;  %v857_v62 = vadd.f32 %v14846_v32, %v11583_v56  ;;  %v14859_v31 = vld [vmem:[#allocation165_spill] sm:$0xff] }
 0x32a   :  { %8687 = vmatmul.mubr.f32.gmra.mrb[122].mxu1 %v10304_v47  ;;  %3374 = vmatmul.mubr.f32.gmra.mrb[76].mxu0 %v10443_v34  ;;  %v5951_v47 = vlaneseq }
 0x32b   :  { %8689 = vmatprep.mubr.f32.mxu1 %v10312_v4  ;;  %3379 = vmatprep.mubr.f32.mxu0 %v14461_v33  ;;  %v11615_v49 = vpop.permute.xlu1 %407 }
 0x32c   :  { %v11549_v52 = vshrl.u32 %v5951_v47, 7  ;;  %v866_v28 = vadd.f32 %v14847_v25, %v11615_v49  ;;  %v868_v24 = vadd.f32 %v14850_v1, %v11615_v49 }
 0x32e   :  { %8690 = vmatmul.mubr.f32.gmra.mrb[124].mxu1 %v10344_v51  ;;  %3381 = vmatmul.mubr.f32.gmra.mrb[78].mxu0 %v10464_v63  ;;  %v5957_v14 = vsub.s32 1, %v11549_v52 }
 0x32f   :  { %8692 = vmatprep.mubr.f32.mxu1 %v10352_v18  ;;  %3386 = vmatprep.mubr.f32.mxu0 %v14461_v33  ;;  %v14843_v18 = vld [vmem:[#allocation157_spill] sm:$0xff] }
 0x330   :  { %v11578_v40 = vrot.slane %v11556_v61, %v5957_v14 }
 0x332   :  { %8693 = vmatmul.mubr.f32.gmra.mrb[126].mxu1 %v10384_v30  ;;  %3388 = vmatmul.mubr.f32.gmra.mrb[80].mxu0 %v10472_v58  ;;  %v14841_v30 = vld [vmem:[#allocation155_spill] sm:$0xff] }
 0x333   :  { %8695 = vmatprep.mubr.f32.mxu1 %v10392_v16  ;;  %3393 = vmatprep.mubr.f32.mxu0 %v14461_v33 }
 0x336   :  { %8696 = vmatmul.mubr.f32.gmra.mrb[128].mxu1 %v10423_v15  ;;  %3395 = vmatmul.mubr.f32.gmra.mrb[82].mxu0 %v10510_v54 }
 0x337   :  { %8698 = vmatprep.mubr.f32.mxu1 %v10443_v34  ;;  %3400 = vmatprep.mubr.f32.mxu0 %v14461_v33 }
 0x33a   :  { %8699 = vmatmul.mubr.f32.gmra.mrb[130].mxu1 %v10464_v63  ;;  %3402 = vmatmul.mubr.f32.gmra.mrb[84].mxu0 %v10518_v29  ;;  %v11562_v63 = vld [vmem:[%s13991_s2 + $0x19] ss:$8 sm:$0x7] }
 0x33b   :  { %8701 = vmatprep.mubr.f32.mxu1 %v10472_v58  ;;  %3407 = vmatprep.mubr.f32.mxu0 %v14461_v33  ;;  %v11581_v50 = vrot.slane %v11562_v63, %v5957_v14  ;;  %v14844_v58 = vld [vmem:[#allocation158_spill] sm:$0xff] }
 0x33e   :  { %8702 = vmatmul.mubr.f32.gmra.mrb[132].mxu1 %v10510_v54  ;;  %3409 = vmatmul.mubr.f32.gmra.mrb[86].mxu0 %v10556_v45  ;;  %v11551_v54 = vpop.permute.xlu0 %392 }
 0x33f   :  { %8704 = vmatprep.mubr.f32.mxu1 %v10518_v29  ;;  %3414 = vmatprep.mubr.f32.mxu0 %v14461_v33  ;;  %v833_v51 = vadd.f32 %v14841_v30, %v11551_v54  ;;  %v835_v8 = vadd.f32 %v14842_v37, %v11551_v54  ;;  %v14854_v30 = vld [vmem:[#allocation163_spill] sm:$0xff]  ;;  %v11651_v37 = vpop.permute.xlu1 %417 }
 0x342   :  { %8705 = vmatmul.mubr.f32.gmra.mrb[134].mxu1 %v10556_v45  ;;  %3416 = vmatmul.mubr.f32.gmra.mrb[88].mxu0 %v10564_v39  ;;  %v5953_v45 = vsub.s32 0, %v11549_v52 }
 0x343   :  { %8707 = vmatprep.mubr.f32.mxu1 %v10564_v39  ;;  %3421 = vmatprep.mubr.f32.mxu0 %v14461_v33  ;;  %v11575_v33 = vpop.permute.xlu0 %397  ;;  %v11675_v32 = vpop.permute.xlu1 %427 }
 0x344   :  { %v11568_v9 = vrot.slane %v11556_v61, %v5953_v45  ;;  %v11571_v11 = vrot.slane %v11562_v63, %v5953_v45  ;;  %v844_v16 = vadd.f32 %v14843_v18, %v11575_v33  ;;  %v846_v12 = vadd.f32 %v14844_v58, %v11575_v33  ;;  %14860 = vst [vmem:[#allocation8_spill] sm:$0xff] %v11675_v32 }
 0x346   :  { %8708 = vmatmul.mubr.f32.gmra.mrb[136].mxu1 %v14839_v59  ;;  %3423 = vmatmul.mubr.f32.gmra.mrb[90].mxu0 %v14839_v59 }
 0x347   :  { %v11637_v23 = vpop.permute.xlu0 %412 }
 0x348   :  { %14851 = vst [vmem:[#allocation89_spill] sm:$0xff] %v11637_v23 }
 0x34b   :  { %v11667_v58 = vpop.permute.xlu0 %422 }
 0x34c   :  { %14858 = vst [vmem:[#allocation16_spill] sm:$0xff] %v11667_v58 }
 0x34f   :  { %v11691_v1 = vpop.permute.xlu0 %432 }
 0x350   :  { %14866 = vst [vmem:[#allocation37_spill] sm:$0xff] %v11691_v1 }
 0x365   :  { %v3109_v2 = vpop.f32.mrb[0].mxu0 }
 0x366   :  { %v8713_v10 = vadd.f32 %v3109_v2, %v833_v51  ;;  %v3111_v43 = vpop.f32.mrb[1].mxu0  ;;  %v877_v51 = vadd.f32 %v14854_v30, %v11637_v23  ;;  %v14867_v30 = vld [vmem:[#allocation167_spill] sm:$0xff] }
 0x367   :  { %v8715_v4 = vadd.f32 %v3111_v43, %v835_v8 }
 0x368   :  { %v11588_v15 = vadd.f32 %v8713_v10, %v11568_v9  ;;  %v11591_v34 = vadd.f32 %v8713_v10, %v11571_v11  ;;  %v14856_v10 = vld [vmem:[#allocation164_spill] sm:$0xff] }
 0x369   :  { %v11596_v29 = vadd.f32 %v8715_v4, %v11578_v40  ;;  %v11599_v39 = vadd.f32 %v8715_v4, %v11581_v50  ;;  %v3116_v42 = vpop.f32.mrb[2].mxu0  ;;  %v879_v43 = vadd.f32 %v14856_v10, %v11637_v23  ;;  %v11699_v10 = vpop.permute.xlu1 %437 }
 0x36a   :  { %v8717_v0 = vadd.f32 %v3116_v42, %v844_v16  ;;  %v3118_v44 = vpop.f32.mrb[3].mxu0  ;;  %14868 = vst [vmem:[#allocation41_spill] sm:$0xff] %v11699_v10 }
 0x36b   :  { %v8719_v26 = vadd.f32 %v3118_v44, %v846_v12 }
 0x36c   :  { %v11608_v60 = vadd.f32 %v8717_v0, %v11568_v9  ;;  %v11611_v7 = vadd.f32 %v8717_v0, %v11571_v11 }
 0x36d   :  { %v11618_v21 = vadd.f32 %v8719_v26, %v11578_v40  ;;  %v11621_v19 = vadd.f32 %v8719_v26, %v11581_v50  ;;  %v3123_v20 = vpop.f32.mrb[4].mxu0 }
 0x36e   :  { %v8721_v46 = vadd.f32 %v3123_v20, %v855_v13  ;;  %v3125_v27 = vpop.f32.mrb[5].mxu0  ;;  %v888_v13 = vadd.f32 %v14859_v31, %v11651_v37 }
 0x36f   :  { %v8723_v55 = vadd.f32 %v3125_v27, %v857_v62 }
 0x370   :  { %v11630_v48 = vadd.f32 %v8721_v46, %v11568_v9  ;;  %v11633_v5 = vadd.f32 %v8721_v46, %v11571_v11  ;;  %v14863_v46 = vld [vmem:[#allocation166_spill] sm:$0xff] }
 0x371   :  { %v11640_v41 = vadd.f32 %v8723_v55, %v11578_v40  ;;  %v11643_v38 = vadd.f32 %v8723_v55, %v11581_v50  ;;  %v3130_v57 = vpop.f32.mrb[6].mxu0  ;;  %v890_v27 = vadd.f32 %v14863_v46, %v11651_v37  ;;  %v11715_v46 = vpop.permute.xlu0 %442 }
 0x372   :  { %14848 = vst [vmem:[#allocation80_spill] sm:$0xff] %v11630_v48  ;;  %14849 = vst [vmem:[#allocation86_spill] sm:$0xff] %v11633_v5  ;;  %v8725_v59 = vadd.f32 %v3130_v57, %v866_v28  ;;  %v3132_v36 = vpop.f32.mrb[7].mxu0 }
 0x373   :  { %14852 = vst [vmem:[#allocation93_spill] sm:$0xff] %v11640_v41  ;;  %14853 = vst [vmem:[#allocation148_spill] sm:$0xff] %v11643_v38  ;;  %v8727_v47 = vadd.f32 %v3132_v36, %v868_v24  ;;  %v11723_v36 = vpop.permute.xlu1 %447  ;;  %v14969_v38 = vld [vmem:[#allocation48_spill] sm:$0xff] }
 0x374   :  { %v11654_v8 = vadd.f32 %v8725_v59, %v11568_v9  ;;  %v11657_v2 = vadd.f32 %v8725_v59, %v11571_v11  ;;  %14874 = vst [vmem:[#allocation61_spill] sm:$0xff] %v11715_v46  ;;  %14876 = vst [vmem:[#allocation65_spill] sm:$0xff] %v11723_v36 }
 0x375   :  { %v11662_v4 = vadd.f32 %v8727_v47, %v11578_v40  ;;  %v11665_v18 = vadd.f32 %v8727_v47, %v11581_v50  ;;  %v3137_v16 = vpop.f32.mrb[8].mxu0 }
 0x376   :  { %14855 = vst [vmem:[#allocation13_spill] sm:$0xff] %v11657_v2  ;;  %v8729_v12 = vadd.f32 %v3137_v16, %v877_v51  ;;  %v3139_v42 = vpop.f32.mrb[9].mxu0  ;;  %v899_v51 = vadd.f32 %v14867_v30, %v11667_v58  ;;  %v11739_v30 = vpop.permute.xlu0 %452 }
 0x377   :  { %14857 = vst [vmem:[#allocation15_spill] sm:$0xff] %v11665_v18  ;;  %v8731_v0 = vadd.f32 %v3139_v42, %v879_v43  ;;  %14882 = vst [vmem:[#allocation83_spill] sm:$0xff] %v11739_v30  ;;  %v11747_v6 = vpop.permute.xlu1 %457 }
 0x378   :  { %v11678_v62 = vadd.f32 %v8729_v12, %v11568_v9  ;;  %v11681_v20 = vadd.f32 %v8729_v12, %v11571_v11  ;;  %v14871_v12 = vld [vmem:[#allocation168_spill] sm:$0xff]  ;;  %14884 = vst [vmem:[#allocation92_spill] sm:$0xff] %v11747_v6 }
 0x379   :  { %v11686_v55 = vadd.f32 %v8731_v0, %v11578_v40  ;;  %v11689_v25 = vadd.f32 %v8731_v0, %v11581_v50  ;;  %v3144_v28 = vpop.f32.mrb[10].mxu0  ;;  %v901_v42 = vadd.f32 %v14871_v12, %v11667_v58  ;;  %v14875_v12 = vld [vmem:[#allocation169_spill] sm:$0xff] }
 0x37a   :  { %14861 = vst [vmem:[#allocation20_spill] sm:$0xff] %v11678_v62  ;;  %14862 = vst [vmem:[#allocation26_spill] sm:$0xff] %v11681_v20  ;;  %v8733_v24 = vadd.f32 %v3144_v28, %v888_v13  ;;  %v3146_v57 = vpop.f32.mrb[11].mxu0  ;;  %v910_v47 = vadd.f32 %v14875_v12, %v11675_v32  ;;  %v11763_v44 = vpop.permute.xlu0 %462 }
 0x37b   :  { %14864 = vst [vmem:[#allocation27_spill] sm:$0xff] %v11686_v55  ;;  %14865 = vst [vmem:[#allocation33_spill] sm:$0xff] %v11689_v25  ;;  %v8735_v59 = vadd.f32 %v3146_v57, %v890_v27 }
 0x37c   :  { %v11702_v43 = vadd.f32 %v8733_v24, %v11568_v9  ;;  %v11705_v16 = vadd.f32 %v8733_v24, %v11571_v11  ;;  %14890 = vst [vmem:[#allocation121_spill] sm:$0xff] %v11763_v44 }
 0x37d   :  { %v11710_v0 = vadd.f32 %v8735_v59, %v11578_v40  ;;  %v11713_v31 = vadd.f32 %v8735_v59, %v11581_v50  ;;  %v3151_v13 = vpop.f32.mrb[12].mxu0 }
 0x37e   :  { %14869 = vst [vmem:[#allocation46_spill] sm:$0xff] %v11702_v43  ;;  %14870 = vst [vmem:[#allocation50_spill] sm:$0xff] %v11705_v16  ;;  %v8737_v27 = vadd.f32 %v3151_v13, %v899_v51  ;;  %v3153_v28 = vpop.f32.mrb[13].mxu0  ;;  %v14879_v51 = vld [vmem:[#allocation170_spill] sm:$0xff] }
 0x37f   :  { %14872 = vst [vmem:[#allocation51_spill] sm:$0xff] %v11710_v0  ;;  %14873 = vst [vmem:[#allocation56_spill] sm:$0xff] %v11713_v31  ;;  %v8739_v57 = vadd.f32 %v3153_v28, %v901_v42  ;;  %v912_v42 = vadd.f32 %v14879_v51, %v11675_v32  ;;  %v14883_v51 = vld [vmem:[#allocation171_spill] sm:$0xff] }
 0x380   :  { %v11726_v59 = vadd.f32 %v8737_v27, %v11568_v9  ;;  %v11729_v26 = vadd.f32 %v8737_v27, %v11571_v11  ;;  %v921_v17 = vadd.f32 %v14883_v51, %v11691_v1  ;;  %v14967_v32 = vld [vmem:[#allocation39_spill] sm:$0xff] }
 0x381   :  { %v11734_v13 = vadd.f32 %v8739_v57, %v11578_v40  ;;  %v11737_v28 = vadd.f32 %v8739_v57, %v11581_v50  ;;  %v3158_v24 = vpop.f32.mrb[14].mxu0 }
 0x382   :  { %14877 = vst [vmem:[#allocation70_spill] sm:$0xff] %v11726_v59  ;;  %14878 = vst [vmem:[#allocation71_spill] sm:$0xff] %v11729_v26  ;;  %v8741_v12 = vadd.f32 %v3158_v24, %v910_v47  ;;  %v3160_v14 = vpop.f32.mrb[15].mxu0  ;;  %v14887_v47 = vld [vmem:[#allocation172_spill] sm:$0xff]  ;;  %v11771_v59 = vpop.permute.xlu1 %467 }
 0x383   :  { %14880 = vst [vmem:[#allocation78_spill] sm:$0xff] %v11734_v13  ;;  %14881 = vst [vmem:[#allocation79_spill] sm:$0xff] %v11737_v28  ;;  %v8743_v45 = vadd.f32 %v3160_v14, %v912_v42  ;;  %v923_v14 = vadd.f32 %v14887_v47, %v11691_v1  ;;  %v14891_v47 = vld [vmem:[#allocation173_spill] sm:$0xff]  ;;  %v11787_v26 = vpop.permute.xlu0 %472 }
 0x384   :  { %v11750_v57 = vadd.f32 %v8741_v12, %v11568_v9  ;;  %v11753_v3 = vadd.f32 %v8741_v12, %v11571_v11  ;;  %v932_v13 = vadd.f32 %v14891_v47, %v11699_v10  ;;  %14892 = vst [vmem:[#allocation126_spill] sm:$0xff] %v11771_v59  ;;  %14898 = vst [vmem:[#allocation135_spill] sm:$0xff] %v11787_v26 }
 0x385   :  { %v11758_v24 = vadd.f32 %v8743_v45, %v11578_v40  ;;  %v11761_v42 = vadd.f32 %v8743_v45, %v11581_v50  ;;  %v3165_v27 = vpop.f32.mrb[16].mxu0 }
 0x386   :  { %14885 = vst [vmem:[#allocation106_spill] sm:$0xff] %v11750_v57  ;;  %14886 = vst [vmem:[#allocation111_spill] sm:$0xff] %v11753_v3  ;;  %v8745_v51 = vadd.f32 %v3165_v27, %v921_v17  ;;  %v3167_v35 = vpop.f32.mrb[17].mxu0  ;;  %v14895_v17 = vld [vmem:[#allocation174_spill] sm:$0xff]  ;;  %v11795_v55 = vpop.permute.xlu1 %477 }
 0x387   :  { %14888 = vst [vmem:[#allocation120_spill] sm:$0xff] %v11758_v24  ;;  %14889 = vst [vmem:[#allocation67_spill] sm:$0xff] %v11761_v42  ;;  %v8747_v28 = vadd.f32 %v3167_v35, %v923_v14  ;;  %v934_v35 = vadd.f32 %v14895_v17, %v11699_v10  ;;  %v14899_v17 = vld [vmem:[#allocation175_spill] sm:$0xff]  ;;  %v11811_v24 = vpop.permute.xlu0 %482 }
 0x388   :  { %v11774_v45 = vadd.f32 %v8745_v51, %v11568_v9  ;;  %v11777_v1 = vadd.f32 %v8745_v51, %v11571_v11  ;;  %v943_v57 = vadd.f32 %v14899_v17, %v11715_v46  ;;  %14900 = vst [vmem:[#allocation138_spill] sm:$0xff] %v11795_v55  ;;  %14906 = vst [vmem:[#allocation150_spill] sm:$0xff] %v11811_v24 }
 0x389   :  { %v11782_v27 = vadd.f32 %v8747_v28, %v11578_v40  ;;  %v11785_v14 = vadd.f32 %v8747_v28, %v11581_v50  ;;  %v3172_v12 = vpop.f32.mrb[18].mxu0 }
 0x38a   :  { %14893 = vst [vmem:[#allocation74_spill] sm:$0xff] %v11774_v45  ;;  %14894 = vst [vmem:[#allocation127_spill] sm:$0xff] %v11777_v1  ;;  %v8749_v47 = vadd.f32 %v3172_v12, %v932_v13  ;;  %v3174_v42 = vpop.f32.mrb[19].mxu0  ;;  %v14903_v13 = vld [vmem:[#allocation176_spill] sm:$0xff] }
 0x38b   :  { %14896 = vst [vmem:[#allocation132_spill] sm:$0xff] %v11782_v27  ;;  %14897 = vst [vmem:[#allocation75_spill] sm:$0xff] %v11785_v14  ;;  %v8751_v3 = vadd.f32 %v3174_v42, %v934_v35  ;;  %v945_v42 = vadd.f32 %v14903_v13, %v11715_v46  ;;  %v14907_v13 = vld [vmem:[#allocation177_spill] sm:$0xff]  ;;  %v11819_v46 = vpop.permute.xlu1 %487  ;;  %v11835_v27 = vpop.permute.xlu0 %492 }
 0x38c   :  { %v11798_v28 = vadd.f32 %v8749_v47, %v11568_v9  ;;  %v11801_v62 = vadd.f32 %v8749_v47, %v11571_v11  ;;  %v954_v45 = vadd.f32 %v14907_v13, %v11723_v36  ;;  %14908 = vst [vmem:[#allocation154_spill] sm:$0xff] %v11819_v46  ;;  %14914 = vst [vmem:[#allocation29_spill] sm:$0xff] %v11835_v27 }
 0x38d   :  { %v11806_v12 = vadd.f32 %v8751_v3, %v11578_v40  ;;  %v11809_v35 = vadd.f32 %v8751_v3, %v11581_v50  ;;  %v3179_v51 = vpop.f32.mrb[20].mxu0  ;;  %v1053_v18 = vadd.f32 %v14967_v32, %v11835_v27 }
 0x38e   :  { %14901 = vst [vmem:[#allocation139_spill] sm:$0xff] %v11798_v28  ;;  %14902 = vst [vmem:[#allocation144_spill] sm:$0xff] %v11801_v62  ;;  %v8753_v17 = vadd.f32 %v3179_v51, %v943_v57  ;;  %v3181_v14 = vpop.f32.mrb[21].mxu0  ;;  %v14911_v57 = vld [vmem:[#allocation178_spill] sm:$0xff] }
 0x38f   :  { %14904 = vst [vmem:[#allocation145_spill] sm:$0xff] %v11806_v12  ;;  %14905 = vst [vmem:[#allocation149_spill] sm:$0xff] %v11809_v35  ;;  %v8755_v1 = vadd.f32 %v3181_v14, %v945_v42  ;;  %v956_v14 = vadd.f32 %v14911_v57, %v11723_v36  ;;  %v14915_v57 = vld [vmem:[#allocation179_spill] sm:$0xff]  ;;  %v11843_v36 = vpop.permute.xlu1 %497  ;;  %v11859_v12 = vpop.permute.xlu0 %502 }
 0x390   :  { %v11822_v3 = vadd.f32 %v8753_v17, %v11568_v9  ;;  %v11825_v10 = vadd.f32 %v8753_v17, %v11571_v11  ;;  %v965_v28 = vadd.f32 %v14915_v57, %v11739_v30  ;;  %14916 = vst [vmem:[#allocation31_spill] sm:$0xff] %v11843_v36  ;;  %14922 = vst [vmem:[#allocation54_spill] sm:$0xff] %v11859_v12 }
 0x391   :  { %v11830_v51 = vadd.f32 %v8755_v1, %v11578_v40  ;;  %v11833_v42 = vadd.f32 %v8755_v1, %v11581_v50  ;;  %v3186_v47 = vpop.f32.mrb[22].mxu0 }
 0x392   :  { %14909 = vst [vmem:[#allocation17_spill] sm:$0xff] %v11822_v3  ;;  %14910 = vst [vmem:[#allocation18_spill] sm:$0xff] %v11825_v10  ;;  %v8757_v13 = vadd.f32 %v3186_v47, %v954_v45  ;;  %v3188_v35 = vpop.f32.mrb[23].mxu0  ;;  %v14919_v45 = vld [vmem:[#allocation180_spill] sm:$0xff] }
 0x393   :  { %14912 = vst [vmem:[#allocation19_spill] sm:$0xff] %v11830_v51  ;;  %14913 = vst [vmem:[#allocation25_spill] sm:$0xff] %v11833_v42  ;;  %v8759_v62 = vadd.f32 %v3188_v35, %v956_v14  ;;  %v967_v35 = vadd.f32 %v14919_v45, %v11739_v30  ;;  %v14923_v45 = vld [vmem:[#allocation181_spill] sm:$0xff]  ;;  %v11867_v30 = vpop.permute.xlu1 %507  ;;  %v11883_v51 = vpop.permute.xlu0 %512 }
 0x394   :  { %v11846_v1 = vadd.f32 %v8757_v13, %v11568_v9  ;;  %v11849_v31 = vadd.f32 %v8757_v13, %v11571_v11  ;;  %v976_v3 = vadd.f32 %v14923_v45, %v11747_v6  ;;  %14924 = vst [vmem:[#allocation55_spill] sm:$0xff] %v11867_v30  ;;  %14930 = vst [vmem:[#allocation77_spill] sm:$0xff] %v11883_v51 }
 0x395   :  { %v11854_v47 = vadd.f32 %v8759_v62, %v11578_v40  ;;  %v11857_v14 = vadd.f32 %v8759_v62, %v11581_v50  ;;  %v3193_v17 = vpop.f32.mrb[24].mxu0 }
 0x396   :  { %14917 = vst [vmem:[#allocation36_spill] sm:$0xff] %v11846_v1  ;;  %14918 = vst [vmem:[#allocation40_spill] sm:$0xff] %v11849_v31  ;;  %v8761_v57 = vadd.f32 %v3193_v17, %v965_v28  ;;  %v3195_v42 = vpop.f32.mrb[25].mxu0  ;;  %v14927_v28 = vld [vmem:[#allocation182_spill] sm:$0xff] }
 0x397   :  { %14920 = vst [vmem:[#allocation45_spill] sm:$0xff] %v11854_v47  ;;  %14921 = vst [vmem:[#allocation49_spill] sm:$0xff] %v11857_v14  ;;  %v8763_v10 = vadd.f32 %v3195_v42, %v967_v35  ;;  %v978_v42 = vadd.f32 %v14927_v28, %v11747_v6  ;;  %v14931_v28 = vld [vmem:[#allocation183_spill] sm:$0xff]  ;;  %v11891_v6 = vpop.permute.xlu1 %517  ;;  %v11907_v47 = vpop.permute.xlu0 %522 }
 0x398   :  { %v11870_v62 = vadd.f32 %v8761_v57, %v11568_v9  ;;  %v11873_v16 = vadd.f32 %v8761_v57, %v11571_v11  ;;  %v987_v1 = vadd.f32 %v14931_v28, %v11763_v44  ;;  %14932 = vst [vmem:[#allocation82_spill] sm:$0xff] %v11891_v6  ;;  %14938 = vst [vmem:[#allocation97_spill] sm:$0xff] %v11907_v47 }
 0x399   :  { %v11878_v17 = vadd.f32 %v8763_v10, %v11578_v40  ;;  %v11881_v35 = vadd.f32 %v8763_v10, %v11581_v50  ;;  %v3200_v13 = vpop.f32.mrb[26].mxu0 }
 0x39a   :  { %14925 = vst [vmem:[#allocation59_spill] sm:$0xff] %v11870_v62  ;;  %14926 = vst [vmem:[#allocation64_spill] sm:$0xff] %v11873_v16  ;;  %v8765_v45 = vadd.f32 %v3200_v13, %v976_v3  ;;  %v3202_v14 = vpop.f32.mrb[27].mxu0  ;;  %v14935_v3 = vld [vmem:[#allocation184_spill] sm:$0xff] }
 0x39b   :  { %14928 = vst [vmem:[#allocation69_spill] sm:$0xff] %v11878_v17  ;;  %14929 = vst [vmem:[#allocation73_spill] sm:$0xff] %v11881_v35  ;;  %v8767_v31 = vadd.f32 %v3202_v14, %v978_v42  ;;  %v989_v14 = vadd.f32 %v14935_v3, %v11763_v44  ;;  %v14939_v3 = vld [vmem:[#allocation185_spill] sm:$0xff]  ;;  %v11915_v44 = vpop.permute.xlu1 %527  ;;  %v11931_v17 = vpop.permute.xlu0 %532 }
 0x39c   :  { %v11894_v10 = vadd.f32 %v8765_v45, %v11568_v9  ;;  %v11897_v25 = vadd.f32 %v8765_v45, %v11571_v11  ;;  %v998_v62 = vadd.f32 %v14939_v3, %v11771_v59  ;;  %14940 = vst [vmem:[#allocation99_spill] sm:$0xff] %v11915_v44  ;;  %14946 = vst [vmem:[#allocation109_spill] sm:$0xff] %v11931_v17 }
 0x39d   :  { %v11902_v13 = vadd.f32 %v8767_v31, %v11578_v40  ;;  %v11905_v42 = vadd.f32 %v8767_v31, %v11581_v50  ;;  %v3207_v57 = vpop.f32.mrb[28].mxu0 }
 0x39e   :  { %14933 = vst [vmem:[#allocation85_spill] sm:$0xff] %v11894_v10  ;;  %14934 = vst [vmem:[#allocation87_spill] sm:$0xff] %v11897_v25  ;;  %v8769_v28 = vadd.f32 %v3207_v57, %v987_v1  ;;  %v3209_v35 = vpop.f32.mrb[29].mxu0  ;;  %v14943_v1 = vld [vmem:[#allocation186_spill] sm:$0xff] }
 0x39f   :  { %14936 = vst [vmem:[#allocation91_spill] sm:$0xff] %v11902_v13  ;;  %14937 = vst [vmem:[#allocation95_spill] sm:$0xff] %v11905_v42  ;;  %v8771_v16 = vadd.f32 %v3209_v35, %v989_v14  ;;  %v1000_v35 = vadd.f32 %v14943_v1, %v11771_v59  ;;  %v14947_v1 = vld [vmem:[#allocation22_spill] sm:$0xff]  ;;  %v11939_v59 = vpop.permute.xlu1 %537  ;;  %v11955_v13 = vpop.permute.xlu0 %542 }
 0x3a0   :  { %v11918_v31 = vadd.f32 %v8769_v28, %v11568_v9  ;;  %v11921_v20 = vadd.f32 %v8769_v28, %v11571_v11  ;;  %v1009_v10 = vadd.f32 %v14947_v1, %v11787_v26  ;;  %14948 = vst [vmem:[#allocation113_spill] sm:$0xff] %v11939_v59  ;;  %14954 = vst [vmem:[#allocation125_spill] sm:$0xff] %v11955_v13 }
 0x3a1   :  { %v11926_v57 = vadd.f32 %v8771_v16, %v11578_v40  ;;  %v11929_v14 = vadd.f32 %v8771_v16, %v11581_v50  ;;  %v3214_v45 = vpop.f32.mrb[30].mxu0 }
 0x3a2   :  { %14941 = vst [vmem:[#allocation101_spill] sm:$0xff] %v11918_v31  ;;  %14942 = vst [vmem:[#allocation103_spill] sm:$0xff] %v11921_v20  ;;  %v8773_v3 = vadd.f32 %v3214_v45, %v998_v62  ;;  %v3216_v42 = vpop.f32.mrb[31].mxu0  ;;  %v14951_v62 = vld [vmem:[#allocation187_spill] sm:$0xff] }
 0x3a3   :  { %14944 = vst [vmem:[#allocation105_spill] sm:$0xff] %v11926_v57  ;;  %14945 = vst [vmem:[#allocation108_spill] sm:$0xff] %v11929_v14  ;;  %v8775_v25 = vadd.f32 %v3216_v42, %v1000_v35  ;;  %v1011_v42 = vadd.f32 %v14951_v62, %v11787_v26  ;;  %v14955_v62 = vld [vmem:[#allocation24_spill] sm:$0xff]  ;;  %v11963_v26 = vpop.permute.xlu1 %547 }
 0x3a4   :  { %v11942_v16 = vadd.f32 %v8773_v3, %v11568_v9  ;;  %v11945_v58 = vadd.f32 %v8773_v3, %v11571_v11  ;;  %v1020_v31 = vadd.f32 %v14955_v62, %v11795_v55  ;;  %14956 = vst [vmem:[#allocation129_spill] sm:$0xff] %v11963_v26 }
 0x3a5   :  { %v11950_v45 = vadd.f32 %v8775_v25, %v11578_v40  ;;  %v11953_v35 = vadd.f32 %v8775_v25, %v11581_v50  ;;  %v3221_v28 = vpop.f32.mrb[32].mxu0 }
 0x3a6   :  { %14949 = vst [vmem:[#allocation115_spill] sm:$0xff] %v11942_v16  ;;  %14950 = vst [vmem:[#allocation117_spill] sm:$0xff] %v11945_v58  ;;  %v8777_v1 = vadd.f32 %v3221_v28, %v1009_v10  ;;  %v3223_v14 = vpop.f32.mrb[33].mxu0  ;;  %v14959_v10 = vld [vmem:[#allocation28_spill] sm:$0xff]  ;;  %v14960_v28 = vld [vmem:[#allocation10_spill] sm:$0xff] }
 0x3a7   :  { %14952 = vst [vmem:[#allocation119_spill] sm:$0xff] %v11950_v45  ;;  %14953 = vst [vmem:[#allocation123_spill] sm:$0xff] %v11953_v35  ;;  %v8779_v20 = vadd.f32 %v3223_v14, %v1011_v42  ;;  %v1022_v14 = vadd.f32 %v14959_v10, %v11795_v55  ;;  %v1031_v42 = vadd.f32 %v14960_v28, %v11811_v24  ;;  %v14963_v35 = vld [vmem:[#allocation32_spill] sm:$0xff]  ;;  %v14964_v45 = vld [vmem:[#allocation7_spill] sm:$0xff]  ;;  %v11987_v10 = vpop.permute.xlu0 %552 }
 0x3a8   :  { %v11966_v25 = vadd.f32 %v8777_v1, %v11568_v9  ;;  %v11969_v0 = vadd.f32 %v8777_v1, %v11571_v11  ;;  %v1033_v58 = vadd.f32 %v14963_v35, %v11811_v24  ;;  %v1042_v1 = vadd.f32 %v14964_v45, %v11819_v46  ;;  %v14965_v16 = vld [vmem:[#allocation35_spill] sm:$0xff]  ;;  %14966 = vst [vmem:[#allocation143_spill] sm:$0xff] %v11987_v10  ;;  %v14968_v24 = vld [vmem:[#allocation44_spill] sm:$0xff] }
 0x3a9   :  { %v11976_v57 = vadd.f32 %v8779_v20, %v11578_v40  ;;  %v11979_v3 = vadd.f32 %v8779_v20, %v11581_v50  ;;  %v3228_v62 = vpop.f32.mrb[34].mxu0  ;;  %v1044_v43 = vadd.f32 %v14965_v16, %v11819_v46  ;;  %v1055_v45 = vadd.f32 %v14968_v24, %v11835_v27  ;;  %v12001_v46 = vpop.permute.xlu1 %557 }
 0x3aa   :  { %14957 = vst [vmem:[#allocation130_spill] sm:$0xff] %v11966_v25  ;;  %14958 = vst [vmem:[#allocation134_spill] sm:$0xff] %v11969_v0  ;;  %v8781_v55 = vadd.f32 %v3228_v62, %v1020_v31  ;;  %v3230_v28 = vpop.f32.mrb[35].mxu0  ;;  %v11999_v16 = vadd.f32 %v14969_v38, %v11843_v36 }
 0x3ab   :  { %14961 = vst [vmem:[#allocation137_spill] sm:$0xff] %v11976_v57  ;;  %14962 = vst [vmem:[#allocation141_spill] sm:$0xff] %v11979_v3  ;;  %v8783_v2 = vadd.f32 %v3230_v28, %v1022_v14  ;;  %v14973_v14 = vld [vmem:[#allocation53_spill] sm:$0xff]  ;;  %v14977_v3 = vld [vmem:[#allocation60_spill] sm:$0xff] }
 0x3ac   :  { %14970 = vst [vmem:[#allocation146_spill] sm:$0xff] %v12001_v46  ;;  %v12004_v31 = vadd.f32 %v8781_v55, %v11568_v9  ;;  %v12007_v32 = vadd.f32 %v8781_v55, %v11571_v11  ;;  %v12011_v62 = vadd.f32 %v14973_v14, %v11843_v36  ;;  %v14974_v28 = vld [vmem:[#allocation57_spill] sm:$0xff]  ;;  %v12025_v0 = vadd.f32 %v14977_v3, %v11859_v12  ;;  %v14978_v55 = vld [vmem:[#allocation63_spill] sm:$0xff]  ;;  %v14979_v14 = vld [vmem:[#allocation68_spill] sm:$0xff] }
 0x3ad   :  { %v12015_v35 = vadd.f32 %v14974_v28, %v11859_v12  ;;  %v12018_v24 = vadd.f32 %v8783_v2, %v11578_v40  ;;  %v12021_v38 = vadd.f32 %v8783_v2, %v11581_v50  ;;  %v3235_v20 = vpop.f32.mrb[36].mxu0  ;;  %v12029_v27 = vadd.f32 %v14978_v55, %v11867_v30  ;;  %v12035_v28 = vpop.permute.xlu0 %562  ;;  %v14981_v2 = vld [vmem:[#allocation72_spill] sm:$0xff] }
 0x3ae   :  { %14971 = vst [vmem:[#allocation151_spill] sm:$0xff] %v12004_v31  ;;  %14972 = vst [vmem:[#allocation153_spill] sm:$0xff] %v12007_v32  ;;  %v12033_v57 = vadd.f32 %v14979_v14, %v11867_v30  ;;  %v8785_v25 = vadd.f32 %v3235_v20, %v1031_v42  ;;  %v3237_v36 = vpop.f32.mrb[37].mxu0  ;;  %v12039_v5 = vadd.f32 %v14981_v2, %v11883_v51  ;;  %v14982_v12 = vld [vmem:[#allocation76_spill] sm:$0xff]  ;;  %v14983_v14 = vld [vmem:[#allocation81_spill] sm:$0xff]  ;;  %v12053_v42 = vpop.permute.xlu1 %567 }
 0x3af   :  { %14975 = vst [vmem:[#allocation152_spill] sm:$0xff] %v12018_v24  ;;  %14976 = vst [vmem:[#allocation9_spill] sm:$0xff] %v12021_v38  ;;  %v8787_v41 = vadd.f32 %v3237_v36, %v1033_v58  ;;  %v12047_v48 = vadd.f32 %v14982_v12, %v11883_v51  ;;  %v12051_v30 = vadd.f32 %v14983_v14, %v11891_v6  ;;  %v14987_v36 = vld [vmem:[#allocation84_spill] sm:$0xff]  ;;  %v14993_v32 = vld [vmem:[#allocation90_spill] sm:$0xff] }
 0x3b0   :  { %14980 = vst [vmem:[#allocation155_spill] sm:$0xff] %v12035_v28  ;;  %14984 = vst [vmem:[#allocation156_spill] sm:$0xff] %v12053_v42  ;;  %v12056_v20 = vadd.f32 %v8785_v25, %v11568_v9  ;;  %v12059_v58 = vadd.f32 %v8785_v25, %v11571_v11  ;;  %v12063_v2 = vadd.f32 %v14987_v36, %v11891_v6  ;;  %v14989_v55 = vld [vmem:[#allocation88_spill] sm:$0xff]  ;;  %v14994_v25 = vld [vmem:[#allocation94_spill] sm:$0xff] }
 0x3b1   :  { %v12067_v12 = vadd.f32 %v14989_v55, %v11907_v47  ;;  %v12070_v3 = vadd.f32 %v8787_v41, %v11578_v40  ;;  %v12073_v14 = vadd.f32 %v8787_v41, %v11581_v50  ;;  %v3242_v38 = vpop.f32.mrb[38].mxu0  ;;  %v12077_v24 = vadd.f32 %v14993_v32, %v11907_v47  ;;  %v14996_v36 = vld [vmem:[#allocation96_spill] sm:$0xff]  ;;  %v12087_v55 = vpop.permute.xlu0 %572  ;;  %v14998_v41 = vld [vmem:[#allocation98_spill] sm:$0xff] }
 0x3b2   :  { %14985 = vst [vmem:[#allocation157_spill] sm:$0xff] %v12056_v20  ;;  %14986 = vst [vmem:[#allocation158_spill] sm:$0xff] %v12059_v58  ;;  %v12081_v31 = vadd.f32 %v14994_v25, %v11915_v44  ;;  %v12085_v51 = vadd.f32 %v14996_v36, %v11915_v44  ;;  %v8789_v6 = vadd.f32 %v3242_v38, %v1042_v1  ;;  %v14999_v47 = vld [vmem:[#allocation100_spill] sm:$0xff]  ;;  %v15000_v36 = vld [vmem:[#allocation102_spill] sm:$0xff]  ;;  %v12105_v1 = vpop.permute.xlu1 %577 }
 0x3b3   :  { %14988 = vst [vmem:[#allocation159_spill] sm:$0xff] %v12063_v2  ;;  %14990 = vst [vmem:[#allocation160_spill] sm:$0xff] %v12067_v12  ;;  %v3244_v12 = vpop.f32.mrb[39].mxu0  ;;  %v12091_v2 = vadd.f32 %v14998_v41, %v11931_v17  ;;  %v12103_v44 = vadd.f32 %v15000_v36, %v11939_v59  ;;  %v15007_v25 = vld [vmem:[#allocation107_spill] sm:$0xff] }
 0x3b4   :  { %14991 = vst [vmem:[#allocation161_spill] sm:$0xff] %v12070_v3  ;;  %14992 = vst [vmem:[#allocation162_spill] sm:$0xff] %v12073_v14  ;;  %v8791_v23 = vadd.f32 %v3244_v12, %v1044_v43  ;;  %v12108_v38 = vadd.f32 %v8789_v6, %v11568_v9  ;;  %v12111_v43 = vadd.f32 %v8789_v6, %v11571_v11  ;;  %v15005_v12 = vld [vmem:[#allocation104_spill] sm:$0xff]  ;;  %v15011_v14 = vld [vmem:[#allocation110_spill] sm:$0xff] }
 0x3b5   :  { %14995 = vst [vmem:[#allocation163_spill] sm:$0xff] %v12081_v31  ;;  %14997 = vst [vmem:[#allocation164_spill] sm:$0xff] %v12087_v55  ;;  %v12099_v31 = vadd.f32 %v14999_v47, %v11931_v17  ;;  %v12115_v41 = vadd.f32 %v15005_v12, %v11939_v59  ;;  %v12119_v47 = vadd.f32 %v15007_v25, %v11955_v13  ;;  %v3249_v17 = vpop.f32.mrb[40].mxu0  ;;  %v15012_v6 = vld [vmem:[#allocation112_spill] sm:$0xff]  ;;  %v15014_v12 = vld [vmem:[#allocation114_spill] sm:$0xff]  ;;  %v12139_v25 = vpop.permute.xlu0 %582 }
 0x3b6   :  { %15001 = vst [vmem:[#allocation165_spill] sm:$0xff] %v12103_v44  ;;  %15002 = vst [vmem:[#allocation166_spill] sm:$0xff] %v12105_v1  ;;  %v12122_v32 = vadd.f32 %v8791_v23, %v11578_v40  ;;  %v12125_v36 = vadd.f32 %v8791_v23, %v11581_v50  ;;  %v12129_v58 = vadd.f32 %v15011_v14, %v11955_v13  ;;  %v15016_v23 = vld [vmem:[#allocation116_spill] sm:$0xff]  ;;  %v15017_v13 = vld [vmem:[#allocation118_spill] sm:$0xff] }
 0x3b7   :  { %15003 = vst [vmem:[#allocation167_spill] sm:$0xff] %v12108_v38  ;;  %15004 = vst [vmem:[#allocation168_spill] sm:$0xff] %v12111_v43  ;;  %v12133_v3 = vadd.f32 %v15012_v6, %v11963_v26  ;;  %v12137_v59 = vadd.f32 %v15014_v12, %v11963_v26  ;;  %v8793_v20 = vadd.f32 %v3249_v17, %v1053_v18  ;;  %v15018_v12 = vld [vmem:[#allocation122_spill] sm:$0xff]  ;;  %v12157_v18 = vpop.permute.xlu1 %587  ;;  %v15024_v6 = vld [vmem:[#allocation128_spill] sm:$0xff]  ;;  %v5961_v38 = vsub.s32 2, %v11549_v52 }
 0x3b8   :  { %15006 = vst [vmem:[#allocation169_spill] sm:$0xff] %v12115_v41  ;;  %15008 = vst [vmem:[#allocation170_spill] sm:$0xff] %v12119_v47  ;;  %v3251_v47 = vpop.f32.mrb[41].mxu0  ;;  %v12143_v41 = vadd.f32 %v15016_v23, %v11987_v10  ;;  %v12155_v26 = vadd.f32 %v15018_v12, %v12001_v46 }
 0x3b9   :  { %15009 = vst [vmem:[#allocation171_spill] sm:$0xff] %v12122_v32  ;;  %15010 = vst [vmem:[#allocation172_spill] sm:$0xff] %v12125_v36  ;;  %v8795_v44 = vadd.f32 %v3251_v47, %v1055_v45  ;;  %v12160_v17 = vadd.f32 %v8793_v20, %v11568_v9  ;;  %v12163_v45 = vadd.f32 %v8793_v20, %v11571_v11  ;;  %v15022_v47 = vld [vmem:[#allocation124_spill] sm:$0xff]  ;;  %v15028_v36 = vld [vmem:[#allocation131_spill] sm:$0xff] }
 0x3ba   :  { %15013 = vst [vmem:[#allocation173_spill] sm:$0xff] %v12133_v3  ;;  %15015 = vst [vmem:[#allocation174_spill] sm:$0xff] %v12139_v25  ;;  %v12151_v3 = vadd.f32 %v15017_v13, %v11987_v10  ;;  %v12167_v23 = vadd.f32 %v15022_v47, %v12001_v46  ;;  %v12171_v13 = vadd.f32 %v15024_v6, %v12035_v28  ;;  %v3256_v10 = vpop.f32.mrb[42].mxu0  ;;  %v15029_v20 = vld [vmem:[#allocation133_spill] sm:$0xff]  ;;  %v12187_v47 = vpop.permute.xlu0 %592 }
 0x3bb   :  { %15019 = vst [vmem:[#allocation175_spill] sm:$0xff] %v12157_v18  ;;  %15020 = vst [vmem:[#allocation176_spill] sm:$0xff] %v12160_v17  ;;  %v12174_v14 = vadd.f32 %v8795_v44, %v11578_v40  ;;  %v12177_v12 = vadd.f32 %v8795_v44, %v11581_v50  ;;  %v12181_v43 = vadd.f32 %v15028_v36, %v12035_v28  ;;  %v3258_v46 = vpop.f32.mrb[43].mxu0  ;;  %v15033_v28 = vld [vmem:[#allocation140_spill] sm:$0xff]  ;;  %v12208_v52 = vpop.permute.xlu1 %597 }
 0x3bc   :  { %15021 = vst [vmem:[#allocation177_spill] sm:$0xff] %v12163_v45  ;;  %15023 = vst [vmem:[#allocation178_spill] sm:$0xff] %v12167_v23  ;;  %v12185_v32 = vadd.f32 %v15029_v20, %v12053_v42  ;;  %v8797_v6 = vadd.f32 %v3256_v10, %v11999_v16  ;;  %v8799_v23 = vadd.f32 %v3258_v46, %v12011_v62  ;;  %v15034_v10 = vld [vmem:[#allocation142_spill] sm:$0xff]  ;;  %v15038_v62 = vld [vmem:[#allocation147_spill] sm:$0xff] }
 0x3bd   :  { %15025 = vst [vmem:[#allocation179_spill] sm:$0xff] %v12171_v13  ;;  %15026 = vst [vmem:[#allocation180_spill] sm:$0xff] %v12174_v14  ;;  %v15032_v13 = vld [vmem:[#allocation136_spill] sm:$0xff]  ;;  %v12206_v16 = vadd.f32 %v15034_v10, %v12087_v55  ;;  %v12218_v36 = vadd.f32 %v15038_v62, %v12105_v1  ;;  %v15039_v20 = vld [vmem:[#allocation11_spill] sm:$0xff]  ;;  %v12242_v17 = vrot.slane %v11556_v61, %v5961_v38 }
 0x3be   :  { %15027 = vst [vmem:[#allocation181_spill] sm:$0xff] %v12177_v12  ;;  %15030 = vst [vmem:[#allocation182_spill] sm:$0xff] %v12185_v32  ;;  %v12193_v44 = vadd.f32 %v15032_v13, %v12053_v42  ;;  %v12202_v32 = vadd.f32 %v15033_v28, %v12087_v55  ;;  %v12211_v13 = vadd.f32 %v8797_v6, %v11568_v9  ;;  %v3263_v55 = vpop.f32.mrb[44].mxu0  ;;  %v15043_v12 = vld [vmem:[#allocation12_spill] sm:$0xff]  ;;  %v12238_v62 = vpop.permute.xlu0 %602 }
 0x3bf   :  { %15031 = vst [vmem:[#allocation183_spill] sm:$0xff] %v12187_v47  ;;  %15035 = vst [vmem:[#allocation184_spill] sm:$0xff] %v12208_v52  ;;  %v12214_v46 = vadd.f32 %v8797_v6, %v11571_v11  ;;  %v12222_v28 = vadd.f32 %v15039_v20, %v12105_v1  ;;  %v12225_v42 = vadd.f32 %v8799_v23, %v11578_v40  ;;  %v15044_v6 = vld [vmem:[#allocation14_spill] sm:$0xff]  ;;  %v3265_v1 = vpop.f32.mrb[45].mxu0 }
 0x3c0   :  { %15036 = vst [vmem:[#allocation185_spill] sm:$0xff] %v12211_v13  ;;  %v12228_v10 = vadd.f32 %v8799_v23, %v11581_v50  ;;  %v12232_v45 = vadd.f32 %v15043_v12, %v12139_v25  ;;  %v12236_v14 = vadd.f32 %v15044_v6, %v12139_v25  ;;  %15046 = vst [vmem:[#allocation10_spill] sm:$0xff] %v12238_v62  ;;  %v15047_v25 = vld [vmem:[#allocation21_spill] sm:$0xff]  ;;  %v15053_v6 = vld [vmem:[#allocation34_spill] sm:$0xff] }
 0x3c1   :  { %15037 = vst [vmem:[#allocation186_spill] sm:$0xff] %v12214_v46  ;;  %15040 = vst [vmem:[#allocation22_spill] sm:$0xff] %v12222_v28  ;;  %v8801_v20 = vadd.f32 %v3263_v55, %v12015_v35  ;;  %v12245_v23 = vadd.f32 %v3265_v1, %v12025_v0  ;;  %v12248_v28 = vrot.slane %v11562_v63, %v5961_v38  ;;  %v15048_v35 = vld [vmem:[#allocation23_spill] sm:$0xff]  ;;  %v15050_v0 = vld [vmem:[#allocation30_spill] sm:$0xff]  ;;  %v12266_v63 = vpop.permute.xlu1 %607  ;;  %v8643_v38 = vpop.f32.mrb[92].mxu1 }
 0x3c2   :  { %15041 = vst [vmem:[#allocation187_spill] sm:$0xff] %v12225_v42  ;;  %15042 = vst [vmem:[#allocation24_spill] sm:$0xff] %v12228_v10  ;;  %v12260_v61 = vadd.f32 %v15048_v35, %v12157_v18  ;;  %v12264_v55 = vadd.f32 %v15050_v0, %v12187_v47  ;;  %v12273_v12 = vadd.f32 %v15053_v6, %v12187_v47  ;;  %v5536_v46 = vpop.f32.mrb[93].mxu1  ;;  %v15058_v42 = vld [vmem:[#allocation42_spill] sm:$0xff]  ;;  %v12292_v47 = vpop.permute.xlu0 %612 }
 0x3c3   :  { %15045 = vst [vmem:[#allocation28_spill] sm:$0xff] %v12236_v14  ;;  %v12256_v14 = vadd.f32 %v15047_v25, %v12157_v18  ;;  %15052 = vst [vmem:[#allocation35_spill] sm:$0xff] %v12266_v63  ;;  %v12269_v1 = vadd.f32 %v8801_v20, %v11568_v9  ;;  %v15055_v25 = vld [vmem:[#allocation38_spill] sm:$0xff]  ;;  %v12281_v35 = vadd.f32 %v12245_v23, %v11578_v40  ;;  %v3270_v18 = vpop.f32.mrb[46].mxu0 }
 0x3c4   :  { %15049 = vst [vmem:[#allocation32_spill] sm:$0xff] %v12260_v61  ;;  %15051 = vst [vmem:[#allocation7_spill] sm:$0xff] %v12264_v55  ;;  %v12277_v10 = vadd.f32 %v15055_v25, %v12208_v52  ;;  %v8896_v0 = vadd.f32 %v8643_v38, %v11575_v33  ;;  %v12286_v13 = vadd.f32 %v15058_v42, %v12208_v52  ;;  %v15060_v55 = vld [vmem:[#allocation43_spill] sm:$0xff] }
 0x3c5   :  { %15054 = vst [vmem:[#allocation39_spill] sm:$0xff] %v12273_v12  ;;  %15057 = vst [vmem:[#allocation48_spill] sm:$0xff] %v12281_v35  ;;  %v12290_v6 = vadd.f32 %v15060_v55, %v12238_v62  ;;  %v12295_v25 = vadd.f32 %v12029_v27, %v3270_v18  ;;  %v3272_v12 = vpop.f32.mrb[47].mxu0  ;;  %v15063_v55 = vld [vmem:[#allocation47_spill] sm:$0xff]  ;;  %v15065_v27 = vld [vmem:[#allocation52_spill] sm:$0xff]  ;;  %v12323_v42 = vadd.f32 %v11192_v53, %v12292_v47 }
 0x3c6   :  { %15056 = vst [vmem:[#allocation44_spill] sm:$0xff] %v12277_v10  ;;  %15059 = vst [vmem:[#allocation53_spill] sm:$0xff] %v12286_v13  ;;  %v8897_v10 = vadd.f32 %v5536_v46, %v11551_v54  ;;  %v5971_v33 = vadd.f32 %v8896_v0, %v12242_v17  ;;  %v6541_v38 = vadd.f32 %v8896_v0, %v12248_v28  ;;  %v12313_v54 = vpop.permute.xlu1 %617 }
 0x3c7   :  { %15061 = vst [vmem:[#allocation57_spill] sm:$0xff] %v12290_v6  ;;  %15062 = vst [vmem:[#allocation60_spill] sm:$0xff] %v12292_v47  ;;  %v12301_v61 = vadd.f32 %v12033_v57, %v3272_v12  ;;  %v12307_v52 = vadd.f32 %v15063_v55, %v12238_v62  ;;  %v12311_v18 = vadd.f32 %v15065_v27, %v12266_v63  ;;  %v8646_v6 = vpop.f32.mrb[94].mxu1  ;;  %v15068_v57 = vld [vmem:[#allocation58_spill] sm:$0xff]  ;;  %v3277_v62 = vpop.f32.mrb[48].mxu0 }
 0x3c8   :  { %15067 = vst [vmem:[#allocation72_spill] sm:$0xff] %v12313_v54  ;;  %v5968_v46 = vadd.f32 %v8897_v10, %v12242_v17  ;;  %v6538_v0 = vadd.f32 %v8897_v10, %v12248_v28  ;;  %v12319_v12 = vadd.f32 %v15068_v57, %v12266_v63  ;;  %15070 = vst [vmem:[#allocation81_spill] sm:$0xff] %v12323_v42  ;;  %v5548_v27 = vpop.f32.mrb[95].mxu1  ;;  %v3279_v35 = vpop.f32.mrb[49].mxu0 }
 0x3c9   :  { %15064 = vst [vmem:[#allocation63_spill] sm:$0xff] %v12307_v52  ;;  %15066 = vst [vmem:[#allocation68_spill] sm:$0xff] %v12311_v18  ;;  %v8898_v55 = vadd.f32 %v8646_v6, %v11615_v49  ;;  %v15071_v18 = vmin.f32 %v11611_v7, %v11621_v19  ;;  %v12330_v13 = vadd.f32 %v12039_v5, %v3277_v62  ;;  %v15075_v5 = vld [vmem:[#allocation62_spill] sm:$0xff] }
 0x3ca   :  { %15069 = vst [vmem:[#allocation76_spill] sm:$0xff] %v12319_v12  ;;  %v8899_v10 = vadd.f32 %v5548_v27, %v11583_v56  ;;  %v15072_v57 = vmin.f32 %v11608_v60, %v11618_v21  ;;  %v15073_v53 = vmin.f32 %v11591_v34, %v11599_v39  ;;  %v12342_v7 = vadd.f32 %v12047_v48, %v3279_v35  ;;  %v8649_v48 = vpop.f32.mrb[96].mxu1  ;;  %v3284_v35 = vpop.f32.mrb[50].mxu0  ;;  %v15083_v27 = vld [vmem:[#allocation93_spill] sm:$0xff]  ;;  %v15122_v12 = vld [vmem:[#allocation79_spill] sm:$0xff] }
 0x3cb   :  { %v7464_v52 = vmin.f32 %v15071_v18, %v6541_v38  ;;  %v5977_v6 = vadd.f32 %v8898_v55, %v12242_v17  ;;  %v6547_v42 = vadd.f32 %v8898_v55, %v12248_v28  ;;  %v15074_v56 = vmin.f32 %v11588_v15, %v11596_v29  ;;  %v15082_v55 = vld [vmem:[#allocation80_spill] sm:$0xff] }
 0x3cc   :  { %v7142_v63 = vmin.f32 %v15072_v57, %v5971_v33  ;;  %v7460_v49 = vmin.f32 %v15073_v53, %v6538_v0  ;;  %v12349_v60 = vadd.f32 %v15075_v5, %v12292_v47  ;;  %v12353_v34 = vadd.f32 %v11200_v22, %v12313_v54  ;;  %v5560_v33 = vpop.f32.mrb[97].mxu1  ;;  %v3286_v0 = vpop.f32.mrb[51].mxu0  ;;  %v15086_v53 = vld [vmem:[#allocation148_spill] sm:$0xff]  ;;  %v15104_v47 = vld [vmem:[#allocation50_spill] sm:$0xff] }
 0x3cd   :  { %7465 = vmin.xlane.f32.xlu0 %v7464_v52  ;;  %v7138_v19 = vmin.f32 %v15074_v56, %v5968_v46  ;;  %v5974_v39 = vadd.f32 %v8899_v10, %v12242_v17  ;;  %v6544_v21 = vadd.f32 %v8899_v10, %v12248_v28  ;;  %v15078_v52 = vld [vmem:[#allocation66_spill] sm:$0xff]  ;;  %v12362_v15 = vadd.f32 %v8801_v20, %v11571_v11 }
 0x3ce   :  { %15076 = vst [vmem:[#allocation84_spill] sm:$0xff] %v12349_v60  ;;  %15077 = vst [vmem:[#allocation88_spill] sm:$0xff] %v12353_v34  ;;  %7143 = vmin.xlane.f32.xlu1 %v7142_v63  ;;  %v12359_v62 = vadd.f32 %v15078_v52, %v12313_v54  ;;  %v8900_v29 = vadd.f32 %v8649_v48, %v11651_v37  ;;  %v15080_v22 = vmin.f32 %v11654_v8, %v11662_v4  ;;  %v15081_v63 = vld [vmem:[#allocation89_spill] sm:$0xff]  ;;  %v15085_v20 = vld [vmem:[#allocation86_spill] sm:$0xff] }
 0x3cf   :  { %v12369_v18 = vadd.f32 %v12051_v30, %v3284_v35  ;;  %v8901_v46 = vadd.f32 %v5560_v33, %v15081_v63  ;;  %v15084_v10 = vmin.f32 %v15082_v55, %v15083_v27  ;;  %v15087_v56 = vmin.f32 %v15085_v20, %v15086_v53  ;;  %v15088_v8 = vld [vmem:[#allocation159_spill] sm:$0xff]  ;;  %v15089_v30 = vld [vmem:[#allocation13_spill] sm:$0xff]  ;;  %v15096_v27 = vld [vmem:[#allocation46_spill] sm:$0xff] }
 0x3d0   :  { %15079 = vst [vmem:[#allocation90_spill] sm:$0xff] %v12359_v62  ;;  %v7150_v38 = vmin.f32 %v15080_v22, %v5977_v6  ;;  %v5983_v5 = vadd.f32 %v8900_v29, %v12242_v17  ;;  %v6553_v48 = vadd.f32 %v8900_v29, %v12248_v28  ;;  %v12381_v4 = vadd.f32 %v15088_v8, %v3286_v0  ;;  %v15090_v6 = vld [vmem:[#allocation15_spill] sm:$0xff]  ;;  %v3291_v0 = vpop.f32.mrb[52].mxu0  ;;  %v15105_v34 = vld [vmem:[#allocation56_spill] sm:$0xff] }
 0x3d1   :  { %v7146_v57 = vmin.f32 %v15084_v10, %v5974_v39  ;;  %v7468_v37 = vmin.f32 %v15087_v56, %v6544_v21  ;;  %7139 = vmin.xlane.f32.xlu0 %v7138_v19  ;;  %v15091_v52 = vmin.f32 %v15089_v30, %v15090_v6  ;;  %v12388_v33 = vadd.f32 %v12245_v23, %v11581_v50  ;;  %v8652_v19 = vpop.f32.mrb[98].mxu1  ;;  %v15095_v23 = vld [vmem:[#allocation8_spill] sm:$0xff]  ;;  %v15097_v10 = vld [vmem:[#allocation51_spill] sm:$0xff]  ;;  %v3293_v6 = vpop.f32.mrb[53].mxu0 }
 0x3d2   :  { %v12392_v39 = vadd.f32 %v12295_v25, %v11568_v9  ;;  %v12396_v21 = vadd.f32 %v12369_v18, %v11571_v11  ;;  %v6550_v29 = vadd.f32 %v8901_v46, %v12248_v28  ;;  %7461 = vmin.xlane.f32.xlu1 %v7460_v49  ;;  %v5980_v22 = vadd.f32 %v8901_v46, %v12242_v17  ;;  %v5572_v55 = vpop.f32.mrb[99].mxu1  ;;  %v15099_v56 = vld [vmem:[#allocation160_spill] sm:$0xff]  ;;  %v15102_v46 = vld [vmem:[#allocation33_spill] sm:$0xff] }
 0x3d3   :  { %v7472_v35 = vmin.f32 %v15091_v52, %v6547_v42  ;;  %v12402_v42 = vadd.f32 %v12381_v4, %v11581_v50  ;;  %v8902_v63 = vadd.f32 %v8652_v19, %v15095_v23  ;;  %v15098_v20 = vmin.f32 %v15096_v27, %v15097_v10  ;;  %v15100_v30 = vld [vmem:[#allocation16_spill] sm:$0xff]  ;;  %v15101_v52 = vld [vmem:[#allocation26_spill] sm:$0xff] }
 0x3d4   :  { %15092 = vst [vmem:[#allocation94_spill] sm:$0xff] %v12392_v39  ;;  %15093 = vst [vmem:[#allocation96_spill] sm:$0xff] %v12396_v21  ;;  %v12409_v8 = vadd.f32 %v15099_v56, %v3291_v0  ;;  %v8903_v49 = vadd.f32 %v5572_v55, %v15100_v30  ;;  %v15103_v54 = vmin.f32 %v15101_v52, %v15102_v46  ;;  %v15113_v10 = vld [vmem:[#allocation20_spill] sm:$0xff]  ;;  %v15118_v0 = vld [vmem:[#allocation70_spill] sm:$0xff] }
 0x3d5   :  { %15094 = vst [vmem:[#allocation98_spill] sm:$0xff] %v12402_v42  ;;  %v7158_v53 = vmin.f32 %v15098_v20, %v5983_v5  ;;  %v15106_v60 = vmin.f32 %v15104_v47, %v15105_v34  ;;  %v12422_v23 = vadd.f32 %v12295_v25, %v11571_v11  ;;  %v12426_v5 = vadd.f32 %v12301_v61, %v11578_v40  ;;  %v8655_v34 = vpop.f32.mrb[100].mxu1  ;;  %v15114_v20 = vld [vmem:[#allocation27_spill] sm:$0xff]  ;;  %v15119_v42 = vld [vmem:[#allocation78_spill] sm:$0xff] }
 0x3d6   :  { %v7476_v62 = vmin.f32 %v15103_v54, %v6550_v29  ;;  %v12431_v55 = vadd.f32 %v12077_v24, %v3293_v6  ;;  %7151 = vmin.xlane.f32.xlu0 %v7150_v38  ;;  %v12435_v47 = vadd.f32 %v12301_v61, %v11581_v50  ;;  %v12439_v54 = vadd.f32 %v12409_v8, %v11571_v11  ;;  %v15112_v38 = vld [vmem:[#allocation41_spill] sm:$0xff]  ;;  %v3298_v61 = vpop.f32.mrb[54].mxu0  ;;  %v5584_v27 = vpop.f32.mrb[101].mxu1  ;;  %v15116_v6 = vld [vmem:[#allocation163_spill] sm:$0xff] }
 0x3d7   :  { %v12418_v19 = vmin.f32 %v15106_v60, %v6553_v48  ;;  %15107 = vst [vmem:[#allocation100_spill] sm:$0xff] %v12422_v23  ;;  %15108 = vst [vmem:[#allocation102_spill] sm:$0xff] %v12426_v5  ;;  %v5986_v25 = vadd.f32 %v8903_v49, %v12242_v17  ;;  %v6556_v60 = vadd.f32 %v8903_v49, %v12248_v28  ;;  %7147 = vmin.xlane.f32.xlu1 %v7146_v57  ;;  %v15117_v49 = vld [vmem:[#allocation37_spill] sm:$0xff]  ;;  %v3300_v46 = vpop.f32.mrb[55].mxu0 }
 0x3d8   :  { %15109 = vst [vmem:[#allocation104_spill] sm:$0xff] %v12435_v47  ;;  %15110 = vst [vmem:[#allocation107_spill] sm:$0xff] %v12439_v54  ;;  %v5989_v48 = vadd.f32 %v8902_v63, %v12242_v17  ;;  %v12446_v24 = vadd.f32 %v12431_v55, %v11581_v50  ;;  %v8904_v29 = vadd.f32 %v8655_v34, %v15112_v38  ;;  %v15121_v47 = vld [vmem:[#allocation71_spill] sm:$0xff] }
 0x3d9   :  { %v15115_v56 = vmin.f32 %v15113_v10, %v15114_v20  ;;  %v8821_v52 = vadd.f32 %v15116_v6, %v3298_v61  ;;  %v8905_v57 = vadd.f32 %v5584_v27, %v15117_v49  ;;  %v15120_v21 = vmin.f32 %v15118_v0, %v15119_v42  ;;  %v8658_v0 = vpop.f32.mrb[102].mxu1  ;;  %v15130_v10 = vld [vmem:[#allocation120_spill] sm:$0xff]  ;;  %v15136_v54 = vld [vmem:[#allocation127_spill] sm:$0xff] }
 0x3da   :  { %15111 = vst [vmem:[#allocation110_spill] sm:$0xff] %v12446_v24  ;;  %v15123_v39 = vmin.f32 %v15121_v47, %v15122_v12  ;;  %v12466_v38 = vadd.f32 %v12330_v13, %v11568_v9  ;;  %v8823_v27 = vadd.f32 %v12085_v51, %v3300_v46  ;;  %7473 = vmin.xlane.f32.xlu0 %v7472_v35  ;;  %v3305_v35 = vpop.f32.mrb[56].mxu0  ;;  %v15134_v46 = vld [vmem:[#allocation132_spill] sm:$0xff] }
 0x3db   :  { %v12452_v30 = vmin.f32 %v15115_v56, %v5980_v22  ;;  %v7162_v23 = vmin.f32 %v15120_v21, %v5986_v25  ;;  %v6559_v22 = vadd.f32 %v8902_v63, %v12248_v28  ;;  %v12473_v42 = vadd.f32 %v8821_v52, %v11568_v9  ;;  %7469 = vmin.xlane.f32.xlu1 %v7468_v37  ;;  %v5596_v25 = vpop.f32.mrb[103].mxu1  ;;  %v3307_v49 = vpop.f32.mrb[57].mxu0 }
 0x3dc   :  { %v12462_v34 = vmin.f32 %v15123_v39, %v6556_v60  ;;  %15124 = vst [vmem:[#allocation112_spill] sm:$0xff] %v12466_v38  ;;  %v12476_v21 = vadd.f32 %v8821_v52, %v11571_v11  ;;  %v5992_v12 = vadd.f32 %v8905_v57, %v12242_v17  ;;  %v6562_v39 = vadd.f32 %v8905_v57, %v12248_v28  ;;  %v15129_v60 = vld [vmem:[#allocation106_spill] sm:$0xff]  ;;  %v15132_v52 = vld [vmem:[#allocation61_spill] sm:$0xff] }
 0x3dd   :  { %15125 = vst [vmem:[#allocation114_spill] sm:$0xff] %v12473_v42  ;;  %v5995_v63 = vadd.f32 %v8904_v29, %v12242_v17  ;;  %v12482_v47 = vadd.f32 %v8823_v27, %v11578_v40  ;;  %v12485_v51 = vadd.f32 %v8823_v27, %v11581_v50  ;;  %v15131_v20 = vmin.f32 %v15129_v60, %v15130_v10  ;;  %v15133_v57 = vld [vmem:[#allocation74_spill] sm:$0xff]  ;;  %v15137_v27 = vld [vmem:[#allocation75_spill] sm:$0xff]  ;;  %v3312_v10 = vpop.f32.mrb[58].mxu0 }
 0x3de   :  { %15126 = vst [vmem:[#allocation116_spill] sm:$0xff] %v12476_v21  ;;  %v8825_v6 = vadd.f32 %v12091_v2, %v3305_v35  ;;  %v8907_v37 = vadd.f32 %v5596_v25, %v15132_v52  ;;  %v15135_v61 = vmin.f32 %v15133_v57, %v15134_v46  ;;  %v15138_v5 = vmin.f32 %v15136_v54, %v15137_v27  ;;  %v15143_v52 = vld [vmem:[#allocation111_spill] sm:$0xff]  ;;  %v15147_v27 = vld [vmem:[#allocation145_spill] sm:$0xff]  ;;  %v15154_v42 = vld [vmem:[#allocation18_spill] sm:$0xff] }
 0x3df   :  { %15127 = vst [vmem:[#allocation118_spill] sm:$0xff] %v12482_v47  ;;  %15128 = vst [vmem:[#allocation122_spill] sm:$0xff] %v12485_v51  ;;  %v12490_v56 = vmin.f32 %v15131_v20, %v5989_v48  ;;  %v12506_v60 = vadd.f32 %v12330_v13, %v11571_v11  ;;  %v6565_v48 = vadd.f32 %v8904_v29, %v12248_v28  ;;  %7159 = vmin.xlane.f32.xlu0 %v7158_v53  ;;  %v8661_v13 = vpop.f32.mrb[104].mxu1  ;;  %v15144_v53 = vld [vmem:[#allocation67_spill] sm:$0xff]  ;;  %v15151_v21 = vld [vmem:[#allocation17_spill] sm:$0xff] }
 0x3e0   :  { %v12497_v24 = vmin.f32 %v15135_v61, %v5992_v12  ;;  %v12502_v38 = vmin.f32 %v15138_v5, %v6562_v39  ;;  %v15140_v61 = vld [vmem:[#allocation65_spill] sm:$0xff]  ;;  %v12515_v25 = vadd.f32 %v8825_v6, %v11568_v9  ;;  %v5998_v5 = vadd.f32 %v8907_v37, %v12242_v17  ;;  %7477 = vmin.xlane.f32.xlu1 %v7476_v62  ;;  %v5608_v20 = vpop.f32.mrb[105].mxu1  ;;  %v15146_v46 = vld [vmem:[#allocation139_spill] sm:$0xff] }
 0x3e1   :  { %15139 = vst [vmem:[#allocation124_spill] sm:$0xff] %v12506_v60  ;;  %v8906_v12 = vadd.f32 %v8658_v0, %v15140_v61  ;;  %v6568_v54 = vadd.f32 %v8907_v37, %v12248_v28  ;;  %v12520_v29 = vadd.f32 %v8825_v6, %v11571_v11  ;;  %v8827_v39 = vadd.f32 %v12099_v31, %v3307_v49  ;;  %v15149_v37 = vld [vmem:[#allocation165_spill] sm:$0xff]  ;;  %v15150_v2 = vld [vmem:[#allocation83_spill] sm:$0xff]  ;;  %v3314_v6 = vpop.f32.mrb[59].mxu0 }
 0x3e2   :  { %15141 = vst [vmem:[#allocation128_spill] sm:$0xff] %v12515_v25  ;;  %v15145_v57 = vmin.f32 %v15143_v52, %v15144_v53  ;;  %v15148_v61 = vmin.f32 %v15146_v46, %v15147_v27  ;;  %v8829_v62 = vadd.f32 %v15149_v37, %v3312_v10  ;;  %v8909_v51 = vadd.f32 %v5608_v20, %v15150_v2  ;;  %v15152_v47 = vld [vmem:[#allocation19_spill] sm:$0xff]  ;;  %v15155_v60 = vld [vmem:[#allocation25_spill] sm:$0xff]  ;;  %v15164_v27 = vld [vmem:[#allocation170_spill] sm:$0xff] }
 0x3e3   :  { %15142 = vst [vmem:[#allocation131_spill] sm:$0xff] %v12520_v29  ;;  %v15153_v31 = vmin.f32 %v15151_v21, %v15152_v47  ;;  %v15156_v52 = vmin.f32 %v15154_v42, %v15155_v60  ;;  %v12547_v53 = vadd.f32 %v12342_v7, %v11578_v40  ;;  %v12554_v2 = vadd.f32 %v8827_v39, %v11578_v40  ;;  %v15163_v10 = vld [vmem:[#allocation169_spill] sm:$0xff] }
 0x3e4   :  { %v12526_v0 = vmin.f32 %v15145_v57, %v6559_v22  ;;  %v12531_v35 = vmin.f32 %v15148_v61, %v5995_v63  ;;  %v12551_v63 = vadd.f32 %v12342_v7, %v11581_v50  ;;  %v12557_v21 = vadd.f32 %v8827_v39, %v11581_v50  ;;  %7481 = vmin.xlane.f32.xlu0 %v12418_v19  ;;  %v8664_v7 = vpop.f32.mrb[106].mxu1  ;;  %v3319_v57 = vpop.f32.mrb[60].mxu0  ;;  %v15165_v37 = vld [vmem:[#allocation121_spill] sm:$0xff] }
 0x3e5   :  { %v12538_v49 = vmin.f32 %v15153_v31, %v5998_v5  ;;  %v12543_v22 = vmin.f32 %v15156_v52, %v6568_v54  ;;  %15157 = vst [vmem:[#allocation133_spill] sm:$0xff] %v12547_v53  ;;  %15159 = vst [vmem:[#allocation140_spill] sm:$0xff] %v12554_v2  ;;  %v6001_v42 = vadd.f32 %v8906_v12, %v12242_v17  ;;  %7163 = vmin.xlane.f32.xlu1 %v7162_v23  ;;  %v5620_v46 = vpop.f32.mrb[107].mxu1  ;;  %v3321_v31 = vpop.f32.mrb[61].mxu0  ;;  %v15166_v52 = vld [vmem:[#allocation144_spill] sm:$0xff]  ;;  %v15167_v23 = vld [vmem:[#allocation149_spill] sm:$0xff] }
 0x3e6   :  { %15158 = vst [vmem:[#allocation136_spill] sm:$0xff] %v12551_v63  ;;  %15160 = vst [vmem:[#allocation142_spill] sm:$0xff] %v12557_v21  ;;  %v12562_v47 = vadd.f32 %v8829_v62, %v11568_v9  ;;  %v12565_v60 = vadd.f32 %v8829_v62, %v11571_v11  ;;  %v6004_v5 = vadd.f32 %v8909_v51, %v12242_v17  ;;  %v15169_v54 = vld [vmem:[#allocation59_spill] sm:$0xff]  ;;  %v15170_v2 = vld [vmem:[#allocation69_spill] sm:$0xff] }
 0x3e7   :  { %v6574_v19 = vadd.f32 %v8909_v51, %v12248_v28  ;;  %v8831_v20 = vadd.f32 %v15163_v10, %v3314_v6  ;;  %v8833_v61 = vadd.f32 %v15164_v27, %v3319_v57  ;;  %v8911_v62 = vadd.f32 %v5620_v46, %v15165_v37  ;;  %v15177_v46 = vld [vmem:[#allocation173_spill] sm:$0xff] }
 0x3e8   :  { %15161 = vst [vmem:[#allocation147_spill] sm:$0xff] %v12562_v47  ;;  %15162 = vst [vmem:[#allocation11_spill] sm:$0xff] %v12565_v60  ;;  %v15168_v63 = vmin.f32 %v15166_v52, %v15167_v23  ;;  %v15171_v25 = vmin.f32 %v15169_v54, %v15170_v2  ;;  %v12588_v51 = vadd.f32 %v12369_v18, %v11568_v9  ;;  %7155 = vmin.xlane.f32.xlu0 %v12452_v30  ;;  %v15174_v18 = vld [vmem:[#allocation92_spill] sm:$0xff]  ;;  %v15179_v52 = vld [vmem:[#allocation45_spill] sm:$0xff] }
 0x3e9   :  { %v12592_v6 = vadd.f32 %v12381_v4, %v11578_v40  ;;  %v12595_v10 = vadd.f32 %v8831_v20, %v11578_v40  ;;  %v12598_v57 = vadd.f32 %v8831_v20, %v11581_v50  ;;  %v12608_v2 = vadd.f32 %v8833_v61, %v11568_v9  ;;  %7485 = vmin.xlane.f32.xlu1 %v12462_v34  ;;  %v8667_v4 = vpop.f32.mrb[108].mxu1  ;;  %v15178_v34 = vld [vmem:[#allocation36_spill] sm:$0xff]  ;;  %v15267_v29 = vld [vmem:[#allocation9_spill] sm:$0xff] }
 0x3ea   :  { %v12579_v53 = vmin.f32 %v15168_v63, %v6565_v48  ;;  %v12584_v39 = vmin.f32 %v15171_v25, %v6004_v5  ;;  %v12603_v48 = vadd.f32 %v12409_v8, %v11568_v9  ;;  %v6571_v25 = vadd.f32 %v8906_v12, %v12248_v28  ;;  %v3326_v12 = vpop.f32.mrb[62].mxu0  ;;  %v5632_v20 = vpop.f32.mrb[109].mxu1  ;;  %v15181_v5 = vld [vmem:[#allocation64_spill] sm:$0xff] }
 0x3eb   :  { %15172 = vst [vmem:[#allocation12_spill] sm:$0xff] %v12595_v10  ;;  %15173 = vst [vmem:[#allocation14_spill] sm:$0xff] %v12598_v57  ;;  %v8908_v63 = vadd.f32 %v8661_v13, %v15174_v18  ;;  %v12616_v54 = vadd.f32 %v8833_v61, %v11571_v11  ;;  %v8835_v8 = vadd.f32 %v12129_v58, %v3321_v31  ;;  %v3328_v37 = vpop.f32.mrb[63].mxu0  ;;  %v15182_v10 = vld [vmem:[#allocation73_spill] sm:$0xff]  ;;  %v15184_v61 = vld [vmem:[#allocation126_spill] sm:$0xff] }
 0x3ec   :  { %15175 = vst [vmem:[#allocation21_spill] sm:$0xff] %v12608_v2  ;;  %v6010_v13 = vadd.f32 %v8911_v62, %v12242_v17  ;;  %v8837_v27 = vadd.f32 %v15177_v46, %v3326_v12  ;;  %v15180_v23 = vmin.f32 %v15178_v34, %v15179_v52  ;;  %v15183_v30 = vmin.f32 %v15181_v5, %v15182_v10 }
 0x3ed   :  { %15176 = vst [vmem:[#allocation23_spill] sm:$0xff] %v12616_v54  ;;  %v12633_v58 = vadd.f32 %v12431_v55, %v11578_v40  ;;  %v8910_v31 = vadd.f32 %v8664_v7, %v15184_v61  ;;  %v12637_v60 = vadd.f32 %v8835_v8, %v11578_v40  ;;  %v12640_v12 = vadd.f32 %v8835_v8, %v11581_v50  ;;  %v8670_v55 = vpop.f32.mrb[110].mxu1  ;;  %v15194_v7 = vld [vmem:[#allocation101_spill] sm:$0xff] }
 0x3ee   :  { %v12624_v18 = vmin.f32 %v15180_v23, %v6001_v42  ;;  %v12629_v57 = vmin.f32 %v15183_v30, %v6574_v19  ;;  %7167 = vmin.xlane.f32.xlu0 %v12490_v56  ;;  %v6007_v42 = vadd.f32 %v8908_v63, %v12242_v17  ;;  %v6580_v10 = vadd.f32 %v8911_v62, %v12248_v28  ;;  %v15187_v19 = vld [vmem:[#allocation138_spill] sm:$0xff]  ;;  %v3333_v62 = vpop.f32.mrb[64].mxu0  ;;  %v5644_v34 = vpop.f32.mrb[111].mxu1 }
 0x3ef   :  { %15185 = vst [vmem:[#allocation30_spill] sm:$0xff] %v12637_v60  ;;  %15186 = vst [vmem:[#allocation34_spill] sm:$0xff] %v12640_v12  ;;  %v8912_v5 = vadd.f32 %v8667_v4, %v15187_v19  ;;  %v12647_v30 = vadd.f32 %v8837_v27, %v11568_v9  ;;  %7171 = vmin.xlane.f32.xlu1 %v12497_v24  ;;  %v12655_v56 = vadd.f32 %v8837_v27, %v11571_v11  ;;  %v15190_v4 = vld [vmem:[#allocation135_spill] sm:$0xff]  ;;  %v3335_v61 = vpop.f32.mrb[65].mxu0  ;;  %v15191_v24 = vld [vmem:[#allocation40_spill] sm:$0xff] }
 0x3f0   :  { %v8839_v46 = vadd.f32 %v12137_v59, %v3328_v37  ;;  %v8913_v52 = vadd.f32 %v5632_v20, %v15190_v4  ;;  %v8841_v23 = vadd.f32 %v12143_v41, %v3333_v62  ;;  %v15192_v19 = vld [vmem:[#allocation49_spill] sm:$0xff]  ;;  %v6577_v27 = vadd.f32 %v8908_v63, %v12248_v28  ;;  %v8673_v37 = vpop.f32.mrb[112].mxu1 }
 0x3f1   :  { %15188 = vst [vmem:[#allocation38_spill] sm:$0xff] %v12647_v30  ;;  %15189 = vst [vmem:[#allocation42_spill] sm:$0xff] %v12655_v56  ;;  %v15193_v47 = vmin.f32 %v15191_v24, %v15192_v19  ;;  %v15195_v60 = vld [vmem:[#allocation105_spill] sm:$0xff]  ;;  %v12672_v59 = vadd.f32 %v8910_v31, %v12242_v17  ;;  %v5656_v62 = vpop.f32.mrb[113].mxu1  ;;  %v15203_v19 = vld [vmem:[#allocation91_spill] sm:$0xff] }
 0x3f2   :  { %v15196_v8 = vmin.f32 %v15194_v7, %v15195_v60  ;;  %v12675_v20 = vadd.f32 %v8839_v46, %v11578_v40  ;;  %v12678_v41 = vadd.f32 %v8839_v46, %v11581_v50  ;;  %7489 = vmin.xlane.f32.xlu0 %v12526_v0  ;;  %v12685_v60 = vadd.f32 %v8912_v5, %v12242_v17  ;;  %v3340_v46 = vpop.f32.mrb[66].mxu0  ;;  %v15205_v7 = vld [vmem:[#allocation103_spill] sm:$0xff] }
 0x3f3   :  { %v12663_v21 = vmin.f32 %v15193_v47, %v6571_v25  ;;  %v12682_v47 = vadd.f32 %v8910_v31, %v12248_v28  ;;  %v15199_v25 = vld [vmem:[#allocation154_spill] sm:$0xff]  ;;  %v12689_v63 = vadd.f32 %v8841_v23, %v11568_v9  ;;  %7493 = vmin.xlane.f32.xlu1 %v12502_v38  ;;  %v12697_v31 = vadd.f32 %v8841_v23, %v11571_v11  ;;  %v3342_v24 = vpop.f32.mrb[67].mxu0  ;;  %v15202_v38 = vld [vmem:[#allocation85_spill] sm:$0xff]  ;;  %v15217_v30 = vld [vmem:[#allocation95_spill] sm:$0xff] }
 0x3f4   :  { %v12668_v12 = vmin.f32 %v15196_v8, %v6010_v13  ;;  %15197 = vst [vmem:[#allocation43_spill] sm:$0xff] %v12675_v20  ;;  %15198 = vst [vmem:[#allocation47_spill] sm:$0xff] %v12678_v41  ;;  %v8914_v13 = vadd.f32 %v8670_v55, %v15199_v25  ;;  %v8843_v8 = vadd.f32 %v12151_v3, %v3335_v61  ;;  %v15206_v20 = vld [vmem:[#allocation108_spill] sm:$0xff]  ;;  %v15208_v3 = vld [vmem:[#allocation150_spill] sm:$0xff] }
 0x3f5   :  { %15200 = vst [vmem:[#allocation52_spill] sm:$0xff] %v12689_v63  ;;  %15201 = vst [vmem:[#allocation58_spill] sm:$0xff] %v12697_v31  ;;  %v6016_v55 = vadd.f32 %v8913_v52, %v12242_v17  ;;  %v8845_v4 = vadd.f32 %v12155_v26, %v3340_v46  ;;  %v15204_v25 = vmin.f32 %v15202_v38, %v15203_v19  ;;  %v3347_v38 = vpop.f32.mrb[68].mxu0  ;;  %v15230_v63 = vld [vmem:[#allocation119_spill] sm:$0xff] }
 0x3f6   :  { %v15207_v0 = vmin.f32 %v15205_v7, %v15206_v20  ;;  %v12713_v23 = vadd.f32 %v8912_v5, %v12248_v28  ;;  %v8915_v61 = vadd.f32 %v5644_v34, %v15208_v3  ;;  %v12717_v56 = vadd.f32 %v8843_v8, %v11578_v40  ;;  %7175 = vmin.xlane.f32.xlu0 %v12531_v35  ;;  %v8676_v34 = vpop.f32.mrb[114].mxu1 }
 0x3f7   :  { %v12705_v54 = vmin.f32 %v15204_v25, %v6007_v42  ;;  %v12720_v26 = vadd.f32 %v8843_v8, %v11581_v50  ;;  %v6586_v42 = vadd.f32 %v8913_v52, %v12248_v28  ;;  %v12725_v46 = vadd.f32 %v8914_v13, %v12242_v17  ;;  %7179 = vmin.xlane.f32.xlu1 %v12538_v49  ;;  %v15214_v52 = vld [vmem:[#allocation178_spill] sm:$0xff]  ;;  %v5668_v19 = vpop.f32.mrb[115].mxu1  ;;  %v15215_v25 = vld [vmem:[#allocation179_spill] sm:$0xff]  ;;  %v3349_v49 = vpop.f32.mrb[69].mxu0 }
 0x3f8   :  { %v12710_v41 = vmin.f32 %v15207_v0, %v6580_v10  ;;  %15209 = vst [vmem:[#allocation62_spill] sm:$0xff] %v12717_v56  ;;  %v15211_v10 = vld [vmem:[#allocation31_spill] sm:$0xff]  ;;  %v12729_v5 = vadd.f32 %v8845_v4, %v11568_v9  ;;  %v12737_v35 = vadd.f32 %v8845_v4, %v11571_v11  ;;  %v8847_v8 = vadd.f32 %v15214_v52, %v3342_v24  ;;  %v15219_v56 = vld [vmem:[#allocation130_spill] sm:$0xff]  ;;  %v15220_v0 = vld [vmem:[#allocation137_spill] sm:$0xff] }
 0x3f9   :  { %15210 = vst [vmem:[#allocation66_spill] sm:$0xff] %v12720_v26  ;;  %v8916_v20 = vadd.f32 %v8673_v37, %v15211_v10  ;;  %v12741_v37 = vadd.f32 %v8914_v13, %v12248_v28  ;;  %v8849_v3 = vadd.f32 %v15215_v25, %v3347_v38  ;;  %v15216_v10 = vld [vmem:[#allocation87_spill] sm:$0xff]  ;;  %v15221_v26 = vmin.f32 %v15219_v56, %v15220_v0  ;;  %v15222_v52 = vld [vmem:[#allocation29_spill] sm:$0xff]  ;;  %v15232_v0 = vld [vmem:[#allocation134_spill] sm:$0xff] }
 0x3fa   :  { %15212 = vst [vmem:[#allocation89_spill] sm:$0xff] %v12729_v5  ;;  %15213 = vst [vmem:[#allocation80_spill] sm:$0xff] %v12737_v35  ;;  %v15218_v2 = vmin.f32 %v15216_v10, %v15217_v30  ;;  %v6022_v24 = vadd.f32 %v8915_v61, %v12242_v17  ;;  %v8917_v31 = vadd.f32 %v5656_v62, %v15222_v52  ;;  %7497 = vmin.xlane.f32.xlu0 %v12579_v53  ;;  %v15225_v56 = vld [vmem:[#allocation55_spill] sm:$0xff]  ;;  %v8679_v62 = vpop.f32.mrb[116].mxu1  ;;  %v15228_v10 = vld [vmem:[#allocation182_spill] sm:$0xff] }
 0x3fb   :  { %v12752_v4 = vmin.f32 %v15221_v26, %v6016_v55  ;;  %v12757_v13 = vadd.f32 %v8847_v8, %v11578_v40  ;;  %v12760_v38 = vadd.f32 %v8847_v8, %v11581_v50  ;;  %v12765_v30 = vadd.f32 %v8916_v20, %v12242_v17  ;;  %7501 = vmin.xlane.f32.xlu1 %v12543_v22  ;;  %v3354_v8 = vpop.f32.mrb[70].mxu0  ;;  %v5680_v25 = vpop.f32.mrb[117].mxu1 }
 0x3fc   :  { %v12747_v7 = vmin.f32 %v15218_v2, %v6577_v27  ;;  %v6592_v2 = vadd.f32 %v8915_v61, %v12248_v28  ;;  %v8918_v27 = vadd.f32 %v8676_v34, %v15225_v56  ;;  %v12769_v55 = vadd.f32 %v8849_v3, %v11568_v9  ;;  %v3356_v22 = vpop.f32.mrb[71].mxu0  ;;  %v15229_v56 = vld [vmem:[#allocation115_spill] sm:$0xff] }
 0x3fd   :  { %15223 = vst [vmem:[#allocation93_spill] sm:$0xff] %v12757_v13  ;;  %15224 = vst [vmem:[#allocation86_spill] sm:$0xff] %v12760_v38  ;;  %v12777_v53 = vadd.f32 %v8849_v3, %v11571_v11  ;;  %v8851_v61 = vadd.f32 %v12181_v43, %v3349_v49  ;;  %v12781_v34 = vadd.f32 %v8916_v20, %v12248_v28  ;;  %v15233_v38 = vld [vmem:[#allocation141_spill] sm:$0xff]  ;;  %v15235_v49 = vld [vmem:[#allocation54_spill] sm:$0xff] }
 0x3fe   :  { %15226 = vst [vmem:[#allocation148_spill] sm:$0xff] %v12769_v55  ;;  %v8853_v52 = vadd.f32 %v15228_v10, %v3354_v8  ;;  %v15231_v26 = vmin.f32 %v15229_v56, %v15230_v63  ;;  %v15234_v3 = vmin.f32 %v15232_v0, %v15233_v38  ;;  %v12796_v43 = vadd.f32 %v8917_v31, %v12242_v17  ;;  %v3361_v10 = vpop.f32.mrb[72].mxu0 }
 0x3ff   :  { %15227 = vst [vmem:[#allocation159_spill] sm:$0xff] %v12777_v53  ;;  %v8919_v20 = vadd.f32 %v5668_v19, %v15235_v49  ;;  %v12800_v5 = vadd.f32 %v8851_v61, %v11578_v40  ;;  %v12803_v8 = vadd.f32 %v8851_v61, %v11581_v50  ;;  %7183 = vmin.xlane.f32.xlu0 %v12624_v18  ;;  %v8682_v19 = vpop.f32.mrb[118].mxu1  ;;  %v15241_v49 = vld [vmem:[#allocation117_spill] sm:$0xff] }
 0x400   :  { %v12788_v13 = vmin.f32 %v15231_v26, %v12672_v59  ;;  %v12793_v35 = vmin.f32 %v15234_v3, %v6586_v42  ;;  %v12807_v59 = vadd.f32 %v8917_v31, %v12248_v28  ;;  %v12810_v63 = vadd.f32 %v8918_v27, %v12242_v17  ;;  %v15238_v42 = vld [vmem:[#allocation82_spill] sm:$0xff]  ;;  %7187 = vmin.xlane.f32.xlu1 %v12584_v39  ;;  %v5692_v56 = vpop.f32.mrb[119].mxu1  ;;  %v3363_v39 = vpop.f32.mrb[73].mxu0  ;;  %v15244_v18 = vld [vmem:[#allocation157_spill] sm:$0xff] }
 0x401   :  { %15236 = vst [vmem:[#allocation13_spill] sm:$0xff] %v12800_v5  ;;  %15237 = vst [vmem:[#allocation15_spill] sm:$0xff] %v12803_v8  ;;  %v8920_v38 = vadd.f32 %v8679_v62, %v15238_v42  ;;  %v12814_v26 = vadd.f32 %v8853_v52, %v11568_v9  ;;  %v12822_v31 = vadd.f32 %v8853_v52, %v11571_v11  ;;  %v15242_v42 = vld [vmem:[#allocation123_spill] sm:$0xff]  ;;  %v15245_v8 = vld [vmem:[#allocation161_spill] sm:$0xff] }
 0x402   :  { %v8855_v61 = vadd.f32 %v12193_v44, %v3356_v22  ;;  %v12826_v62 = vadd.f32 %v8918_v27, %v12248_v28  ;;  %v8857_v3 = vadd.f32 %v12202_v32, %v3361_v10  ;;  %v15243_v0 = vmin.f32 %v15241_v49, %v15242_v42  ;;  %v15247_v22 = vld [vmem:[#allocation77_spill] sm:$0xff]  ;;  %v3368_v49 = vpop.f32.mrb[74].mxu0 }
 0x403   :  { %15239 = vst [vmem:[#allocation8_spill] sm:$0xff] %v12814_v26  ;;  %15240 = vst [vmem:[#allocation46_spill] sm:$0xff] %v12822_v31  ;;  %v15246_v52 = vmin.f32 %v15244_v18, %v15245_v8  ;;  %v12841_v44 = vadd.f32 %v8919_v20, %v12242_v17  ;;  %v8921_v27 = vadd.f32 %v5680_v25, %v15247_v22  ;;  %7505 = vmin.xlane.f32.xlu0 %v12663_v21  ;;  %v8685_v25 = vpop.f32.mrb[120].mxu1  ;;  %v15253_v22 = vld [vmem:[#allocation151_spill] sm:$0xff]  ;;  %v15256_v21 = vld [vmem:[#allocation158_spill] sm:$0xff] }
 0x404   :  { %v12833_v5 = vmin.f32 %v15243_v0, %v12682_v47  ;;  %v12845_v55 = vadd.f32 %v8855_v61, %v11578_v40  ;;  %v12848_v32 = vadd.f32 %v8855_v61, %v11581_v50  ;;  %v12852_v47 = vadd.f32 %v8919_v20, %v12248_v28  ;;  %7509 = vmin.xlane.f32.xlu1 %v12629_v57  ;;  %v5704_v42 = vpop.f32.mrb[121].mxu1  ;;  %v3370_v57 = vpop.f32.mrb[75].mxu0 }
 0x405   :  { %v12838_v53 = vmin.f32 %v15246_v52, %v6022_v24  ;;  %v12855_v8 = vadd.f32 %v8920_v38, %v12242_v17  ;;  %v15250_v24 = vld [vmem:[#allocation99_spill] sm:$0xff]  ;;  %v12859_v18 = vadd.f32 %v8857_v3, %v11568_v9  ;;  %v12867_v20 = vadd.f32 %v8857_v3, %v11571_v11 }
 0x406   :  { %15248 = vst [vmem:[#allocation51_spill] sm:$0xff] %v12845_v55  ;;  %15249 = vst [vmem:[#allocation160_spill] sm:$0xff] %v12848_v32  ;;  %v8922_v0 = vadd.f32 %v8682_v19, %v15250_v24  ;;  %v8859_v10 = vadd.f32 %v12206_v16, %v3363_v39  ;;  %v12871_v19 = vadd.f32 %v8920_v38, %v12248_v28  ;;  %v15254_v24 = vld [vmem:[#allocation152_spill] sm:$0xff]  ;;  %v15257_v32 = vld [vmem:[#allocation162_spill] sm:$0xff] }
 0x407   :  { %15251 = vst [vmem:[#allocation16_spill] sm:$0xff] %v12859_v18  ;;  %15252 = vst [vmem:[#allocation26_spill] sm:$0xff] %v12867_v20  ;;  %v8861_v52 = vadd.f32 %v12218_v36, %v3368_v49  ;;  %v15255_v61 = vmin.f32 %v15253_v22, %v15254_v24  ;;  %v15258_v3 = vmin.f32 %v15256_v21, %v15257_v32  ;;  %v15259_v39 = vld [vmem:[#allocation97_spill] sm:$0xff]  ;;  %7191 = vmin.xlane.f32.xlu0 %v12705_v54  ;;  %v15265_v49 = vld [vmem:[#allocation22_spill] sm:$0xff]  ;;  %v3375_v24 = vpop.f32.mrb[76].mxu0 }
 0x408   :  { %v12886_v16 = vadd.f32 %v8921_v27, %v12242_v17  ;;  %v8923_v38 = vadd.f32 %v5692_v56, %v15259_v39  ;;  %v12890_v26 = vadd.f32 %v8859_v10, %v11578_v40  ;;  %v12893_v36 = vadd.f32 %v8859_v10, %v11581_v50  ;;  %7195 = vmin.xlane.f32.xlu1 %v12668_v12  ;;  %v8688_v56 = vpop.f32.mrb[122].mxu1  ;;  %v3377_v12 = vpop.f32.mrb[77].mxu0  ;;  %v15269_v54 = vld [vmem:[#allocation176_spill] sm:$0xff]  ;;  %v15281_v18 = vld [vmem:[#allocation167_spill] sm:$0xff] }
 0x409   :  { %v12878_v55 = vmin.f32 %v15255_v61, %v12685_v60  ;;  %v12883_v31 = vmin.f32 %v15258_v3, %v6592_v2  ;;  %v12897_v60 = vadd.f32 %v8921_v27, %v12248_v28  ;;  %v12900_v32 = vadd.f32 %v8922_v0, %v12242_v17  ;;  %v15262_v2 = vld [vmem:[#allocation113_spill] sm:$0xff]  ;;  %v5716_v3 = vpop.f32.mrb[123].mxu1 }
 0x40a   :  { %15260 = vst [vmem:[#allocation33_spill] sm:$0xff] %v12890_v26  ;;  %15261 = vst [vmem:[#allocation50_spill] sm:$0xff] %v12893_v36  ;;  %v8924_v61 = vadd.f32 %v8685_v25, %v15262_v2  ;;  %v12904_v21 = vadd.f32 %v8861_v52, %v11568_v9  ;;  %v12912_v27 = vadd.f32 %v8861_v52, %v11571_v11  ;;  %v15266_v2 = vld [vmem:[#allocation153_spill] sm:$0xff]  ;;  %v15270_v52 = vld [vmem:[#allocation180_spill] sm:$0xff] }
 0x40b   :  { %v8863_v22 = vadd.f32 %v15265_v49, %v3370_v57  ;;  %v12916_v25 = vadd.f32 %v8922_v0, %v12248_v28  ;;  %v8865_v39 = vadd.f32 %v12232_v45, %v3375_v24  ;;  %v15268_v10 = vmin.f32 %v15266_v2, %v15267_v29  ;;  %v15272_v0 = vld [vmem:[#allocation109_spill] sm:$0xff]  ;;  %7513 = vmin.xlane.f32.xlu0 %v12747_v7 }
 0x40c   :  { %15263 = vst [vmem:[#allocation56_spill] sm:$0xff] %v12904_v21  ;;  %15264 = vst [vmem:[#allocation41_spill] sm:$0xff] %v12912_v27  ;;  %v15271_v36 = vmin.f32 %v15269_v54, %v15270_v52  ;;  %v12932_v57 = vadd.f32 %v8923_v38, %v12242_v17  ;;  %v8925_v49 = vadd.f32 %v5704_v42, %v15272_v0  ;;  %7517 = vmin.xlane.f32.xlu1 %v12710_v41  ;;  %v8691_v42 = vpop.f32.mrb[124].mxu1  ;;  %v3382_v52 = vpop.f32.mrb[78].mxu0  ;;  %v15284_v7 = vld [vmem:[#allocation177_spill] sm:$0xff] }
 0x40d   :  { %v12923_v26 = vmin.f32 %v15268_v10, %v12713_v23  ;;  %v12936_v45 = vadd.f32 %v8863_v22, %v11578_v40  ;;  %v12939_v24 = vadd.f32 %v8863_v22, %v11581_v50  ;;  %v12943_v29 = vadd.f32 %v8923_v38, %v12248_v28  ;;  %v15279_v22 = vld [vmem:[#allocation28_spill] sm:$0xff]  ;;  %v5728_v0 = vpop.f32.mrb[125].mxu1  ;;  %v3384_v41 = vpop.f32.mrb[79].mxu0 }
 0x40e   :  { %v12929_v20 = vmin.f32 %v15271_v36, %v12796_v43  ;;  %v12946_v23 = vadd.f32 %v8924_v61, %v12242_v17  ;;  %v15276_v43 = vld [vmem:[#allocation129_spill] sm:$0xff]  ;;  %v12950_v10 = vadd.f32 %v8865_v39, %v11568_v9  ;;  %v12958_v38 = vadd.f32 %v8865_v39, %v11571_v11 }
 0x40f   :  { %15273 = vst [vmem:[#allocation20_spill] sm:$0xff] %v12936_v45  ;;  %15274 = vst [vmem:[#allocation27_spill] sm:$0xff] %v12939_v24  ;;  %v8926_v36 = vadd.f32 %v8688_v56, %v15276_v43  ;;  %v8867_v2 = vadd.f32 %v15279_v22, %v3377_v12  ;;  %v12962_v56 = vadd.f32 %v8924_v61, %v12248_v28  ;;  %v15285_v39 = vld [vmem:[#allocation181_spill] sm:$0xff]  ;;  %7199 = vmin.xlane.f32.xlu0 %v12788_v13 }
 0x410   :  { %15275 = vst [vmem:[#allocation163_spill] sm:$0xff] %v12946_v23  ;;  %15277 = vst [vmem:[#allocation37_spill] sm:$0xff] %v12950_v10  ;;  %v8869_v43 = vadd.f32 %v12256_v14, %v3382_v52  ;;  %v15282_v23 = vld [vmem:[#allocation171_spill] sm:$0xff]  ;;  %v15286_v24 = vmin.f32 %v15284_v7, %v15285_v39  ;;  %v12978_v12 = vadd.f32 %v8925_v49, %v12242_v17  ;;  %v15287_v61 = vld [vmem:[#allocation125_spill] sm:$0xff]  ;;  %7203 = vmin.xlane.f32.xlu1 %v12752_v4  ;;  %v3389_v39 = vpop.f32.mrb[80].mxu0 }
 0x411   :  { %15278 = vst [vmem:[#allocation70_spill] sm:$0xff] %v12958_v38  ;;  %15280 = vst [vmem:[#allocation78_spill] sm:$0xff] %v12962_v56  ;;  %v15283_v54 = vmin.f32 %v15281_v18, %v15282_v23  ;;  %v8927_v22 = vadd.f32 %v5716_v3, %v15287_v61  ;;  %v12982_v14 = vadd.f32 %v8867_v2, %v11578_v40  ;;  %v8694_v3 = vpop.f32.mrb[126].mxu1  ;;  %v15294_v7 = vld [vmem:[#allocation32_spill] sm:$0xff]  ;;  %v3391_v4 = vpop.f32.mrb[81].mxu0  ;;  %v15310_v10 = vld [vmem:[#allocation185_spill] sm:$0xff] }
 0x412   :  { %v12975_v27 = vmin.f32 %v15286_v24, %v12807_v59  ;;  %v12985_v52 = vadd.f32 %v8867_v2, %v11581_v50  ;;  %v12992_v18 = vadd.f32 %v8926_v36, %v12242_v17  ;;  %v15291_v59 = vld [vmem:[#allocation146_spill] sm:$0xff]  ;;  %v12996_v23 = vadd.f32 %v8869_v43, %v11568_v9  ;;  %v5740_v61 = vpop.f32.mrb[127].mxu1  ;;  %v15297_v56 = vld [vmem:[#allocation172_spill] sm:$0xff] }
 0x413   :  { %v12969_v45 = vmin.f32 %v15283_v54, %v12725_v46  ;;  %15288 = vst [vmem:[#allocation71_spill] sm:$0xff] %v12982_v14  ;;  %v12989_v46 = vadd.f32 %v8925_v49, %v12248_v28  ;;  %v8928_v24 = vadd.f32 %v8691_v42, %v15291_v59  ;;  %v13004_v49 = vadd.f32 %v8869_v43, %v11571_v11  ;;  %v15295_v59 = vld [vmem:[#allocation7_spill] sm:$0xff]  ;;  %v15299_v43 = vld [vmem:[#allocation48_spill] sm:$0xff] }
 0x414   :  { %15289 = vst [vmem:[#allocation79_spill] sm:$0xff] %v12985_v52  ;;  %15290 = vst [vmem:[#allocation106_spill] sm:$0xff] %v12992_v18  ;;  %v8871_v2 = vadd.f32 %v15294_v7, %v3384_v41  ;;  %v13008_v42 = vadd.f32 %v8926_v36, %v12248_v28  ;;  %v8873_v21 = vadd.f32 %v15295_v59, %v3389_v39  ;;  %v15296_v18 = vld [vmem:[#allocation168_spill] sm:$0xff]  ;;  %v15301_v36 = vld [vmem:[#allocation143_spill] sm:$0xff]  ;;  %7521 = vmin.xlane.f32.xlu0 %v12833_v5 }
 0x415   :  { %15292 = vst [vmem:[#allocation120_spill] sm:$0xff] %v12996_v23  ;;  %15293 = vst [vmem:[#allocation61_spill] sm:$0xff] %v13004_v49  ;;  %v15298_v54 = vmin.f32 %v15296_v18, %v15297_v56  ;;  %v15300_v13 = vmin.f32 %v12269_v1, %v15299_v43  ;;  %v13024_v41 = vadd.f32 %v8927_v22, %v12242_v17  ;;  %7525 = vmin.xlane.f32.xlu1 %v12793_v35  ;;  %v3396_v43 = vpop.f32.mrb[82].mxu0 }
 0x416   :  { %v8929_v7 = vadd.f32 %v5728_v0, %v15301_v36  ;;  %v13028_v39 = vadd.f32 %v8871_v2, %v11578_v40  ;;  %v13031_v59 = vadd.f32 %v8871_v2, %v11581_v50  ;;  %v13038_v1 = vadd.f32 %v8928_v24, %v12242_v17  ;;  %v8697_v0 = vpop.f32.mrb[128].mxu1  ;;  %v3398_v35 = vpop.f32.mrb[83].mxu0 }
 0x417   :  { %v13015_v14 = vmin.f32 %v15298_v54, %v12741_v37  ;;  %v13021_v52 = vmin.f32 %v15300_v13, %v12841_v44  ;;  %v13035_v37 = vadd.f32 %v8927_v22, %v12248_v28  ;;  %v15305_v44 = vld [vmem:[#allocation156_spill] sm:$0xff]  ;;  %v13042_v18 = vadd.f32 %v8873_v21, %v11568_v9  ;;  %v15308_v13 = vld [vmem:[#allocation39_spill] sm:$0xff]  ;;  %v5752_v36 = vpop.f32.mrb[129].mxu1 }
 0x418   :  { %15302 = vst [vmem:[#allocation74_spill] sm:$0xff] %v13028_v39  ;;  %15303 = vst [vmem:[#allocation132_spill] sm:$0xff] %v13031_v59  ;;  %v8930_v56 = vadd.f32 %v8694_v3, %v15305_v44  ;;  %v13050_v22 = vadd.f32 %v8873_v21, %v11571_v11  ;;  %v8875_v2 = vadd.f32 %v15308_v13, %v3391_v4  ;;  %v15309_v44 = vld [vmem:[#allocation44_spill] sm:$0xff]  ;;  %v15313_v4 = vld [vmem:[#allocation155_spill] sm:$0xff]  ;;  %7207 = vmin.xlane.f32.xlu0 %v12878_v55 }
 0x419   :  { %15304 = vst [vmem:[#allocation127_spill] sm:$0xff] %v13038_v1  ;;  %15306 = vst [vmem:[#allocation75_spill] sm:$0xff] %v13042_v18  ;;  %v13054_v3 = vadd.f32 %v8928_v24, %v12248_v28  ;;  %v8877_v38 = vadd.f32 %v15309_v44, %v3396_v43  ;;  %v15311_v1 = vld [vmem:[#allocation187_spill] sm:$0xff]  ;;  %v7547_v21 = vmin.f32 %v12362_v15, %v12388_v33  ;;  %v15317_v15 = vld [vmem:[#allocation166_spill] sm:$0xff]  ;;  %7211 = vmin.xlane.f32.xlu1 %v12838_v53 }
 0x41a   :  { %15307 = vst [vmem:[#allocation65_spill] sm:$0xff] %v13050_v22  ;;  %v15312_v54 = vmin.f32 %v15310_v10, %v15311_v1  ;;  %v13066_v5 = vadd.f32 %v8929_v7, %v12242_v17  ;;  %v8931_v13 = vadd.f32 %v5740_v61, %v15313_v4  ;;  %v13070_v24 = vadd.f32 %v8875_v2, %v11578_v40  ;;  %v8700_v61 = vpop.f32.mrb[130].mxu1  ;;  %v3403_v4 = vpop.f32.mrb[84].mxu0 }
 0x41b   :  { %v13073_v43 = vadd.f32 %v8875_v2, %v11581_v50  ;;  %v13077_v10 = vadd.f32 %v8929_v7, %v12248_v28  ;;  %v8932_v33 = vadd.f32 %v8697_v0, %v15317_v15  ;;  %v13084_v1 = vadd.f32 %v8877_v38, %v11568_v9  ;;  %v15320_v2 = vld [vmem:[#allocation53_spill] sm:$0xff]  ;;  %v5764_v59 = vpop.f32.mrb[131].mxu1  ;;  %v3405_v53 = vpop.f32.mrb[85].mxu0 }
 0x41c   :  { %v13061_v39 = vmin.f32 %v15312_v54, %v12765_v30  ;;  %15314 = vst [vmem:[#allocation111_spill] sm:$0xff] %v13070_v24  ;;  %v13080_v30 = vadd.f32 %v8930_v56, %v12242_v17  ;;  %v13092_v7 = vadd.f32 %v8877_v38, %v11571_v11  ;;  %v8879_v44 = vadd.f32 %v15320_v2, %v3398_v35  ;;  %v15322_v15 = vld [vmem:[#allocation57_spill] sm:$0xff]  ;;  %v15323_v54 = vld [vmem:[#allocation186_spill] sm:$0xff]  ;;  %v15324_v24 = vld [vmem:[#allocation24_spill] sm:$0xff] }
 0x41d   :  { %15315 = vst [vmem:[#allocation67_spill] sm:$0xff] %v13073_v43  ;;  %15318 = vst [vmem:[#allocation145_spill] sm:$0xff] %v13084_v1  ;;  %v13096_v0 = vadd.f32 %v8930_v56, %v12248_v28  ;;  %v8881_v49 = vadd.f32 %v15322_v15, %v3403_v4  ;;  %v13100_v23 = vmin.f32 %v7547_v21, %v12852_v47  ;;  %v15326_v35 = vld [vmem:[#allocation164_spill] sm:$0xff]  ;;  %7529 = vmin.xlane.f32.xlu0 %v12923_v26 }
 0x41e   :  { %15316 = vst [vmem:[#allocation139_spill] sm:$0xff] %v13080_v30  ;;  %15319 = vst [vmem:[#allocation165_spill] sm:$0xff] %v13092_v7  ;;  %v15325_v55 = vmin.f32 %v15323_v54, %v15324_v24  ;;  %v13109_v38 = vadd.f32 %v8931_v13, %v12242_v17  ;;  %v8933_v2 = vadd.f32 %v5752_v36, %v15326_v35  ;;  %7533 = vmin.xlane.f32.xlu1 %v12883_v31  ;;  %v8703_v36 = vpop.f32.mrb[132].mxu1  ;;  %v3410_v35 = vpop.f32.mrb[86].mxu0 }
 0x41f   :  { %15321 = vst [vmem:[#allocation83_spill] sm:$0xff] %v13096_v0  ;;  %v13113_v56 = vadd.f32 %v8879_v44, %v11578_v40  ;;  %v13116_v4 = vadd.f32 %v8879_v44, %v11581_v50  ;;  %v13120_v47 = vadd.f32 %v8931_v13, %v12248_v28  ;;  %v13123_v21 = vadd.f32 %v8932_v33, %v12242_v17  ;;  %v15332_v44 = vld [vmem:[#allocation63_spill] sm:$0xff]  ;;  %v5776_v22 = vpop.f32.mrb[133].mxu1  ;;  %v3412_v31 = vpop.f32.mrb[87].mxu0  ;;  %v15336_v0 = vld [vmem:[#allocation112_spill] sm:$0xff] }
 0x420   :  { %v13106_v43 = vmin.f32 %v15325_v55, %v12781_v34  ;;  %v15330_v34 = vld [vmem:[#allocation175_spill] sm:$0xff]  ;;  %v13127_v54 = vadd.f32 %v8881_v49, %v11568_v9  ;;  %v13135_v13 = vadd.f32 %v8881_v49, %v11571_v11  ;;  %v8883_v15 = vadd.f32 %v15332_v44, %v3405_v53  ;;  %v15337_v55 = vld [vmem:[#allocation102_spill] sm:$0xff] }
 0x421   :  { %15327 = vst [vmem:[#allocation17_spill] sm:$0xff] %v13113_v56  ;;  %15328 = vst [vmem:[#allocation19_spill] sm:$0xff] %v13116_v4  ;;  %v8934_v24 = vadd.f32 %v8700_v61, %v15330_v34  ;;  %v13139_v61 = vadd.f32 %v8932_v33, %v12248_v28  ;;  %v15334_v34 = vld [vmem:[#allocation68_spill] sm:$0xff]  ;;  %v15338_v56 = vld [vmem:[#allocation94_spill] sm:$0xff]  ;;  %v13147_v26 = vadd.f32 %v8933_v2, %v12242_v17  ;;  %7215 = vmin.xlane.f32.xlu0 %v12969_v45 }
 0x422   :  { %15329 = vst [vmem:[#allocation18_spill] sm:$0xff] %v13123_v21  ;;  %15331 = vst [vmem:[#allocation25_spill] sm:$0xff] %v13135_v13  ;;  %v8885_v18 = vadd.f32 %v15334_v34, %v3410_v35  ;;  %v15335_v21 = vld [vmem:[#allocation133_spill] sm:$0xff]  ;;  %v7229_v1 = vmin.f32 %v15338_v56, %v15337_v55  ;;  %v15339_v49 = vld [vmem:[#allocation174_spill] sm:$0xff]  ;;  %v13151_v53 = vadd.f32 %v8883_v15, %v11578_v40  ;;  %7219 = vmin.xlane.f32.xlu1 %v12929_v20 }
 0x423   :  { %15333 = vst [vmem:[#allocation169_spill] sm:$0xff] %v13139_v61  ;;  %v7233_v30 = vmin.f32 %v15336_v0, %v15335_v21  ;;  %v8935_v4 = vadd.f32 %v5764_v59, %v15339_v49  ;;  %v13154_v33 = vadd.f32 %v8883_v15, %v11581_v50  ;;  %v13158_v44 = vadd.f32 %v8933_v2, %v12248_v28  ;;  %v15344_v56 = vld [vmem:[#allocation184_spill] sm:$0xff]  ;;  %v8706_v59 = vpop.f32.mrb[134].mxu1  ;;  %v3417_v49 = vpop.f32.mrb[88].mxu0 }
 0x424   :  { %15340 = vst [vmem:[#allocation170_spill] sm:$0xff] %v13151_v53  ;;  %v13161_v0 = vadd.f32 %v8934_v24, %v12242_v17  ;;  %v8936_v21 = vadd.f32 %v8703_v36, %v15344_v56  ;;  %v13165_v55 = vadd.f32 %v8885_v18, %v11568_v9  ;;  %v13173_v2 = vadd.f32 %v8885_v18, %v11571_v11  ;;  %v15347_v35 = vld [vmem:[#allocation76_spill] sm:$0xff]  ;;  %v5788_v7 = vpop.f32.mrb[135].mxu1  ;;  %v15348_v36 = vld [vmem:[#allocation183_spill] sm:$0xff] }
 0x425   :  { %15341 = vst [vmem:[#allocation121_spill] sm:$0xff] %v13154_v33  ;;  %15342 = vst [vmem:[#allocation144_spill] sm:$0xff] %v13158_v44  ;;  %v8887_v34 = vadd.f32 %v15347_v35, %v3412_v31  ;;  %v8937_v56 = vadd.f32 %v5776_v22, %v15348_v36  ;;  %v3419_v44 = vpop.f32.mrb[89].mxu0  ;;  %v13179_v20 = vmin.f32 %v7233_v30, %v12886_v16  ;;  %7537 = vmin.xlane.f32.xlu0 %v13015_v14  ;;  %v15355_v45 = vld [vmem:[#allocation88_spill] sm:$0xff] }
 0x426   :  { %15343 = vst [vmem:[#allocation149_spill] sm:$0xff] %v13161_v0  ;;  %15345 = vst [vmem:[#allocation59_spill] sm:$0xff] %v13165_v55  ;;  %v15349_v0 = vld [vmem:[#allocation81_spill] sm:$0xff]  ;;  %v7230_v15 = vmin.f32 %v7229_v1, %v12810_v63  ;;  %v13183_v53 = vadd.f32 %v8934_v24, %v12248_v28  ;;  %v13186_v18 = vadd.f32 %v8935_v4, %v12242_v17  ;;  %7541 = vmin.xlane.f32.xlu1 %v12975_v27  ;;  %v13208_v1 = vpop.f32.mrb[136].mxu1  ;;  %v15356_v33 = vld [vmem:[#allocation136_spill] sm:$0xff] }
 0x427   :  { %15346 = vst [vmem:[#allocation69_spill] sm:$0xff] %v13173_v2  ;;  %v8889_v61 = vadd.f32 %v15349_v0, %v3417_v49  ;;  %v13189_v31 = vadd.f32 %v8887_v34, %v11578_v40  ;;  %v13192_v35 = vadd.f32 %v8887_v34, %v11581_v50  ;;  %v13196_v22 = vadd.f32 %v8935_v4, %v12248_v28  ;;  %v15354_v0 = vld [vmem:[#allocation84_spill] sm:$0xff]  ;;  %v5800_v49 = vpop.f32.mrb[137].mxu1 }
 0x428   :  { %v13199_v16 = vadd.f32 %v8936_v21, %v12242_v17  ;;  %v13202_v63 = vadd.f32 %v8936_v21, %v12248_v28  ;;  %v8891_v34 = vadd.f32 %v15354_v0, %v3419_v44  ;;  %v3424_v21 = vpop.f32.mrb[90].mxu0  ;;  %v13219_v36 = vadd.f32 %v8937_v56, %v12242_v17  ;;  %v15357_v13 = vld [vmem:[#allocation124_spill] sm:$0xff] }
 0x429   :  { %15350 = vst [vmem:[#allocation92_spill] sm:$0xff] %v13189_v31  ;;  %15351 = vst [vmem:[#allocation173_spill] sm:$0xff] %v13192_v35  ;;  %v13205_v30 = vadd.f32 %v8889_v61, %v11568_v9  ;;  %v13215_v4 = vadd.f32 %v8889_v61, %v11571_v11  ;;  %v8893_v27 = vadd.f32 %v15355_v45, %v3424_v21  ;;  %v15358_v24 = vld [vmem:[#allocation104_spill] sm:$0xff]  ;;  %v15360_v61 = vld [vmem:[#allocation35_spill] sm:$0xff]  ;;  %7223 = vmin.xlane.f32.xlu0 %v13061_v39 }
 0x42a   :  { %15352 = vst [vmem:[#allocation36_spill] sm:$0xff] %v13199_v16  ;;  %15353 = vst [vmem:[#allocation45_spill] sm:$0xff] %v13202_v63  ;;  %v3426_v63 = vpop.f32.mrb[91].mxu0  ;;  %v7555_v16 = vmin.f32 %v15357_v13, %v15356_v33  ;;  %v15359_v31 = vld [vmem:[#allocation100_spill] sm:$0xff]  ;;  %v13227_v14 = vadd.f32 %v8937_v56, %v12248_v28  ;;  %v8938_v35 = vadd.f32 %v8706_v59, %v15360_v61  ;;  %v15361_v45 = vld [vmem:[#allocation10_spill] sm:$0xff]  ;;  %7227 = vmin.xlane.f32.xlu1 %v13021_v52 }
 0x42b   :  { %v7551_v55 = vmin.f32 %v15359_v31, %v15358_v24  ;;  %v13231_v44 = vadd.f32 %v8891_v34, %v11578_v40  ;;  %v13234_v0 = vadd.f32 %v8891_v34, %v11581_v50  ;;  %v8939_v21 = vadd.f32 %v5788_v7, %v15361_v45  ;;  %v15362_v56 = vld [vmem:[#allocation60_spill] sm:$0xff]  ;;  %v15363_v34 = vld [vmem:[#allocation90_spill] sm:$0xff]  ;;  %v15364_v52 = vld [vmem:[#allocation107_spill] sm:$0xff] }
 0x42c   :  { %v13239_v13 = vadd.f32 %v8893_v27, %v11568_v9  ;;  %v13242_v33 = vadd.f32 %v8893_v27, %v11571_v11  ;;  %v8941_v31 = vadd.f32 %v5800_v49, %v15362_v56  ;;  %v8895_v39 = vadd.f32 %v15363_v34, %v3426_v63  ;;  %v15365_v27 = vld [vmem:[#allocation110_spill] sm:$0xff] }
 0x42d   :  { %v7556_v7 = vmin.f32 %v7555_v16, %v12897_v60  ;;  %v7552_v9 = vmin.f32 %v7551_v55, %v12826_v62  ;;  %v7241_v11 = vmin.f32 %v12603_v48, %v12633_v58  ;;  %v7237_v49 = vmin.f32 %v12588_v51, %v12592_v6  ;;  %7545 = vmin.xlane.f32.xlu0 %v13106_v43  ;;  %v15368_v62 = vld [vmem:[#allocation96_spill] sm:$0xff]  ;;  %v15369_v60 = vld [vmem:[#allocation98_spill] sm:$0xff] }
 0x42e   :  { %v15366_v61 = vmin.f32 %v15364_v52, %v15365_v27  ;;  %v6102_v56 = vadd.f32 %v8895_v39, %v11578_v40  ;;  %v6672_v63 = vadd.f32 %v8895_v39, %v11581_v50  ;;  %v15370_v55 = vmin.f32 %v15368_v62, %v15369_v60  ;;  %v15371_v58 = vld [vmem:[#allocation128_spill] sm:$0xff]  ;;  %7549 = vmin.xlane.f32.xlu1 %v13100_v23  ;;  %v15374_v50 = vld [vmem:[#allocation114_spill] sm:$0xff]  ;;  %v15377_v52 = vld [vmem:[#allocation131_spill] sm:$0xff] }
 0x42f   :  { %v15372_v51 = vld [vmem:[#allocation140_spill] sm:$0xff]  ;;  %v7238_v40 = vmin.f32 %v7237_v49, %v12855_v8  ;;  %v15375_v34 = vld [vmem:[#allocation118_spill] sm:$0xff]  ;;  %v15383_v8 = vld [vmem:[#allocation21_spill] sm:$0xff] }
 0x430   :  { %v13261_v45 = vmin.f32 %v15366_v61, %v12943_v29  ;;  %v7560_v48 = vmin.f32 %v15370_v55, %v12871_v19  ;;  %v15373_v6 = vmin.f32 %v15371_v58, %v15372_v51  ;;  %v7242_v29 = vmin.f32 %v7241_v11, %v12932_v57  ;;  %v15378_v27 = vld [vmem:[#allocation142_spill] sm:$0xff]  ;;  %v15380_v23 = vld [vmem:[#allocation116_spill] sm:$0xff]  ;;  %v15387_v51 = vld [vmem:[#allocation147_spill] sm:$0xff] }
 0x431   :  { %v15376_v43 = vmin.f32 %v15374_v50, %v15375_v34  ;;  %v15379_v19 = vmin.f32 %v15377_v52, %v15378_v27  ;;  %v7317_v62 = vmin.f32 %v13239_v13, %v6102_v56  ;;  %v15381_v60 = vld [vmem:[#allocation122_spill] sm:$0xff]  ;;  %7231 = vmin.xlane.f32.xlu0 %v7230_v15 }
 0x432   :  { %15367 = vst [vmem:[#allocation64_spill] sm:$0xff] %v13261_v45  ;;  %v7250_v16 = vmin.f32 %v15373_v6, %v12978_v12  ;;  %v7639_v12 = vmin.f32 %v13242_v33, %v6672_v63  ;;  %v15382_v57 = vmin.f32 %v15380_v23, %v15381_v60  ;;  %v15384_v49 = vld [vmem:[#allocation30_spill] sm:$0xff]  ;;  %v15388_v6 = vld [vmem:[#allocation12_spill] sm:$0xff]  ;;  %7235 = vmin.xlane.f32.xlu1 %v13179_v20 }
 0x433   :  { %v7246_v39 = vmin.f32 %v15376_v43, %v12900_v32  ;;  %v7572_v61 = vmin.f32 %v15379_v19, %v12989_v46  ;;  %v15385_v55 = vmin.f32 %v15383_v8, %v15384_v49  ;;  %v15386_v32 = vld [vmem:[#allocation163_spill] sm:$0xff]  ;;  %v15389_v50 = vmin.f32 %v15387_v51, %v15388_v6  ;;  %v15391_v13 = vld [vmem:[#allocation34_spill] sm:$0xff]  ;;  %v15397_v19 = vld [vmem:[#allocation52_spill] sm:$0xff] }
 0x434   :  { %v7568_v11 = vmin.f32 %v15382_v57, %v12916_v25  ;;  %v15390_v46 = vld [vmem:[#allocation23_spill] sm:$0xff]  ;;  %v15393_v63 = vld [vmem:[#allocation78_spill] sm:$0xff]  ;;  %v15441_v45 = vld [vmem:[#allocation72_spill] sm:$0xff] }
 0x435   :  { %v7258_v58 = vmin.f32 %v15385_v55, %v13024_v41  ;;  %v7254_v34 = vmin.f32 %v15389_v50, %v15386_v32  ;;  %v15392_v56 = vmin.f32 %v15390_v46, %v15391_v13  ;;  %v15394_v43 = vld [vmem:[#allocation11_spill] sm:$0xff]  ;;  %v15395_v52 = vld [vmem:[#allocation14_spill] sm:$0xff]  ;;  %7553 = vmin.xlane.f32.xlu0 %v7552_v9 }
 0x436   :  { %v15396_v27 = vmin.f32 %v15394_v43, %v15395_v52  ;;  %v15398_v23 = vld [vmem:[#allocation62_spill] sm:$0xff]  ;;  %v15402_v49 = vld [vmem:[#allocation43_spill] sm:$0xff]  ;;  %v15410_v43 = vld [vmem:[#allocation148_spill] sm:$0xff]  ;;  %7557 = vmin.xlane.f32.xlu1 %v7556_v7 }
 0x437   :  { %v7580_v33 = vmin.f32 %v15392_v56, %v13035_v37  ;;  %v15399_v60 = vmin.f32 %v15397_v19, %v15398_v23  ;;  %v15400_v57 = vld [vmem:[#allocation106_spill] sm:$0xff]  ;;  %v15408_v13 = vld [vmem:[#allocation47_spill] sm:$0xff]  ;;  %v15411_v52 = vld [vmem:[#allocation13_spill] sm:$0xff] }
 0x438   :  { %v7576_v25 = vmin.f32 %v15396_v27, %v15393_v63  ;;  %v15401_v8 = vld [vmem:[#allocation38_spill] sm:$0xff]  ;;  %v15413_v27 = vld [vmem:[#allocation127_spill] sm:$0xff]  ;;  %v15414_v19 = vld [vmem:[#allocation89_spill] sm:$0xff] }
 0x439   :  { %v7266_v41 = vmin.f32 %v15399_v60, %v13066_v5  ;;  %v15403_v55 = vmin.f32 %v15401_v8, %v15402_v49  ;;  %v15404_v51 = vld [vmem:[#allocation58_spill] sm:$0xff]  ;;  %v15412_v5 = vmin.f32 %v15410_v43, %v15411_v52  ;;  %v15415_v23 = vld [vmem:[#allocation93_spill] sm:$0xff]  ;;  %v15417_v8 = vld [vmem:[#allocation159_spill] sm:$0xff]  ;;  %v6667_v43 = vadd.f32 %v8938_v35, %v12248_v28  ;;  %7239 = vmin.xlane.f32.xlu0 %v7238_v40 }
 0x43a   :  { %v15405_v6 = vld [vmem:[#allocation66_spill] sm:$0xff]  ;;  %v15416_v60 = vmin.f32 %v15414_v19, %v15415_v23  ;;  %v6094_v52 = vadd.f32 %v8939_v21, %v12242_v17  ;;  %v15428_v19 = vld [vmem:[#allocation51_spill] sm:$0xff]  ;;  %7243 = vmin.xlane.f32.xlu1 %v7242_v29 }
 0x43b   :  { %v7262_v32 = vmin.f32 %v15403_v55, %v15400_v57  ;;  %v15406_v37 = vmin.f32 %v15404_v51, %v15405_v6  ;;  %v15407_v46 = vld [vmem:[#allocation42_spill] sm:$0xff]  ;;  %v7274_v15 = vmin.f32 %v15412_v5, %v13109_v38  ;;  %v15420_v51 = vld [vmem:[#allocation80_spill] sm:$0xff]  ;;  %v15424_v38 = vld [vmem:[#allocation33_spill] sm:$0xff] }
 0x43c   :  { %v15409_v56 = vmin.f32 %v15407_v46, %v15408_v13  ;;  %v7270_v57 = vmin.f32 %v15416_v60, %v15413_v27  ;;  %v15423_v46 = vld [vmem:[#allocation16_spill] sm:$0xff]  ;;  %v15426_v5 = vld [vmem:[#allocation139_spill] sm:$0xff]  ;;  %v6664_v60 = vadd.f32 %v8939_v21, %v12248_v28  ;;  %v6100_v21 = vadd.f32 %v8941_v31, %v12242_v17 }
 0x43d   :  { %v7588_v50 = vmin.f32 %v15406_v37, %v13077_v10  ;;  %v15418_v10 = vld [vmem:[#allocation15_spill] sm:$0xff]  ;;  %v15425_v13 = vmin.f32 %v15423_v46, %v15424_v38  ;;  %v15427_v27 = vld [vmem:[#allocation8_spill] sm:$0xff]  ;;  %7561 = vmin.xlane.f32.xlu0 %v7560_v48 }
 0x43e   :  { %v7584_v63 = vmin.f32 %v15409_v56, %v13008_v42  ;;  %v15419_v49 = vmin.f32 %v15417_v8, %v15418_v10  ;;  %v15421_v42 = vld [vmem:[#allocation86_spill] sm:$0xff]  ;;  %v6097_v56 = vadd.f32 %v8938_v35, %v12242_v17  ;;  %v15430_v8 = vld [vmem:[#allocation144_spill] sm:$0xff]  ;;  %v15438_v35 = vld [vmem:[#allocation37_spill] sm:$0xff] }
 0x43f   :  { %v15422_v6 = vmin.f32 %v15420_v51, %v15421_v42  ;;  %v7282_v20 = vmin.f32 %v15425_v13, %v13147_v26  ;;  %v15432_v10 = vld [vmem:[#allocation50_spill] sm:$0xff]  ;;  %v15434_v42 = vld [vmem:[#allocation83_spill] sm:$0xff] }
 0x440   :  { %v7596_v55 = vmin.f32 %v15419_v49, %v13120_v47  ;;  %v15429_v47 = vmin.f32 %v15427_v27, %v15428_v19  ;;  %v15435_v26 = vld [vmem:[#allocation46_spill] sm:$0xff]  ;;  %v15439_v13 = vld [vmem:[#allocation71_spill] sm:$0xff]  ;;  %v15443_v19 = vld [vmem:[#allocation56_spill] sm:$0xff] }
 0x441   :  { %v7592_v37 = vmin.f32 %v15422_v6, %v13054_v3  ;;  %v15431_v3 = vld [vmem:[#allocation26_spill] sm:$0xff]  ;;  %v15436_v6 = vld [vmem:[#allocation160_spill] sm:$0xff]  ;;  %v15440_v24 = vmin.f32 %v15438_v35, %v15439_v13  ;;  %v15453_v9 = vld [vmem:[#allocation75_spill] sm:$0xff]  ;;  %7247 = vmin.xlane.f32.xlu0 %v7246_v39 }
 0x442   :  { %v7278_v23 = vmin.f32 %v15429_v47, %v15426_v5  ;;  %v15433_v49 = vmin.f32 %v15431_v3, %v15432_v10  ;;  %v15437_v46 = vmin.f32 %v15435_v26, %v15436_v6  ;;  %v8940_v5 = vadd.f32 %v13208_v1, %v15441_v45  ;;  %v15442_v27 = vld [vmem:[#allocation18_spill] sm:$0xff]  ;;  %v15444_v47 = vld [vmem:[#allocation20_spill] sm:$0xff]  ;;  %v15454_v35 = vld [vmem:[#allocation111_spill] sm:$0xff] }
 0x443   :  { %v7290_v59 = vmin.f32 %v15440_v24, %v13186_v18  ;;  %v15446_v10 = vld [vmem:[#allocation70_spill] sm:$0xff]  ;;  %v6670_v6 = vadd.f32 %v8941_v31, %v12248_v28  ;;  %v15449_v18 = vld [vmem:[#allocation169_spill] sm:$0xff]  ;;  %v15455_v13 = vmin.f32 %v15453_v9, %v15454_v35  ;;  %v15461_v31 = vld [vmem:[#allocation67_spill] sm:$0xff] }
 0x444   :  { %v7604_v51 = vmin.f32 %v15433_v49, %v15430_v8  ;;  %v7600_v38 = vmin.f32 %v15437_v46, %v15434_v42  ;;  %v15445_v8 = vmin.f32 %v15443_v19, %v15444_v47  ;;  %v15447_v49 = vld [vmem:[#allocation79_spill] sm:$0xff]  ;;  %v15450_v24 = vld [vmem:[#allocation41_spill] sm:$0xff]  ;;  %v15457_v19 = vld [vmem:[#allocation120_spill] sm:$0xff] }
 0x445   :  { %v15448_v42 = vmin.f32 %v15446_v10, %v15447_v49  ;;  %v15451_v46 = vld [vmem:[#allocation27_spill] sm:$0xff]  ;;  %v13384_v2 = vmin.f32 %v15455_v13, %v13219_v36  ;;  %v15458_v47 = vld [vmem:[#allocation74_spill] sm:$0xff]  ;;  %v15468_v35 = vld [vmem:[#allocation36_spill] sm:$0xff]  ;;  %7569 = vmin.xlane.f32.xlu0 %v7568_v11 }
 0x446   :  { %v7286_v3 = vmin.f32 %v15445_v8, %v15442_v27  ;;  %v15452_v1 = vmin.f32 %v15450_v24, %v15451_v46  ;;  %v15456_v27 = vld [vmem:[#allocation149_spill] sm:$0xff]  ;;  %v15459_v8 = vmin.f32 %v15457_v19, %v15458_v47  ;;  %v15466_v36 = vld [vmem:[#allocation170_spill] sm:$0xff]  ;;  %v6954_v39 = vld [vmem:[%s13990_s1 + $0x8] sm:$0xff] }
 0x447   :  { %v7612_v26 = vmin.f32 %v15448_v42, %v13196_v22  ;;  %v15460_v22 = vld [vmem:[#allocation65_spill] sm:$0xff]  ;;  %vm7644_vm1 = vcmp.gt.f32.partialorder %v6954_v39, 0.0 }
 0x448   :  { %v7608_v45 = vmin.f32 %v15452_v1, %v15449_v18  ;;  %v7294_v10 = vmin.f32 %v15459_v8, %v15456_v27  ;;  %v15462_v7 = vmin.f32 %v15460_v22, %v15461_v31  ;;  %v15463_v42 = vld [vmem:[#allocation61_spill] sm:$0xff]  ;;  %v15464_v18 = vld [vmem:[#allocation132_spill] sm:$0xff]  ;;  %v15467_v1 = vmin.f32 %v13127_v54, %v15466_v36 }
 0x449   :  { %v15465_v24 = vmin.f32 %v15463_v42, %v15464_v18  ;;  %v15469_v13 = vld [vmem:[#allocation145_spill] sm:$0xff]  ;;  %v6103_v54 = vadd.f32 %v8940_v5, %v12242_v17  ;;  %v15479_v36 = vmin.f32 %v13205_v30, %v13231_v44  ;;  %v15487_v44 = vld [vmem:[#allocation64_spill] sm:$0xff]  ;;  %7255 = vmin.xlane.f32.xlu0 %v7254_v34 }
 0x44a   :  { %v13394_v49 = vmin.f32 %v15462_v7, %v13227_v14  ;;  %v13405_v9 = vmin.f32 %v15467_v1, %v6094_v52  ;;  %v15470_v27 = vld [vmem:[#allocation17_spill] sm:$0xff]  ;;  %v6673_v52 = vadd.f32 %v8940_v5, %v12248_v28  ;;  %7565 = vmin.xlane.f32.xlu1 %v15487_v44  ;;  %v6955_v34 = vld [vmem:[%s13990_s1 + $0x10] sm:$0xff] }
 0x44b   :  { %v13400_v46 = vmin.f32 %v15465_v24, %v13183_v53  ;;  %v15471_v19 = vmin.f32 %v15469_v13, %v15470_v27  ;;  %v15472_v8 = vld [vmem:[#allocation25_spill] sm:$0xff]  ;;  %v15477_v53 = vld [vmem:[#allocation19_spill] sm:$0xff]  ;;  %v13429_v1 = vmin.f32 %v15479_v36, %v6100_v21  ;;  %v15481_v13 = vld [vmem:[#allocation92_spill] sm:$0xff]  ;;  %v13446_v5 = vmin.f32 %v7317_v62, %v6103_v54 }
 0x44c   :  { %v15473_v14 = vld [vmem:[#allocation121_spill] sm:$0xff]  ;;  %v13448_v30 = vmin.f32 %v7639_v12, %v6673_v52  ;;  %v6953_v62 = vld [vmem:[%s13990_s1] sm:$0xff]  ;;  %v6958_v12 = vld [vmem:[%s13990_s1 + $0x28] sm:$0xff]  ;;  %vm7645_vm7 = vcmp.gt.f32.partialorder %v6955_v34, 0.0 }
 0x44d   :  { %v13411_v47 = vmin.f32 %v15471_v19, %v15468_v35  ;;  %v15474_v22 = vmin.f32 %v15472_v8, %v15473_v14  ;;  %v15475_v7 = vld [vmem:[#allocation45_spill] sm:$0xff]  ;;  %v15480_v35 = vld [vmem:[#allocation59_spill] sm:$0xff]  ;;  %v15483_v19 = vmin.f32 %v13215_v4, %v13234_v0  ;;  %7577 = vmin.xlane.f32.xlu0 %v7576_v25  ;;  %vm7643_vm2 = vcmp.gt.f32.partialorder %v6953_v62, 0.0  ;;  %v6959_v25 = vld [vmem:[%s13990_s1 + $0x30] sm:$0xff] }
 0x44e   :  { %v15476_v42 = vld [vmem:[#allocation165_spill] sm:$0xff]  ;;  %7251 = vmin.xlane.f32.xlu1 %v7250_v16  ;;  %vm7648_vm3 = vcmp.gt.f32.partialorder %v6958_v12, 0.0  ;;  %vm7649_vm8 = vcmp.gt.f32.partialorder %v6959_v25, 0.0  ;;  %v6963_v12 = vld [vmem:[%s13990_s1 + $0x50] sm:$0xff] }
 0x44f   :  { %v13416_v31 = vmin.f32 %v15474_v22, %v6664_v60  ;;  %v15478_v18 = vmin.f32 %v15476_v42, %v15477_v53  ;;  %v15482_v60 = vmin.f32 %v15480_v35, %v15481_v13  ;;  %v13439_v8 = vmin.f32 %v15483_v19, %v6670_v6  ;;  %v15484_v17 = vld [vmem:[#allocation69_spill] sm:$0xff] }
 0x450   :  { %v15485_v14 = vld [vmem:[#allocation173_spill] sm:$0xff]  ;;  %vm7653_vm13 = vcmp.gt.f32.partialorder %v6963_v12, 0.0 }
 0x451   :  { %v13422_v24 = vmin.f32 %v15478_v18, %v15475_v7  ;;  %v13434_v27 = vmin.f32 %v15482_v60, %v6097_v56  ;;  %v15486_v28 = vmin.f32 %v15484_v17, %v15485_v14  ;;  %7263 = vmin.xlane.f32.xlu0 %v7262_v32  ;;  %v6960_v42 = vld [vmem:[%s13990_s1 + $0x38] sm:$0xff] }
 0x452   :  { %7573 = vmin.xlane.f32.xlu1 %v7572_v61  ;;  %vm7650_vm11 = vcmp.gt.f32.partialorder %v6960_v42, 0.0 }
 0x453   :  { %v13444_v40 = vmin.f32 %v15486_v28, %v6667_v43 }
 0x455   :  { %7585 = vmin.xlane.f32.xlu0 %v7584_v63 }
 0x456   :  { %7259 = vmin.xlane.f32.xlu1 %v7258_v58 }
 0x459   :  { %7271 = vmin.xlane.f32.xlu0 %v7270_v57 }
 0x45a   :  { %7581 = vmin.xlane.f32.xlu1 %v7580_v33  ;;  %v7466_v4 = vpop.xlane.xlu0 %7465 }
 0x45b   :  { %v7144_v0 = vpop.xlane.xlu1 %7143 }
 0x45c   :  { %v7690_v33 = vsel %vm7644_vm1, %v7144_v0, 0.0 }
 0x45d   :  { %7593 = vmin.xlane.f32.xlu0 %v7592_v37  ;;  %v7837_v37 = vsel %vm7644_vm1, %v7466_v4, 0.0 }
 0x45e   :  { %7267 = vmin.xlane.f32.xlu1 %v7266_v41  ;;  %v7140_v48 = vpop.xlane.xlu0 %7139 }
 0x45f   :  { %v7462_v16 = vpop.xlane.xlu1 %7461 }
 0x460   :  { %v7836_v41 = vsel %vm7643_vm2, %v7462_v16, 0.0 }
 0x461   :  { %7279 = vmin.xlane.f32.xlu0 %v7278_v23 }
 0x462   :  { %7589 = vmin.xlane.f32.xlu1 %v7588_v50 }
 0x463   :  { %v13451_v29 = vpop.xlane.xlu0 %7151 }
 0x464   :  { %v7148_v61 = vpop.xlane.xlu1 %7147 }
 0x465   :  { %7601 = vmin.xlane.f32.xlu0 %v7600_v38  ;;  %v7691_v43 = vsel %vm7645_vm7, %v7148_v61, 0.0  ;;  %v6956_v38 = vld [vmem:[%s13990_s1 + $0x18] sm:$0xff] }
 0x466   :  { %7275 = vmin.xlane.f32.xlu1 %v7274_v15  ;;  %v13478_v15 = vsel %vm7735_vm4, %v7690_v33, -inf  ;;  %vm7646_vm9 = vcmp.gt.f32.partialorder %v6956_v38, 0.0 }
 0x467   :  { %v13462_v11 = vpop.xlane.xlu0 %7473  ;;  %v7692_v60 = vsel %vm7646_vm9, %v13451_v29, 0.0 }
 0x468   :  { %v7470_v58 = vpop.xlane.xlu1 %7469  ;;  %v7739_v0 = vsel %vm7735_vm4, %v7692_v60, -inf  ;;  %v7839_v29 = vsel %vm7646_vm9, %v13462_v11, 0.0 }
 0x469   :  { %7287 = vmin.xlane.f32.xlu0 %v7286_v3  ;;  %v7838_v53 = vsel %vm7645_vm7, %v7470_v58, 0.0  ;;  %v7886_v58 = vsel %vm7882_vm6, %v7839_v29, -inf }
 0x46a   :  { %7597 = vmin.xlane.f32.xlu1 %v7596_v55  ;;  %v7885_v19 = vsel %vm7882_vm6, %v7838_v53, -inf }
 0x46c   :  { %v7160_v32 = vpop.xlane.xlu0 %7159 }
 0x46d   :  { %7609 = vmin.xlane.f32.xlu0 %v7608_v45  ;;  %v7478_v50 = vpop.xlane.xlu1 %7477  ;;  %v7694_v63 = vsel %vm7648_vm3, %v7160_v32, 0.0 }
 0x46e   :  { %7283 = vmin.xlane.f32.xlu1 %v7282_v20  ;;  %v13482_v55 = vsel %vm7735_vm4, %v7694_v63, -inf  ;;  %v13486_v20 = vsel %vm7882_vm6, %v7836_v41, -inf }
 0x46f   :  { %v7743_v56 = vmax.f32 %v13478_v15, %v13482_v55 }
 0x471   :  { %7295 = vmin.xlane.f32.xlu0 %v7294_v10  ;;  %v6961_v10 = vld [vmem:[%s13990_s1 + $0x40] sm:$0xff] }
 0x472   :  { %7605 = vmin.xlane.f32.xlu1 %v7604_v51  ;;  %v7482_v51 = vpop.xlane.xlu0 %7481  ;;  %v7164_v21 = vpop.xlane.xlu1 %7163  ;;  %vm7651_vm10 = vcmp.gt.f32.partialorder %v6961_v10, 0.0 }
 0x473   :  { %v7841_v3 = vsel %vm7648_vm3, %v7482_v51, 0.0  ;;  %v7695_v6 = vsel %vm7649_vm8, %v7164_v21, 0.0 }
 0x474   :  { %v13507_v45 = vsel %vm7882_vm6, %v7841_v3, -inf  ;;  %v7744_v22 = vsel %vm7735_vm4, %v7695_v6, -inf }
 0x475   :  { %7617 = vmin.xlane.f32.xlu0 %v13400_v46  ;;  %v7738_v46 = vsel %vm7735_vm4, %v7691_v43, -inf  ;;  %v6965_v43 = vld [vmem:[%s13990_s1 + $0x60] sm:$0xff] }
 0x476   :  { %7291 = vmin.xlane.f32.xlu1 %v7290_v59  ;;  %v6957_v59 = vld [vmem:[%s13990_s1 + $0x20] sm:$0xff]  ;;  %v7745_v18 = vmax.f32 %v7738_v46, %v7744_v22  ;;  %v7156_v54 = vpop.xlane.xlu0 %7155  ;;  %v7486_v52 = vpop.xlane.xlu1 %7485  ;;  %vm7655_vm15 = vcmp.gt.f32.partialorder %v6965_v43, 0.0 }
 0x477   :  { %vm7647_vm5 = vcmp.gt.f32.partialorder %v6957_v59, 0.0  ;;  %v7842_v13 = vsel %vm7649_vm8, %v7486_v52, 0.0 }
 0x478   :  { %v7840_v57 = vsel %vm7647_vm5, %v7478_v50, 0.0  ;;  %v7693_v36 = vsel %vm7647_vm5, %v7156_v54, 0.0  ;;  %v7891_v17 = vsel %vm7882_vm6, %v7842_v13, -inf }
 0x479   :  { %7303 = vmin.xlane.f32.xlu0 %v13411_v47  ;;  %v7740_v47 = vsel %vm7735_vm4, %v7693_v36, -inf  ;;  %v7892_v14 = vmax.f32 %v7885_v19, %v7891_v17 }
 0x47a   :  { %7613 = vmin.xlane.f32.xlu1 %v7612_v26  ;;  %v13503_v26 = vsel %vm7882_vm6, %v7837_v37, -inf }
 0x47b   :  { %v7890_v7 = vmax.f32 %v13503_v26, %v13507_v45  ;;  %v7168_v28 = vpop.xlane.xlu0 %7167  ;;  %v6966_v26 = vld [vmem:[%s13990_s1 + $0x68] sm:$0xff] }
 0x47c   :  { %v7172_v44 = vpop.xlane.xlu1 %7171  ;;  %v7696_v4 = vsel %vm7650_vm11, %v7168_v28, 0.0  ;;  %vm7656_vm0 = vcmp.gt.f32.partialorder %v6966_v26, 0.0  ;;  %v6968_v28 = vld [vmem:[%s13990_s1 + $0x78] sm:$0xff] }
 0x47d   :  { %7625 = vmin.xlane.f32.xlu0 %v13422_v24  ;;  %v7746_v16 = vsel %vm7735_vm4, %v7696_v4, -inf }
 0x47e   :  { %7299 = vmin.xlane.f32.xlu1 %v13384_v2  ;;  %v13489_v2 = vsel %vm7882_vm6, %v7840_v57, -inf  ;;  %v7747_v61 = vmax.f32 %v7739_v0, %v7746_v16  ;;  %v6969_v0 = vld [vmem:[%s13990_s1 + $0x80] sm:$0xff] }
 0x47f   :  { %v7888_v23 = vmax.f32 %v13486_v20, %v13489_v2  ;;  %v7490_v62 = vpop.xlane.xlu0 %7489  ;;  %vm7659_vm3 = vcmp.gt.f32.partialorder %v6969_v0, 0.0 }
 0x480   :  { %v7494_v59 = vpop.xlane.xlu1 %7493  ;;  %v7843_v11 = vsel %vm7650_vm11, %v7490_v62, 0.0 }
 0x481   :  { %7311 = vmin.xlane.f32.xlu0 %v13434_v27  ;;  %v7844_v27 = vsel %vm7651_vm10, %v7494_v59, 0.0  ;;  %v7893_v34 = vsel %vm7882_vm6, %v7843_v11, -inf }
 0x482   :  { %7621 = vmin.xlane.f32.xlu1 %v13394_v49  ;;  %v7689_v49 = vsel %vm7643_vm2, %v7140_v48, 0.0  ;;  %v7697_v48 = vsel %vm7651_vm10, %v7172_v44, 0.0  ;;  %v7895_v33 = vsel %vm7882_vm6, %v7844_v27, -inf  ;;  %v7894_v25 = vmax.f32 %v7886_v58, %v7893_v34 }
 0x483   :  { %v7736_v35 = vsel %vm7735_vm4, %v7689_v49, -inf  ;;  %v7748_v39 = vsel %vm7735_vm4, %v7697_v48, -inf  ;;  %v7176_v41 = vpop.xlane.xlu0 %7175  ;;  %vm7658_vm2 = vcmp.gt.f32.partialorder %v6968_v28, 0.0 }
 0x484   :  { %v7180_v32 = vpop.xlane.xlu1 %7179 }
 0x485   :  { %7633 = vmin.xlane.f32.xlu0 %v13444_v40  ;;  %v7699_v63 = vsel %vm7653_vm13, %v7180_v32, 0.0 }
 0x486   :  { %7307 = vmin.xlane.f32.xlu1 %v13405_v9  ;;  %v7741_v9 = vmax.f32 %v7736_v35, %v7740_v47  ;;  %v7752_v37 = vsel %vm7735_vm4, %v7699_v63, -inf }
 0x487   :  { %v13572_v40 = vmax.f32 %v7745_v18, %v7752_v37  ;;  %v7498_v2 = vpop.xlane.xlu0 %7497 }
 0x488   :  { %v13544_v24 = vmax.f32 %v7741_v9, %v7748_v39 }
 0x489   :  { %7319 = vmin.xlane.f32.xlu0 %v13446_v5 }
 0x48a   :  { %7629 = vmin.xlane.f32.xlu1 %v13416_v31  ;;  %v6962_v31 = vld [vmem:[%s13990_s1 + $0x48] sm:$0xff] }
 0x48b   :  { %vm7652_vm12 = vcmp.gt.f32.partialorder %v6962_v31, 0.0 }
 0x48c   :  { %v7698_v50 = vsel %vm7652_vm12, %v7176_v41, 0.0  ;;  %v7845_v51 = vsel %vm7652_vm12, %v7498_v2, 0.0  ;;  %v7184_v21 = vpop.xlane.xlu0 %7183  ;;  %v6971_v41 = vld [vmem:[%s13990_s1 + $0x90] sm:$0xff] }
 0x48d   :  { %v7750_v57 = vsel %vm7735_vm4, %v7698_v50, -inf  ;;  %v7897_v55 = vsel %vm7882_vm6, %v7845_v51, -inf  ;;  %7641 = vmin.xlane.f32.xlu0 %v13448_v30  ;;  %vm7661_vm7 = vcmp.gt.f32.partialorder %v6971_v41, 0.0 }
 0x48e   :  { %7315 = vmin.xlane.f32.xlu1 %v13429_v1  ;;  %v13556_v1 = vmax.f32 %v7888_v23, %v7895_v33  ;;  %v13566_v20 = vmax.f32 %v7743_v56, %v7750_v57  ;;  %v7502_v23 = vpop.xlane.xlu1 %7501  ;;  %v13584_v56 = vmax.f32 %v7890_v7, %v7897_v55  ;;  %v6967_v7 = vld [vmem:[%s13990_s1 + $0x70] sm:$0xff]  ;;  %v6970_v33 = vld [vmem:[%s13990_s1 + $0x88] sm:$0xff] }
 0x48f   :  { %v7846_v15 = vsel %vm7653_vm13, %v7502_v23, 0.0  ;;  %vm7657_vm1 = vcmp.gt.f32.partialorder %v6967_v7, 0.0  ;;  %vm7660_vm5 = vcmp.gt.f32.partialorder %v6970_v33, 0.0 }
 0x490   :  { %v7899_v5 = vsel %vm7882_vm6, %v7846_v15, -inf  ;;  %v7506_v45 = vpop.xlane.xlu0 %7505 }
 0x491   :  { %v13587_v38 = vmax.f32 %v7892_v14, %v7899_v5  ;;  %v6972_v5 = vld [vmem:[%s13990_s1 + $0x98] sm:$0xff] }
 0x492   :  { %7637 = vmin.xlane.f32.xlu1 %v13439_v8  ;;  %v6964_v8 = vld [vmem:[%s13990_s1 + $0x58] sm:$0xff]  ;;  %v7188_v3 = vpop.xlane.xlu1 %7187  ;;  %vm7662_vm8 = vcmp.gt.f32.partialorder %v6972_v5, 0.0 }
 0x493   :  { %vm7654_vm14 = vcmp.gt.f32.partialorder %v6964_v8, 0.0  ;;  %v7701_v10 = vsel %vm7655_vm15, %v7188_v3, 0.0 }
 0x494   :  { %v7700_v6 = vsel %vm7654_vm14, %v7184_v21, 0.0  ;;  %v7756_v46 = vsel %vm7735_vm4, %v7701_v10, -inf  ;;  %v7847_v53 = vsel %vm7654_vm14, %v7506_v45, 0.0  ;;  %v7192_v13 = vpop.xlane.xlu0 %7191  ;;  %v6973_v21 = vld [vmem:[%s13990_s1 + $0xa0] sm:$0xff] }
 0x495   :  { %v7754_v49 = vsel %vm7735_vm4, %v7700_v6, -inf  ;;  %v7757_v30 = vmax.f32 %v13544_v24, %v7756_v46  ;;  %v7901_v54 = vsel %vm7882_vm6, %v7847_v53, -inf  ;;  %v7702_v60 = vsel %vm7656_vm0, %v7192_v13, 0.0  ;;  %v6975_v13 = vld [vmem:[%s13990_s1 + $0xb0] sm:$0xff] }
 0x496   :  { %v13592_v22 = vmax.f32 %v7747_v61, %v7754_v49  ;;  %v7510_v42 = vpop.xlane.xlu1 %7509  ;;  %v13604_v36 = vmax.f32 %v7894_v25, %v7901_v54  ;;  %v7758_v17 = vsel %vm7735_vm4, %v7702_v60, -inf  ;;  %vm7663_vm9 = vcmp.gt.f32.partialorder %v6973_v21, 0.0 }
 0x497   :  { %v7848_v18 = vsel %vm7655_vm15, %v7510_v42, 0.0  ;;  %v7759_v14 = vmax.f32 %v13566_v20, %v7758_v17  ;;  %vm7665_vm11 = vcmp.gt.f32.partialorder %v6975_v13, 0.0 }
 0x498   :  { %v7903_v52 = vsel %vm7882_vm6, %v7848_v18, -inf  ;;  %v7514_v4 = vpop.xlane.xlu0 %7513 }
 0x499   :  { %v7904_v35 = vmax.f32 %v13556_v1, %v7903_v52  ;;  %v7849_v16 = vsel %vm7656_vm0, %v7514_v4, 0.0  ;;  %v6974_v52 = vld [vmem:[%s13990_s1 + $0xa8] sm:$0xff] }
 0x49a   :  { %v7196_v47 = vpop.xlane.xlu1 %7195  ;;  %v7905_v39 = vsel %vm7882_vm6, %v7849_v16, -inf  ;;  %vm7664_vm10 = vcmp.gt.f32.partialorder %v6974_v52, 0.0 }
 0x49b   :  { %v7703_v19 = vsel %vm7657_vm1, %v7196_v47, 0.0  ;;  %v7906_v31 = vmax.f32 %v13584_v56, %v7905_v39 }
 0x49c   :  { %v7760_v9 = vsel %vm7735_vm4, %v7703_v19, -inf  ;;  %v7200_v62 = vpop.xlane.xlu0 %7199 }
 0x49d   :  { %v7761_v44 = vmax.f32 %v13572_v40, %v7760_v9  ;;  %v7704_v59 = vsel %vm7658_vm2, %v7200_v62, 0.0  ;;  %v6977_v62 = vld [vmem:[%s13990_s1 + $0xc0] sm:$0xff] }
 0x49e   :  { %v7518_v48 = vpop.xlane.xlu1 %7517  ;;  %v7762_v58 = vsel %vm7735_vm4, %v7704_v59, -inf  ;;  %vm7667_vm13 = vcmp.gt.f32.partialorder %v6977_v62, 0.0 }
 0x49f   :  { %v7850_v29 = vsel %vm7657_vm1, %v7518_v48, 0.0  ;;  %v7763_v34 = vmax.f32 %v13592_v22, %v7762_v58 }
 0x4a0   :  { %v7907_v61 = vsel %vm7882_vm6, %v7850_v29, -inf }
 0x4a1   :  { %v7908_v24 = vmax.f32 %v13587_v38, %v7907_v61  ;;  %v7522_v1 = vpop.xlane.xlu0 %7521  ;;  %v6976_v61 = vld [vmem:[%s13990_s1 + $0xb8] sm:$0xff] }
 0x4a2   :  { %v7204_v12 = vpop.xlane.xlu1 %7203  ;;  %v7851_v50 = vsel %vm7658_vm2, %v7522_v1, 0.0  ;;  %vm7666_vm12 = vcmp.gt.f32.partialorder %v6976_v61, 0.0 }
 0x4a3   :  { %v7705_v11 = vsel %vm7659_vm3, %v7204_v12, 0.0  ;;  %v7909_v57 = vsel %vm7882_vm6, %v7851_v50, -inf }
 0x4a4   :  { %v7764_v27 = vsel %vm7735_vm4, %v7705_v11, -inf  ;;  %v7910_v20 = vmax.f32 %v13604_v36, %v7909_v57 }
 0x4a5   :  { %v13630_v25 = vmax.f32 %v7757_v30, %v7764_v27  ;;  %v7208_v40 = vpop.xlane.xlu0 %7207 }
 0x4a6   :  { %v7526_v32 = vpop.xlane.xlu1 %7525  ;;  %v7706_v43 = vsel %vm7660_vm5, %v7208_v40, 0.0  ;;  %v6979_v40 = vld [vmem:[%s13990_s1 + $0xd0] sm:$0xff] }
 0x4a7   :  { %v7852_v63 = vsel %vm7659_vm3, %v7526_v32, 0.0  ;;  %v7766_v51 = vsel %vm7735_vm4, %v7706_v43, -inf  ;;  %vm7669_vm15 = vcmp.gt.f32.partialorder %v6979_v40, 0.0 }
 0x4a8   :  { %v7911_v37 = vsel %vm7882_vm6, %v7852_v63, -inf  ;;  %v13644_v55 = vmax.f32 %v7759_v14, %v7766_v51 }
 0x4a9   :  { %v13639_v8 = vmax.f32 %v7904_v35, %v7911_v37  ;;  %v6978_v37 = vld [vmem:[%s13990_s1 + $0xc8] sm:$0xff] }
 0x4aa   :  { %v7212_v2 = vpop.xlane.xlu1 %7211  ;;  %v7530_v38 = vpop.xlane.xlu0 %7529  ;;  %vm7668_vm14 = vcmp.gt.f32.partialorder %v6978_v37, 0.0  ;;  %v6986_v37 = vld [vmem:[%s13990_s1 + $0x108] sm:$0xff] }
 0x4ab   :  { %v7707_v23 = vsel %vm7661_vm7, %v7212_v2, 0.0  ;;  %v7853_v6 = vsel %vm7660_vm5, %v7530_v38, 0.0 }
 0x4ac   :  { %v7768_v15 = vsel %vm7735_vm4, %v7707_v23, -inf  ;;  %v7913_v49 = vsel %vm7882_vm6, %v7853_v6, -inf }
 0x4ad   :  { %v13649_v56 = vmax.f32 %v7761_v44, %v7768_v15  ;;  %v13657_v22 = vmax.f32 %v7906_v31, %v7913_v49 }
 0x4ae   :  { %v7534_v3 = vpop.xlane.xlu1 %7533  ;;  %v7216_v30 = vpop.xlane.xlu0 %7215 }
 0x4af   :  { %v7854_v10 = vsel %vm7661_vm7, %v7534_v3, 0.0  ;;  %v7708_v7 = vsel %vm7662_vm8, %v7216_v30, 0.0 }
 0x4b0   :  { %v7915_v46 = vsel %vm7882_vm6, %v7854_v10, -inf  ;;  %v7770_v53 = vsel %vm7735_vm4, %v7708_v7, -inf }
 0x4b1   :  { %v13659_v26 = vmax.f32 %v7908_v24, %v7915_v46  ;;  %v13664_v54 = vmax.f32 %v7763_v34, %v7770_v53  ;;  %v6980_v46 = vld [vmem:[%s13990_s1 + $0xd8] sm:$0xff] }
 0x4b2   :  { %v7220_v45 = vpop.xlane.xlu1 %7219  ;;  %v7538_v35 = vpop.xlane.xlu0 %7537  ;;  %vm7670_vm0 = vcmp.gt.f32.partialorder %v6980_v46, 0.0  ;;  %v13820_v46 = vld [vmem:[%s13990_s1 + $0x150] sm:$0xff] }
 0x4b3   :  { %v7709_v42 = vsel %vm7663_vm9, %v7220_v45, 0.0  ;;  %v7855_v60 = vsel %vm7662_vm8, %v7538_v35, 0.0 }
 0x4b4   :  { %v7772_v18 = vsel %vm7735_vm4, %v7709_v42, -inf  ;;  %v7917_v17 = vsel %vm7882_vm6, %v7855_v60, -inf }
 0x4b5   :  { %v7773_v36 = vmax.f32 %v13630_v25, %v7772_v18  ;;  %v13676_v14 = vmax.f32 %v7910_v20, %v7917_v17 }
 0x4b6   :  { %v7542_v47 = vpop.xlane.xlu1 %7541  ;;  %v7224_v44 = vpop.xlane.xlu0 %7223 }
 0x4b7   :  { %v7856_v19 = vsel %vm7663_vm9, %v7542_v47, 0.0  ;;  %v7710_v0 = vsel %vm7664_vm10, %v7224_v44, 0.0  ;;  %vm7676_vm9 = vcmp.gt.f32.partialorder %v6986_v37, 0.0 }
 0x4b8   :  { %v7919_v9 = vsel %vm7882_vm6, %v7856_v19, -inf  ;;  %v7774_v16 = vsel %vm7735_vm4, %v7710_v0, -inf }
 0x4b9   :  { %v7920_v28 = vmax.f32 %v13639_v8, %v7919_v9  ;;  %v7775_v39 = vmax.f32 %v13644_v55, %v7774_v16 }
 0x4ba   :  { %v7228_v4 = vpop.xlane.xlu1 %7227  ;;  %v7546_v24 = vpop.xlane.xlu0 %7545 }
 0x4bb   :  { %v7711_v48 = vsel %vm7665_vm11, %v7228_v4, 0.0  ;;  %v7857_v59 = vsel %vm7664_vm10, %v7546_v24, 0.0 }
 0x4bc   :  { %v7776_v29 = vsel %vm7735_vm4, %v7711_v48, -inf  ;;  %v7921_v58 = vsel %vm7882_vm6, %v7857_v59, -inf }
 0x4bd   :  { %v7777_v31 = vmax.f32 %v13649_v56, %v7776_v29  ;;  %v7922_v34 = vmax.f32 %v13657_v22, %v7921_v58 }
 0x4be   :  { %v7550_v12 = vpop.xlane.xlu1 %7549  ;;  %v7232_v25 = vpop.xlane.xlu0 %7231 }
 0x4bf   :  { %v7858_v11 = vsel %vm7665_vm11, %v7550_v12, 0.0  ;;  %v7712_v41 = vsel %vm7666_vm12, %v7232_v25, 0.0  ;;  %v6982_v25 = vld [vmem:[%s13990_s1 + $0xe8] sm:$0xff] }
 0x4c0   :  { %v7923_v27 = vsel %vm7882_vm6, %v7858_v11, -inf  ;;  %v7778_v50 = vsel %vm7735_vm4, %v7712_v41, -inf  ;;  %vm7672_vm2 = vcmp.gt.f32.partialorder %v6982_v25, 0.0 }
 0x4c1   :  { %v7924_v33 = vmax.f32 %v13659_v26, %v7923_v27  ;;  %v7779_v57 = vmax.f32 %v13664_v54, %v7778_v50  ;;  %v6984_v50 = vld [vmem:[%s13990_s1 + $0xf8] sm:$0xff] }
 0x4c2   :  { %v7236_v1 = vpop.xlane.xlu1 %7235  ;;  %v7554_v8 = vpop.xlane.xlu0 %7553  ;;  %vm7674_vm7 = vcmp.gt.f32.partialorder %v6984_v50, 0.0 }
 0x4c3   :  { %v7713_v32 = vsel %vm7667_vm13, %v7236_v1, 0.0  ;;  %v7859_v43 = vsel %vm7666_vm12, %v7554_v8, 0.0  ;;  %v6983_v1 = vld [vmem:[%s13990_s1 + $0xf0] sm:$0xff]  ;;  %v13786_v8 = vld [vmem:[%s13990_s1 + $0x120] sm:$0xff] }
 0x4c4   :  { %v7780_v63 = vsel %vm7735_vm4, %v7713_v32, -inf  ;;  %v7925_v51 = vsel %vm7882_vm6, %v7859_v43, -inf  ;;  %v6985_v32 = vld [vmem:[%s13990_s1 + $0x100] sm:$0xff]  ;;  %vm7673_vm3 = vcmp.gt.f32.partialorder %v6983_v1, 0.0  ;;  %v13791_v43 = vld [vmem:[%s13990_s1 + $0x118] sm:$0xff]  ;;  %vm7679_vm10 = vcmp.gt.f32.partialorder %v13786_v8, 0.0 }
 0x4c5   :  { %v13702_v20 = vmax.f32 %v7773_v36, %v7780_v63  ;;  %v7926_v55 = vmax.f32 %v13676_v14, %v7925_v51  ;;  %vm7675_vm5 = vcmp.gt.f32.partialorder %v6985_v32, 0.0  ;;  %v13797_v51 = vld [vmem:[%s13990_s1 + $0x130] sm:$0xff]  ;;  %vm7678_vm11 = vcmp.gt.f32.partialorder %v13791_v43, 0.0 }
 0x4c6   :  { %v7558_v2 = vpop.xlane.xlu1 %7557  ;;  %v7240_v56 = vpop.xlane.xlu0 %7239  ;;  %vm7681_vm12 = vcmp.gt.f32.partialorder %v13797_v51, 0.0 }
 0x4c7   :  { %v7860_v23 = vsel %vm7667_vm13, %v7558_v2, 0.0  ;;  %v7714_v21 = vsel %vm7668_vm14, %v7240_v56, 0.0 }
 0x4c8   :  { %v7927_v15 = vsel %vm7882_vm6, %v7860_v23, -inf  ;;  %v7782_v6 = vsel %vm7735_vm4, %v7714_v21, -inf }
 0x4c9   :  { %v13711_v5 = vmax.f32 %v7920_v28, %v7927_v15  ;;  %v13716_v49 = vmax.f32 %v7775_v39, %v7782_v6 }
 0x4ca   :  { %v7244_v38 = vpop.xlane.xlu1 %7243  ;;  %v7562_v26 = vpop.xlane.xlu0 %7561 }
 0x4cb   :  { %v7715_v3 = vsel %vm7669_vm15, %v7244_v38, 0.0  ;;  %v7861_v45 = vsel %vm7668_vm14, %v7562_v26, 0.0  ;;  %v13806_v38 = vld [vmem:[%s13990_s1 + $0x138] sm:$0xff] }
 0x4cc   :  { %v7784_v10 = vsel %vm7735_vm4, %v7715_v3, -inf  ;;  %v7929_v42 = vsel %vm7882_vm6, %v7861_v45, -inf  ;;  %vm7682_vm13 = vcmp.gt.f32.partialorder %v13806_v38, 0.0 }
 0x4cd   :  { %v13721_v22 = vmax.f32 %v7777_v31, %v7784_v10  ;;  %v13726_v18 = vmax.f32 %v7922_v34, %v7929_v42  ;;  %v6981_v34 = vld [vmem:[%s13990_s1 + $0xe0] sm:$0xff]  ;;  %v13815_v10 = vld [vmem:[%s13990_s1 + $0x128] sm:$0xff]  ;;  %v13834_v42 = vld [vmem:[%s13990_s1 + $0x158] sm:$0xff] }
 0x4ce   :  { %v7248_v52 = vpop.xlane.xlu0 %7247  ;;  %vm7671_vm1 = vcmp.gt.f32.partialorder %v6981_v34, 0.0  ;;  %vm7680_vm14 = vcmp.gt.f32.partialorder %v13815_v10, 0.0 }
 0x4cf   :  { %v7716_v35 = vsel %vm7670_vm0, %v7248_v52, 0.0 }
 0x4d0   :  { %v7786_v13 = vsel %vm7735_vm4, %v7716_v35, -inf }
 0x4d1   :  { %v13731_v47 = vmax.f32 %v7779_v57, %v7786_v13  ;;  %v6987_v57 = vld [vmem:[%s13990_s1 + $0x110] sm:$0xff] }
 0x4d2   :  { %v7570_v60 = vpop.xlane.xlu0 %7569  ;;  %vm7677_vm8 = vcmp.gt.f32.partialorder %v6987_v57, 0.0 }
 0x4d3   :  { %v7863_v17 = vsel %vm7670_vm0, %v7570_v60, 0.0 }
 0x4d4   :  { %v7933_v9 = vsel %vm7882_vm6, %v7863_v17, -inf }
 0x4d5   :  { %v13734_v14 = vmax.f32 %v7926_v55, %v7933_v9  ;;  %v13850_v9 = vld [vmem:[%s13990_s1 + $0x148] sm:$0xff] }
 0x4d6   :  { %v7256_v28 = vpop.xlane.xlu0 %7255 }
 0x4d7   :  { %v7566_v30 = vpop.xlane.xlu1 %7565  ;;  %v7718_v23 = vsel %vm7672_vm2, %v7256_v28, 0.0 }
 0x4d8   :  { %v7862_v7 = vsel %vm7669_vm15, %v7566_v30, 0.0  ;;  %v7790_v26 = vsel %vm7735_vm4, %v7718_v23, -inf  ;;  %vm7685_vm15 = vcmp.gt.f32.partialorder %v13820_v46, 0.0 }
 0x4d9   :  { %v7931_v53 = vsel %vm7882_vm6, %v7862_v7, -inf  ;;  %v13829_v7 = vld [vmem:[%s13990_s1 + $0x140] sm:$0xff]  ;;  %v7791_v28 = vmax.f32 %v13716_v49, %v7790_v26 }
 0x4da   :  { %v13728_v54 = vmax.f32 %v7924_v33, %v7931_v53  ;;  %v7578_v4 = vpop.xlane.xlu0 %7577  ;;  %vm7683_vm0 = vcmp.gt.f32.partialorder %v13829_v7, 0.0 }
 0x4db   :  { %v7252_v36 = vpop.xlane.xlu1 %7251  ;;  %v7865_v6 = vsel %vm7672_vm2, %v7578_v4, 0.0  ;;  %vm7684_vm2 = vcmp.gt.f32.partialorder %v13850_v9, 0.0 }
 0x4dc   :  { %v7717_v40 = vsel %vm7671_vm1, %v7252_v36, 0.0 }
 0x4dd   :  { %v7788_v21 = vsel %vm7735_vm4, %v7717_v40, -inf }
 0x4de   :  { %v7264_v48 = vpop.xlane.xlu0 %7263  ;;  %v7789_v13 = vmax.f32 %v13702_v20, %v7788_v21 }
 0x4df   :  { %v7574_v19 = vpop.xlane.xlu1 %7573  ;;  %v7720_v45 = vsel %vm7674_vm7, %v7264_v48, 0.0 }
 0x4e0   :  { %v7864_v2 = vsel %vm7671_vm1, %v7574_v19, 0.0  ;;  %v7937_v19 = vsel %vm7882_vm6, %v7865_v6, -inf  ;;  %v7794_v20 = vsel %vm7735_vm4, %v7720_v45, -inf  ;;  %vm7686_vm1 = vcmp.gt.f32.partialorder %v13834_v42, 0.0 }
 0x4e1   :  { %v7935_v3 = vsel %vm7882_vm6, %v7864_v2, -inf  ;;  %v7795_v1 = vmax.f32 %v13731_v47, %v7794_v20 }
 0x4e2   :  { %v7586_v29 = vpop.xlane.xlu0 %7585  ;;  %v7936_v60 = vmax.f32 %v13711_v5, %v7935_v3 }
 0x4e3   :  { %v7260_v44 = vpop.xlane.xlu1 %7259  ;;  %v7867_v36 = vsel %vm7674_vm7, %v7586_v29, 0.0  ;;  %v7938_v29 = vmax.f32 %v13726_v18, %v7937_v19 }
 0x4e4   :  { %v7719_v55 = vsel %vm7673_vm3, %v7260_v44, 0.0  ;;  %v7941_v48 = vsel %vm7882_vm6, %v7867_v36, -inf }
 0x4e5   :  { %v7792_v53 = vsel %vm7735_vm4, %v7719_v55, -inf }
 0x4e6   :  { %v13738_v61 = vpop.xlane.xlu0 %7271  ;;  %v7793_v4 = vmax.f32 %v13721_v22, %v7792_v53 }
 0x4e7   :  { %v7582_v0 = vpop.xlane.xlu1 %7581  ;;  %v7722_v49 = vsel %vm7676_vm9, %v13738_v61, 0.0 }
 0x4e8   :  { %v7866_v30 = vsel %vm7673_vm3, %v7582_v0, 0.0 }
 0x4e9   :  { %v7939_v44 = vsel %vm7882_vm6, %v7866_v30, -inf }
 0x4ea   :  { %v13742_v24 = vpop.xlane.xlu0 %7593  ;;  %v7940_v61 = vmax.f32 %v13728_v54, %v7939_v44 }
 0x4eb   :  { %v7268_v16 = vpop.xlane.xlu1 %7267  ;;  %v7869_v34 = vsel %vm7676_vm9, %v13742_v24, 0.0  ;;  %v7798_v24 = vsel %vm7735_vm4, %v7722_v49, -inf }
 0x4ec   :  { %v7721_v52 = vsel %vm7675_vm5, %v7268_v16, 0.0  ;;  %v13867_v16 = vld [vmem:[%s13990_s1 + $0x160] sm:$0xff]  ;;  %v7945_v37 = vsel %vm7882_vm6, %v7869_v34, -inf  ;;  %v7799_v21 = vmax.f32 %v7791_v28, %v7798_v24 }
 0x4ed   :  { %v7796_v0 = vsel %vm7735_vm4, %v7721_v52, -inf  ;;  %vm7687_vm3 = vcmp.gt.f32.partialorder %v13867_v16, 0.0  ;;  %v13916_v45 = vmax.f32 %v7938_v29, %v7945_v37 }
 0x4ee   :  { %v13746_v12 = vpop.xlane.xlu0 %7279  ;;  %v13883_v50 = vmax.f32 %v7789_v13, %v7796_v0 }
 0x4ef   :  { %v13736_v39 = vpop.xlane.xlu1 %7589  ;;  %v7724_v18 = vsel %vm7678_vm11, %v13746_v12, 0.0 }
 0x4f0   :  { %v7868_v5 = vsel %vm7675_vm5, %v13736_v39, 0.0  ;;  %v7802_v2 = vsel %vm7735_vm4, %v7724_v18, -inf }
 0x4f1   :  { %v7943_v32 = vsel %vm7882_vm6, %v7868_v5, -inf  ;;  %v7803_v43 = vmax.f32 %v7795_v1, %v7802_v2 }
 0x4f2   :  { %v13750_v11 = vpop.xlane.xlu0 %7601  ;;  %v13901_v40 = vmax.f32 %v7936_v60, %v7943_v32 }
 0x4f3   :  { %v13740_v31 = vpop.xlane.xlu1 %7275  ;;  %v7871_v23 = vsel %vm7678_vm11, %v13750_v11, 0.0 }
 0x4f4   :  { %v7723_v39 = vsel %vm7677_vm8, %v13740_v31, 0.0  ;;  %v7949_v52 = vsel %vm7882_vm6, %v7871_v23, -inf }
 0x4f5   :  { %v7800_v54 = vsel %vm7735_vm4, %v7723_v39, -inf }
 0x4f6   :  { %v13754_v27 = vpop.xlane.xlu0 %7287  ;;  %v7801_v30 = vmax.f32 %v7793_v4, %v7800_v54 }
 0x4f7   :  { %v13744_v62 = vpop.xlane.xlu1 %7597  ;;  %v7726_v36 = vsel %vm7680_vm14, %v13754_v27, 0.0 }
 0x4f8   :  { %v7870_v22 = vsel %vm7677_vm8, %v13744_v62, 0.0  ;;  %v7942_v62 = vmax.f32 %v13734_v14, %v7941_v48  ;;  %v13899_v14 = vld [vmem:[%s13990_s1 + $0x168] sm:$0xff]  ;;  %v7806_v48 = vsel %vm7735_vm4, %v7726_v36, -inf  ;;  %s9575_s1 = smov [#allocation4]  }
 0x4f9   :  { %v7947_v47 = vsel %vm7882_vm6, %v7870_v22, -inf  ;;  %vm7688_vm5 = vcmp.gt.f32.partialorder %v13899_v14, 0.0  ;;  %v7807_v18 = vmax.f32 %v7799_v21, %v7806_v48  ;;  %s7992_s19 = sshll.u32 %s9575_s1, 4  ;;  %s7993_s19 = int_to_ptr.vmem [resolvable:$true] %s7992_s19 }
 0x4fa   :  { %v13767_v41 = vpop.xlane.xlu0 %7609  ;;  %v7950_v5 = vmax.f32 %v7942_v62, %v7949_v52  ;;  %s9549_s23 = scalar_lea.vmem %s7993_s19, 128  ;;  %p9554_p1 = scmp.lt.s32.totalorder %s7993_s19, %s7993_s19 }
 0x4fb   :  { %v13748_v59 = vpop.xlane.xlu1 %7283  ;;  %v7873_v39 = vsel %vm7680_vm14, %v13767_v41, 0.0  ;;  %p9550_p0 = scmp.ne.s32.totalorder %s7993_s19, %s9549_s23  ;;  %p9555_p2 = scmp.lt.s32.totalorder %s9549_s23, %s9549_s23 }
 0x4fd   :  { %p9556_p3 = por %p9555_p2, %p9554_p1 }
 0x4fe   :  { %v7296_v15 = vpop.xlane.xlu0 %7295 }
 0x4ff   :  { %v13752_v58 = vpop.xlane.xlu1 %7605  ;;  %v7728_v12 = vsel %vm7682_vm13, %v7296_v15, 0.0  ;;  %p9557_p4 = pnand %p9556_p3, %p9550_p0 }
 0x500   :  { %v7810_v53 = vsel %vm7735_vm4, %v7728_v12, -inf  ;;  %v7872_v27 = vsel %vm7679_vm10, %v13752_v58, 0.0 }
 0x501   :  { %v7811_v44 = vmax.f32 %v7803_v43, %v7810_v53  ;;  %v7951_v42 = vsel %vm7882_vm6, %v7872_v27, -inf }
 0x502   :  { %v7618_v35 = vpop.xlane.xlu0 %7617  ;;  %v7952_v21 = vmax.f32 %v13901_v40, %v7951_v42 }
 0x503   :  { %v13759_v33 = vpop.xlane.xlu1 %7291 }
 0x504   :  { %v7727_v57 = vsel %vm7681_vm12, %v13759_v33, 0.0  ;;  %v7725_v33 = vsel %vm7679_vm10, %v13748_v59, 0.0  ;;  %v7948_v59 = vmax.f32 %v7940_v61, %v7947_v47  ;;  %v7953_v47 = vsel %vm7882_vm6, %v7873_v39, -inf }
 0x505   :  { %v7808_v15 = vsel %vm7735_vm4, %v7727_v57, -inf  ;;  %v7804_v11 = vsel %vm7735_vm4, %v7725_v33, -inf }
 0x506   :  { %v7304_v25 = vpop.xlane.xlu0 %7303  ;;  %v7809_v51 = vmax.f32 %v7801_v30, %v7808_v15  ;;  %v7954_v15 = vmax.f32 %v13916_v45, %v7953_v47 }
 0x507   :  { %v13775_v63 = vpop.xlane.xlu1 %7613  ;;  %v7730_v46 = vsel %vm7684_vm2, %v7304_v25, 0.0  ;;  %v7805_v25 = vmax.f32 %v13883_v50, %v7804_v11 }
 0x508   :  { %v7874_v3 = vsel %vm7681_vm12, %v13775_v63, 0.0  ;;  %v7875_v63 = vsel %vm7682_vm13, %v7618_v35, 0.0 }
 0x509   :  { %v7955_v13 = vsel %vm7882_vm6, %v7874_v3, -inf  ;;  %v7957_v4 = vsel %vm7882_vm6, %v7875_v63, -inf }
 0x50a   :  { %v7626_v55 = vpop.xlane.xlu0 %7625  ;;  %v7956_v29 = vmax.f32 %v7948_v59, %v7955_v13  ;;  %v7958_v34 = vmax.f32 %v7950_v5, %v7957_v4 }
 0x50b   :  { %v13801_v56 = vpop.xlane.xlu1 %7299  ;;  %v7877_v57 = vsel %vm7684_vm2, %v7626_v55, 0.0 }
 0x50c   :  { %v7729_v28 = vsel %vm7683_vm0, %v13801_v56, 0.0  ;;  %v7961_v9 = vsel %vm7882_vm6, %v7877_v57, -inf }
 0x50d   :  { %v7812_v8 = vsel %vm7735_vm4, %v7729_v28, -inf  ;;  %v7962_v59 = vmax.f32 %v7954_v15, %v7961_v9 }
 0x50e   :  { %v7312_v19 = vpop.xlane.xlu0 %7311  ;;  %v7813_v50 = vmax.f32 %v7805_v25, %v7812_v8 }
 0x50f   :  { %v13844_v17 = vpop.xlane.xlu1 %7621  ;;  %v7732_v35 = vsel %vm7686_vm1, %v7312_v19, 0.0 }
 0x510   :  { %v7818_v0 = vsel %vm7735_vm4, %v7732_v35, -inf  ;;  %v7876_v62 = vsel %vm7683_vm0, %v13844_v17, 0.0 }
 0x511   :  { %v7819_v49 = vmax.f32 %v7811_v44, %v7818_v0  ;;  %v7959_v17 = vsel %vm7882_vm6, %v7876_v62, -inf }
 0x512   :  { %v7634_v22 = vpop.xlane.xlu0 %7633  ;;  %v7960_v30 = vmax.f32 %v7952_v21, %v7959_v17 }
 0x513   :  { %v7308_v31 = vpop.xlane.xlu1 %7307  ;;  %v7879_v32 = vsel %vm7686_vm1, %v7634_v22, 0.0 }
 0x514   :  { %v7731_v6 = vsel %vm7685_vm15, %v7308_v31, 0.0  ;;  %v7814_v31 = vsel %vm7735_vm4, %v7730_v46, -inf  ;;  %v7965_v41 = vsel %vm7882_vm6, %v7879_v32, -inf }
 0x515   :  { %v7816_v60 = vsel %vm7735_vm4, %v7731_v6, -inf  ;;  %v7966_v54 = vmax.f32 %v7958_v34, %v7965_v41  ;;  %v7815_v33 = vmax.f32 %v7807_v18, %v7814_v31 }
 0x516   :  { %v7817_v56 = vmax.f32 %v7809_v51, %v7816_v60  ;;  %v7320_v12 = vpop.xlane.xlu0 %7319 }
 0x517   :  { %v7630_v26 = vpop.xlane.xlu1 %7629  ;;  %v7734_v7 = vsel %vm7688_vm5, %v7320_v12, 0.0 }
 0x518   :  { %v7878_v20 = vsel %vm7685_vm15, %v7630_v26, 0.0  ;;  %v7825_v1 = vmax.f32 %v7817_v56, %v7819_v49  ;;  %v7822_v55 = vsel %vm7735_vm4, %v7734_v7, -inf }
 0x519   :  { %v7963_v58 = vsel %vm7882_vm6, %v7878_v20, -inf  ;;  %v7823_v6 = vmax.f32 %v7815_v33, %v7822_v55 }
 0x51a   :  { %v7964_v24 = vmax.f32 %v7956_v29, %v7963_v58  ;;  %v7642_v16 = vpop.xlane.xlu0 %7641 }
 0x51b   :  { %v7316_v38 = vpop.xlane.xlu1 %7315  ;;  %v7881_v11 = vsel %vm7688_vm5, %v7642_v16, 0.0 }
 0x51c   :  { %v7733_v61 = vsel %vm7687_vm3, %v7316_v38, 0.0  ;;  %v7972_v23 = vmax.f32 %v7964_v24, %v7966_v54  ;;  %v7969_v43 = vsel %vm7882_vm6, %v7881_v11, -inf }
 0x51d   :  { %v7820_v37 = vsel %vm7735_vm4, %v7733_v61, -inf  ;;  %v7970_v63 = vmax.f32 %v7962_v59, %v7969_v43 }
 0x51e   :  { %v7821_v3 = vmax.f32 %v7813_v50, %v7820_v37 }
 0x51f   :  { %v7638_v10 = vpop.xlane.xlu1 %7637 }
 0x520   :  { %v7880_v2 = vsel %vm7687_vm3, %v7638_v10, 0.0  ;;  %v7824_v53 = vmax.f32 %v7821_v3, %v7823_v6 }
 0x521   :  { %v7967_v26 = vsel %vm7882_vm6, %v7880_v2, -inf }
 0x522   :  { %v7968_v52 = vmax.f32 %v7960_v30, %v7967_v26  ;;  %v7826_v51 = vmax.f32 %v7824_v53, %v7825_v1 }
 0x524   :  { %v7971_v36 = vmax.f32 %v7968_v52, %v7970_v63  ;;  %7827 = vmax.xlane.f32.xlu1 %v7826_v51 }
 0x526   :  { %v7973_v40 = vmax.f32 %v7971_v36, %v7972_v23 }
 0x528   :  { %7974 = vmax.xlane.f32.xlu0 %v7973_v40 }
 0x5b1   :  { %v7828_v45 = vpop.xlane.xlu1 %7827 }
 0x5b2   :  { %v7829_v13 = vrot.slane %v7828_v45, 4 }
 0x5b4   :  { %v7830_v60 = vmax.f32 %v7828_v45, %v7829_v13 }
 0x5b5   :  { %v7975_v19 = vpop.xlane.xlu0 %7974 }
 0x5b6   :  { %v7831_v28 = vrot.slane %v7830_v60, 2  ;;  %v7976_v44 = vrot.slane %v7975_v19, 4 }
 0x5b8   :  { %v7977_v20 = vmax.f32 %v7975_v19, %v7976_v44  ;;  %v7832_v38 = vmax.f32 %v7830_v60, %v7831_v28 }
 0x5ba   :  { %v7978_v35 = vrot.slane %v7977_v20, 2  ;;  %v7833_v14 = vrot.slane %v7832_v38, 1 }
 0x5bc   :  { %v7979_v27 = vmax.f32 %v7977_v20, %v7978_v35  ;;  %v7834_v5 = vmax.f32 %v7832_v38, %v7833_v14 }
 0x5be   :  { %9540 = vpush %v7834_v5  ;;  %v7980_v4 = vrot.slane %v7979_v27, 1 }
 0x5c0   :  { %v7981_v0 = vmax.f32 %v7979_v27, %v7980_v4 }
 0x5c2   :  { %9542 = vpush %v7981_v0 }
 0x5ef   :  { %s9541_s20 = spop %9540 }
 0x5f3   :  { %s9543_s21 = spop %9542 }
 0x5f4   :  { %s7983_s22 = smax.f32 %s9543_s21, %s9541_s20 }
 0x5f5   :  { %v7984_v48 = vstv %s7983_s22 }
 0x5f6   :  { %7985 = vst [vmem:[#allocation4] sm:$0xff] %v7984_v48 }
 0x5f7   :  { %9560 = shalt.err (!%p9557_p4)
}
 0x5f8   :  { %s9561_s26 = scalar_lea.hbm %s13992_s3, 128 }
 0x5f9   :  { %p9562_p5 = scmp.ne.s32.totalorder %s13992_s3, %s9561_s26  ;;  %p9565_p6 = scmp.lt.u32.totalorder %s9561_s26, %s13992_s3 }
 0x5fb   :  { %p9567_p7 = pnand %p9565_p6, %p9562_p5 }
 0x5fd   :  { %9570 = shalt.err (!%p9567_p7)
}
 0x5fe   :  { %7995 = dma.vmem_to_hbm [thread:$0]  %s7993_s19, 128, %s13992_s3, [#allocation5]  }
 0x5ff   :  { %9571 = dma.done.wait [#allocation5], 128  }
 0x600   :  { %9572 = vsyncadd [#allocation5], 4294967168 }
 0x601   :  { %7999 = vsyncpa [#allocation5], 1 }

</bundles_post_ra>
